<compile_context>
chip_gen: v6e
topology: v6e:2x2x1
jax: 0.10.0
libtpu: 0.0.40
codegen_flags: <defaults>
</compile_context>

<pallas_src>
import functools

import jax
import jax.numpy as jnp
import numpy as np
from jax.experimental import pallas as pl
from jax.experimental.pallas import tpu as pltpu

LEAKY_SLOPE = 0.01   # nn.LeakyReLU default negative_slope
RES_SCALE = 0.1      # ResBlock default res_scale


# ----------------------------------------------------------------------------
# One-time weight repacking (plain JAX, weights only)
# ----------------------------------------------------------------------------
def _expand_band(w3, W):
    """(3, 3, C, C) HWIO 3x3 conv weight -> (3, W*C, W*C).

    y[h] = A_dn[h] @ band[0] + A[h] @ band[1] + A_up[h] @ band[2], where A is
    the (H, W*C) activation and A_dn/A_up are A shifted by +/-1 row (zero
    fill).  Zero padding along W is folded into the band structure:
        band[dy][wi*C+ci, w*C+co] = w3[dy, dx, ci, co]  with wi = w + dx - 1.
    """
    C = w3.shape[2]
    mats = []
    for dy in range(3):
        acc = jnp.zeros((W, C, W, C), w3.dtype)
        for dx in range(3):
            # S[wi, w] = 1 iff wi == w + dx - 1 (out-of-range wi simply absent
            # -> implements zero padding at the left/right image borders).
            shift = jnp.eye(W, k=1 - dx, dtype=w3.dtype)
            acc = acc + shift[:, None, :, None] * w3[dy, dx][None, :, None, :]
        mats.append(acc.reshape(W * C, W * C))
    return jnp.stack(mats)


def _expand_blockdiag(w1c, W):
    """(C, C) chunk of a 1x1 conv weight -> block-diagonal (W*C, W*C)."""
    C = w1c.shape[0]
    eye = jnp.eye(W, dtype=w1c.dtype)
    return (eye[:, None, :, None] * w1c[None, :, None, :]).reshape(W * C, W * C)


def prepare_params(params, W):
    """Repack weights into lane-dense matmul operands for the fused kernel."""
    C = params["b1"][1].shape[0]
    bands, biases = [], []
    for name in ("b1", "b2", "b3"):
        wa, ba, wb, bb = params[name]
        bands.append(_expand_band(wa, W))
        biases.append(jnp.tile(ba, W))           # bias_wide[w*C + co] = b[co]
        bands.append(_expand_band(wb, W))
        biases.append(jnp.tile(bb, W))
    bdiags = []
    for name, k in (("c1", 2), ("c2", 3), ("c3", 4)):
        w1, b1 = params[name]
        for j in range(k):                       # chunk j multiplies stream j
            bdiags.append(_expand_blockdiag(w1[j * C:(j + 1) * C], W))
        biases.append(jnp.tile(b1, W))
    return (jnp.stack(bands),                    # (6, 3, W*C, W*C)
            jnp.stack(bdiags),                   # (9, W*C, W*C)
            jnp.stack(biases))                   # (9, W*C)


# ----------------------------------------------------------------------------
# Fused Pallas kernel: full CascadingBlock forward, one image per grid step
# ----------------------------------------------------------------------------
def _cascading_kernel(x_ref, bands_ref, bdiags_ref, biases_ref, o_ref, *, H, WC):
    f32 = jnp.float32

    # Row-shift matrices (H, H) built from 2-D iota; shifting via tiny MXU
    # matmuls avoids any unaligned sublane slicing / relayout copies.
    row = jax.lax.broadcasted_iota(jnp.int32, (H, H), 0)
    col = jax.lax.broadcasted_iota(jnp.int32, (H, H), 1)
    sdn = (row == col + 1).astype(f32)   # (sdn @ A)[h] = A[h-1], zero at h=0
    sup = (col == row + 1).astype(f32)   # (sup @ A)[h] = A[h+1], zero at h=H-1

    biases = biases_ref[...].astype(f32)          # (9, WC)

    def conv3(act, idx, lrelu):
        """3x3 conv (zero pad 1) + bias on a lane-dense (H, W*C) activation."""
        a_dn = jnp.dot(sdn, act, preferred_element_type=f32)
        a_up = jnp.dot(sup, act, preferred_element_type=f32)
        acc = jnp.dot(a_dn, bands_ref[idx, 0], preferred_element_type=f32)
        acc = acc + jnp.dot(act, bands_ref[idx, 1], preferred_element_type=f32)
        acc = acc + jnp.dot(a_up, bands_ref[idx, 2], preferred_element_type=f32)
        acc = acc + biases[idx][None, :]
        if lrelu:
            acc = jnp.where(acc >= 0, acc, LEAKY_SLOPE * acc)
        return acc

    def res_block(act, i):
        h = conv3(act, 2 * i, True)               # conv3x3 -> LeakyReLU
        h = conv3(h, 2 * i + 1, False)            # conv3x3
        return act + RES_SCALE * h                # x + 0.1 * body(x)

    def conv1(streams, bd_start, bias_idx):
        """1x1 conv on the (virtual) channel-concat of `streams`."""
        acc = jnp.dot(streams[0], bdiags_ref[bd_start],
                      preferred_element_type=f32)
        for j in range(1, len(streams)):
            acc = acc + jnp.dot(streams[j], bdiags_ref[bd_start + j],
                                preferred_element_type=f32)
        return acc + biases[bias_idx][None, :]

    x = x_ref[0].astype(f32)                      # (H, W*C)
    r1 = res_block(x, 0)                          # b1(x)
    y1 = conv1([x, r1], 0, 6)                     # c1(cat[x, r1])
    r2 = res_block(y1, 1)                         # b2(.)
    y2 = conv1([x, r1, r2], 2, 7)                 # c2(cat[x, r1, r2])
    r3 = res_block(y2, 2)                         # b3(.)
    out = conv1([x, r1, r2, r3], 5, 8)            # c3(cat[x, r1, r2, r3])
    o_ref[0] = out.astype(o_ref.dtype)


def cascading_block(x, bands, bdiags, biases):
    N, H, W, C = x.shape
    WC = W * C
    x_wc = x.reshape(N, H, WC)                    # lane-dense HBM layout (free)

    kern = functools.partial(_cascading_kernel, H=H, WC=WC)
    flops = N * (6 * (2 * 2 * H * H * WC + 3 * 2 * H * WC * WC)
                 + 9 * 2 * H * WC * WC)
    bytes_accessed = 4 * (x_wc.size + N * H * WC
                          + bands.size + bdiags.size + biases.size)

    out = pl.pallas_call(
        kern,
        out_shape=jax.ShapeDtypeStruct((N, H, WC), x.dtype),
        grid=(N,),
        in_specs=[
            pl.BlockSpec((1, H, WC), lambda n: (n, 0, 0)),
            pl.BlockSpec(bands.shape, lambda n: (0, 0, 0, 0)),
            pl.BlockSpec(bdiags.shape, lambda n: (0, 0, 0)),
            pl.BlockSpec(biases.shape, lambda n: (0, 0)),
        ],
        out_specs=pl.BlockSpec((1, H, WC), lambda n: (n, 0, 0)),
        compiler_params=pltpu.CompilerParams(
            dimension_semantics=("parallel",),
            vmem_limit_bytes=32 * 1024 * 1024),
        cost_estimate=pl.CostEstimate(
            flops=flops, transcendentals=0, bytes_accessed=bytes_accessed),
    )(x_wc, bands, bdiags, biases)
    return out.reshape(N, H, W, C)


# ----------------------------------------------------------------------------
# Pure-JAX reference (for verification)
# ----------------------------------------------------------------------------
def _ref_conv(x, w, b, padding):
    y = jax.lax.conv_general_dilated(
        x, w, window_strides=(1, 1), padding=padding,
        dimension_numbers=("NHWC", "HWIO", "NHWC"))
    return y + b


def _ref_res_block(x, params):
    wa, ba, wb, bb = params
    h = _ref_conv(x, wa, ba, "SAME")
    h = jnp.where(h >= 0, h, LEAKY_SLOPE * h)
    h = _ref_conv(h, wb, bb, "SAME")
    return x + RES_SCALE * h


def _ref_cascading_block(x, params):
    def c(x, p):
        w, b = p
        return _ref_conv(x, w.reshape(1, 1, *w.shape), b, "VALID")
    x = jnp.concatenate([x, _ref_res_block(x, params["b1"])], axis=-1)
    x = jnp.concatenate(
        [x, _ref_res_block(c(x, params["c1"]), params["b2"])], axis=-1)
    x = jnp.concatenate(
        [x, _ref_res_block(c(x, params["c2"]), params["b3"])], axis=-1)
    return c(x, params["c3"])


# ----------------------------------------------------------------------------
# Deterministic parameter init (PyTorch-equivalent shapes, HWIO / (Cin,Cout))
# ----------------------------------------------------------------------------
def init_params(key, C):
    ks = jax.random.split(key, 12)

    def conv3_p(k1, k2, cin, cout):
        return (0.05 * jax.random.normal(k1, (3, 3, cin, cout), jnp.float32),
                0.05 * jax.random.normal(k2, (cout,), jnp.float32))

    def conv1_p(k1, k2, cin, cout):
        return (0.05 * jax.random.normal(k1, (cin, cout), jnp.float32),
                0.05 * jax.random.normal(k2, (cout,), jnp.float32))

    params = {}
    for i, name in enumerate(["b1", "b2", "b3"]):
        wa, ba = conv3_p(ks[4 * i + 0], ks[4 * i + 1], C, C)
        wb, bb = conv3_p(ks[4 * i + 2], ks[4 * i + 3], C, C)
        params[name] = (wa, ba, wb, bb)
    kc = jax.random.split(jax.random.fold_in(key, 99), 6)
    params["c1"] = conv1_p(kc[0], kc[1], 2 * C, C)
    params["c2"] = conv1_p(kc[2], kc[3], 3 * C, C)
    params["c3"] = conv1_p(kc[4], kc[5], 4 * C, C)
    return params


# ----------------------------------------------------------------------------
if __name__ == "__main__":
    key = jax.random.PRNGKey(0)
    N, H, W, C = 2, 16, 16, 8       # NHWC (PyTorch equivalent: [2, 8, 16, 16])
    kx, kp = jax.random.split(key)
    x = jax.random.normal(kx, (N, H, W, C), jnp.float32)
    params = init_params(kp, C)

    # One-time weight layout transform (weights only).
    prepped = prepare_params(params, W)

    fwd = jax.jit(cascading_block)
    out = jax.block_until_ready(fwd(x, *prepped))

    ref = _ref_cascading_block(x, params)
    assert out.shape == (N, H, W, C)
    np.testing.assert_allclose(np.asarray(out), np.asarray(ref),
                               rtol=1e-4, atol=1e-4)
    print("KERNEL_OK")
</pallas_src>

<mosaic_0001>
module attributes {stable_mosaic.version = 11 : i64} {
  func.func @_cascading_kernel(%arg0: i32, %arg1: memref<1x16x128xf32, #tpu.memory_space<vmem>>, %arg2: memref<6x3x128x128xf32, #tpu.memory_space<vmem>>, %arg3: memref<9x128x128xf32, #tpu.memory_space<vmem>>, %arg4: memref<9x128xf32, #tpu.memory_space<vmem>>, %arg5: memref<1x16x128xf32, #tpu.memory_space<vmem>>) attributes {dimension_semantics = [#tpu.dimension_semantics<parallel>], iteration_bounds = array<i64: 2>, scalar_prefetch = 0 : i64, scratch_operands = 0 : i64, tpu.core_type = #tpu.core_type<tc>, window_params = [{transform_indices = @transform_0, window_bounds = array<i64: 1, 16, 128>}, {pipeline_mode = #tpu.pipeline_mode<synchronous>, transform_indices = @transform_1, window_bounds = array<i64: 6, 3, 128, 128>}, {pipeline_mode = #tpu.pipeline_mode<synchronous>, transform_indices = @transform_2, window_bounds = array<i64: 9, 128, 128>}, {pipeline_mode = #tpu.pipeline_mode<synchronous>, transform_indices = @transform_3, window_bounds = array<i64: 9, 128>}, {transform_indices = @transform_4, window_bounds = array<i64: 1, 16, 128>}]} {
    %0 = tpu.iota {dimensions = array<i32: 0>} : vector<16x16xi32>
    %1 = tpu.iota {dimensions = array<i32: 1>} : vector<16x16xi32>
    %c1_i32 = arith.constant 1 : i32
    %2 = vector.broadcast %c1_i32 : i32 to vector<16x16xi32>
    %3 = arith.addi %1, %2 : vector<16x16xi32>
    %4 = arith.cmpi eq, %0, %3 : vector<16x16xi32>
    %5 = arith.extui %4 : vector<16x16xi1> to vector<16x16xi32>
    %6 = arith.sitofp %5 : vector<16x16xi32> to vector<16x16xf32>
    %c1_i32_0 = arith.constant 1 : i32
    %7 = vector.broadcast %c1_i32_0 : i32 to vector<16x16xi32>
    %8 = arith.addi %0, %7 : vector<16x16xi32>
    %9 = arith.cmpi eq, %1, %8 : vector<16x16xi32>
    %10 = arith.extui %9 : vector<16x16xi1> to vector<16x16xi32>
    %11 = arith.sitofp %10 : vector<16x16xi32> to vector<16x16xf32>
    %c0 = arith.constant 0 : index
    %c0_1 = arith.constant 0 : index
    %12 = vector.load %arg4[%c0, %c0_1] : memref<9x128xf32, #tpu.memory_space<vmem>>, vector<9x128xf32>
    %c0_2 = arith.constant 0 : index
    %c0_3 = arith.constant 0 : index
    %c0_4 = arith.constant 0 : index
    %13 = vector.load %arg1[%c0_2, %c0_3, %c0_4] : memref<1x16x128xf32, #tpu.memory_space<vmem>>, vector<1x16x128xf32>
    %14 = vector.shape_cast %13 : vector<1x16x128xf32> to vector<16x128xf32>
    %cst = arith.constant dense<0.000000e+00> : vector<16x128xf32>
    %15 = tpu.matmul %6, %14, %cst {dimension_numbers = #tpu.dot_dimension_numbers<[1], [0], [0], [1], [0, 0, 1, 1], [], []>} : vector<16x16xf32>, vector<16x128xf32>, vector<16x128xf32> -> vector<16x128xf32>
    %cst_5 = arith.constant dense<0.000000e+00> : vector<16x128xf32>
    %16 = tpu.matmul %11, %14, %cst_5 {dimension_numbers = #tpu.dot_dimension_numbers<[1], [0], [0], [1], [0, 0, 1, 1], [], []>} : vector<16x16xf32>, vector<16x128xf32>, vector<16x128xf32> -> vector<16x128xf32>
    %c0_6 = arith.constant 0 : index
    %c0_7 = arith.constant 0 : index
    %c0_8 = arith.constant 0 : index
    %c0_9 = arith.constant 0 : index
    %17 = vector.load %arg2[%c0_6, %c0_7, %c0_8, %c0_9] : memref<6x3x128x128xf32, #tpu.memory_space<vmem>>, vector<1x1x128x128xf32>
    %18 = vector.shape_cast %17 : vector<1x1x128x128xf32> to vector<128x128xf32>
    %cst_10 = arith.constant dense<0.000000e+00> : vector<16x128xf32>
    %19 = tpu.matmul %15, %18, %cst_10 {dimension_numbers = #tpu.dot_dimension_numbers<[1], [0], [0], [1], [0, 0, 1, 1], [], []>} : vector<16x128xf32>, vector<128x128xf32>, vector<16x128xf32> -> vector<16x128xf32>
    %c0_11 = arith.constant 0 : index
    %c1 = arith.constant 1 : index
    %c0_12 = arith.constant 0 : index
    %c0_13 = arith.constant 0 : index
    %20 = vector.load %arg2[%c0_11, %c1, %c0_12, %c0_13] : memref<6x3x128x128xf32, #tpu.memory_space<vmem>>, vector<1x1x128x128xf32>
    %21 = vector.shape_cast %20 : vector<1x1x128x128xf32> to vector<128x128xf32>
    %cst_14 = arith.constant dense<0.000000e+00> : vector<16x128xf32>
    %22 = tpu.matmul %14, %21, %cst_14 {dimension_numbers = #tpu.dot_dimension_numbers<[1], [0], [0], [1], [0, 0, 1, 1], [], []>} : vector<16x128xf32>, vector<128x128xf32>, vector<16x128xf32> -> vector<16x128xf32>
    %23 = arith.addf %19, %22 : vector<16x128xf32>
    %c0_15 = arith.constant 0 : index
    %c2 = arith.constant 2 : index
    %c0_16 = arith.constant 0 : index
    %c0_17 = arith.constant 0 : index
    %24 = vector.load %arg2[%c0_15, %c2, %c0_16, %c0_17] : memref<6x3x128x128xf32, #tpu.memory_space<vmem>>, vector<1x1x128x128xf32>
    %25 = vector.shape_cast %24 : vector<1x1x128x128xf32> to vector<128x128xf32>
    %cst_18 = arith.constant dense<0.000000e+00> : vector<16x128xf32>
    %26 = tpu.matmul %16, %25, %cst_18 {dimension_numbers = #tpu.dot_dimension_numbers<[1], [0], [0], [1], [0, 0, 1, 1], [], []>} : vector<16x128xf32>, vector<128x128xf32>, vector<16x128xf32> -> vector<16x128xf32>
    %27 = arith.addf %23, %26 : vector<16x128xf32>
    %28 = vector.extract_strided_slice %12 {offsets = [0, 0], sizes = [1, 128], strides = [1, 1]} : vector<9x128xf32> to vector<1x128xf32>
    %29 = vector.shape_cast %28 : vector<1x128xf32> to vector<128xf32>
    %30 = vector.shape_cast %29 : vector<128xf32> to vector<1x128xf32>
    %31 = vector.broadcast %30 : vector<1x128xf32> to vector<16x128xf32>
    %32 = arith.addf %27, %31 : vector<16x128xf32>
    %cst_19 = arith.constant 0.000000e+00 : f32
    %33 = vector.broadcast %cst_19 : f32 to vector<16x128xf32>
    %34 = arith.cmpf oge, %32, %33 : vector<16x128xf32>
    %cst_20 = arith.constant 0.00999999977 : f32
    %35 = vector.broadcast %cst_20 : f32 to vector<16x128xf32>
    %36 = arith.mulf %35, %32 : vector<16x128xf32>
    %37 = arith.select %34, %32, %36 : vector<16x128xi1>, vector<16x128xf32>
    %cst_21 = arith.constant dense<0.000000e+00> : vector<16x128xf32>
    %38 = tpu.matmul %6, %37, %cst_21 {dimension_numbers = #tpu.dot_dimension_numbers<[1], [0], [0], [1], [0, 0, 1, 1], [], []>} : vector<16x16xf32>, vector<16x128xf32>, vector<16x128xf32> -> vector<16x128xf32>
    %cst_22 = arith.constant dense<0.000000e+00> : vector<16x128xf32>
    %39 = tpu.matmul %11, %37, %cst_22 {dimension_numbers = #tpu.dot_dimension_numbers<[1], [0], [0], [1], [0, 0, 1, 1], [], []>} : vector<16x16xf32>, vector<16x128xf32>, vector<16x128xf32> -> vector<16x128xf32>
    %c1_23 = arith.constant 1 : index
    %c0_24 = arith.constant 0 : index
    %c0_25 = arith.constant 0 : index
    %c0_26 = arith.constant 0 : index
    %40 = vector.load %arg2[%c1_23, %c0_24, %c0_25, %c0_26] : memref<6x3x128x128xf32, #tpu.memory_space<vmem>>, vector<1x1x128x128xf32>
    %41 = vector.shape_cast %40 : vector<1x1x128x128xf32> to vector<128x128xf32>
    %cst_27 = arith.constant dense<0.000000e+00> : vector<16x128xf32>
    %42 = tpu.matmul %38, %41, %cst_27 {dimension_numbers = #tpu.dot_dimension_numbers<[1], [0], [0], [1], [0, 0, 1, 1], [], []>} : vector<16x128xf32>, vector<128x128xf32>, vector<16x128xf32> -> vector<16x128xf32>
    %c1_28 = arith.constant 1 : index
    %c1_29 = arith.constant 1 : index
    %c0_30 = arith.constant 0 : index
    %c0_31 = arith.constant 0 : index
    %43 = vector.load %arg2[%c1_28, %c1_29, %c0_30, %c0_31] : memref<6x3x128x128xf32, #tpu.memory_space<vmem>>, vector<1x1x128x128xf32>
    %44 = vector.shape_cast %43 : vector<1x1x128x128xf32> to vector<128x128xf32>
    %cst_32 = arith.constant dense<0.000000e+00> : vector<16x128xf32>
    %45 = tpu.matmul %37, %44, %cst_32 {dimension_numbers = #tpu.dot_dimension_numbers<[1], [0], [0], [1], [0, 0, 1, 1], [], []>} : vector<16x128xf32>, vector<128x128xf32>, vector<16x128xf32> -> vector<16x128xf32>
    %46 = arith.addf %42, %45 : vector<16x128xf32>
    %c1_33 = arith.constant 1 : index
    %c2_34 = arith.constant 2 : index
    %c0_35 = arith.constant 0 : index
    %c0_36 = arith.constant 0 : index
    %47 = vector.load %arg2[%c1_33, %c2_34, %c0_35, %c0_36] : memref<6x3x128x128xf32, #tpu.memory_space<vmem>>, vector<1x1x128x128xf32>
    %48 = vector.shape_cast %47 : vector<1x1x128x128xf32> to vector<128x128xf32>
    %cst_37 = arith.constant dense<0.000000e+00> : vector<16x128xf32>
    %49 = tpu.matmul %39, %48, %cst_37 {dimension_numbers = #tpu.dot_dimension_numbers<[1], [0], [0], [1], [0, 0, 1, 1], [], []>} : vector<16x128xf32>, vector<128x128xf32>, vector<16x128xf32> -> vector<16x128xf32>
    %50 = arith.addf %46, %49 : vector<16x128xf32>
    %51 = vector.extract_strided_slice %12 {offsets = [1, 0], sizes = [1, 128], strides = [1, 1]} : vector<9x128xf32> to vector<1x128xf32>
    %52 = vector.shape_cast %51 : vector<1x128xf32> to vector<128xf32>
    %53 = vector.shape_cast %52 : vector<128xf32> to vector<1x128xf32>
    %54 = vector.broadcast %53 : vector<1x128xf32> to vector<16x128xf32>
    %55 = arith.addf %50, %54 : vector<16x128xf32>
    %cst_38 = arith.constant 1.000000e-01 : f32
    %56 = vector.broadcast %cst_38 : f32 to vector<16x128xf32>
    %57 = arith.mulf %56, %55 : vector<16x128xf32>
    %58 = arith.addf %14, %57 : vector<16x128xf32>
    %c0_39 = arith.constant 0 : index
    %c0_40 = arith.constant 0 : index
    %c0_41 = arith.constant 0 : index
    %59 = vector.load %arg3[%c0_39, %c0_40, %c0_41] : memref<9x128x128xf32, #tpu.memory_space<vmem>>, vector<1x128x128xf32>
    %60 = vector.shape_cast %59 : vector<1x128x128xf32> to vector<128x128xf32>
    %cst_42 = arith.constant dense<0.000000e+00> : vector<16x128xf32>
    %61 = tpu.matmul %14, %60, %cst_42 {dimension_numbers = #tpu.dot_dimension_numbers<[1], [0], [0], [1], [0, 0, 1, 1], [], []>} : vector<16x128xf32>, vector<128x128xf32>, vector<16x128xf32> -> vector<16x128xf32>
    %c1_43 = arith.constant 1 : index
    %c0_44 = arith.constant 0 : index
    %c0_45 = arith.constant 0 : index
    %62 = vector.load %arg3[%c1_43, %c0_44, %c0_45] : memref<9x128x128xf32, #tpu.memory_space<vmem>>, vector<1x128x128xf32>
    %63 = vector.shape_cast %62 : vector<1x128x128xf32> to vector<128x128xf32>
    %cst_46 = arith.constant dense<0.000000e+00> : vector<16x128xf32>
    %64 = tpu.matmul %58, %63, %cst_46 {dimension_numbers = #tpu.dot_dimension_numbers<[1], [0], [0], [1], [0, 0, 1, 1], [], []>} : vector<16x128xf32>, vector<128x128xf32>, vector<16x128xf32> -> vector<16x128xf32>
    %65 = arith.addf %61, %64 : vector<16x128xf32>
    %66 = vector.extract_strided_slice %12 {offsets = [6, 0], sizes = [1, 128], strides = [1, 1]} : vector<9x128xf32> to vector<1x128xf32>
    %67 = vector.shape_cast %66 : vector<1x128xf32> to vector<128xf32>
    %68 = vector.shape_cast %67 : vector<128xf32> to vector<1x128xf32>
    %69 = vector.broadcast %68 : vector<1x128xf32> to vector<16x128xf32>
    %70 = arith.addf %65, %69 : vector<16x128xf32>
    %cst_47 = arith.constant dense<0.000000e+00> : vector<16x128xf32>
    %71 = tpu.matmul %6, %70, %cst_47 {dimension_numbers = #tpu.dot_dimension_numbers<[1], [0], [0], [1], [0, 0, 1, 1], [], []>} : vector<16x16xf32>, vector<16x128xf32>, vector<16x128xf32> -> vector<16x128xf32>
    %cst_48 = arith.constant dense<0.000000e+00> : vector<16x128xf32>
    %72 = tpu.matmul %11, %70, %cst_48 {dimension_numbers = #tpu.dot_dimension_numbers<[1], [0], [0], [1], [0, 0, 1, 1], [], []>} : vector<16x16xf32>, vector<16x128xf32>, vector<16x128xf32> -> vector<16x128xf32>
    %c2_49 = arith.constant 2 : index
    %c0_50 = arith.constant 0 : index
    %c0_51 = arith.constant 0 : index
    %c0_52 = arith.constant 0 : index
    %73 = vector.load %arg2[%c2_49, %c0_50, %c0_51, %c0_52] : memref<6x3x128x128xf32, #tpu.memory_space<vmem>>, vector<1x1x128x128xf32>
    %74 = vector.shape_cast %73 : vector<1x1x128x128xf32> to vector<128x128xf32>
    %cst_53 = arith.constant dense<0.000000e+00> : vector<16x128xf32>
    %75 = tpu.matmul %71, %74, %cst_53 {dimension_numbers = #tpu.dot_dimension_numbers<[1], [0], [0], [1], [0, 0, 1, 1], [], []>} : vector<16x128xf32>, vector<128x128xf32>, vector<16x128xf32> -> vector<16x128xf32>
    %c2_54 = arith.constant 2 : index
    %c1_55 = arith.constant 1 : index
    %c0_56 = arith.constant 0 : index
    %c0_57 = arith.constant 0 : index
    %76 = vector.load %arg2[%c2_54, %c1_55, %c0_56, %c0_57] : memref<6x3x128x128xf32, #tpu.memory_space<vmem>>, vector<1x1x128x128xf32>
    %77 = vector.shape_cast %76 : vector<1x1x128x128xf32> to vector<128x128xf32>
    %cst_58 = arith.constant dense<0.000000e+00> : vector<16x128xf32>
    %78 = tpu.matmul %70, %77, %cst_58 {dimension_numbers = #tpu.dot_dimension_numbers<[1], [0], [0], [1], [0, 0, 1, 1], [], []>} : vector<16x128xf32>, vector<128x128xf32>, vector<16x128xf32> -> vector<16x128xf32>
    %79 = arith.addf %75, %78 : vector<16x128xf32>
    %c2_59 = arith.constant 2 : index
    %c2_60 = arith.constant 2 : index
    %c0_61 = arith.constant 0 : index
    %c0_62 = arith.constant 0 : index
    %80 = vector.load %arg2[%c2_59, %c2_60, %c0_61, %c0_62] : memref<6x3x128x128xf32, #tpu.memory_space<vmem>>, vector<1x1x128x128xf32>
    %81 = vector.shape_cast %80 : vector<1x1x128x128xf32> to vector<128x128xf32>
    %cst_63 = arith.constant dense<0.000000e+00> : vector<16x128xf32>
    %82 = tpu.matmul %72, %81, %cst_63 {dimension_numbers = #tpu.dot_dimension_numbers<[1], [0], [0], [1], [0, 0, 1, 1], [], []>} : vector<16x128xf32>, vector<128x128xf32>, vector<16x128xf32> -> vector<16x128xf32>
    %83 = arith.addf %79, %82 : vector<16x128xf32>
    %84 = vector.extract_strided_slice %12 {offsets = [2, 0], sizes = [1, 128], strides = [1, 1]} : vector<9x128xf32> to vector<1x128xf32>
    %85 = vector.shape_cast %84 : vector<1x128xf32> to vector<128xf32>
    %86 = vector.shape_cast %85 : vector<128xf32> to vector<1x128xf32>
    %87 = vector.broadcast %86 : vector<1x128xf32> to vector<16x128xf32>
    %88 = arith.addf %83, %87 : vector<16x128xf32>
    %cst_64 = arith.constant 0.000000e+00 : f32
    %89 = vector.broadcast %cst_64 : f32 to vector<16x128xf32>
    %90 = arith.cmpf oge, %88, %89 : vector<16x128xf32>
    %cst_65 = arith.constant 0.00999999977 : f32
    %91 = vector.broadcast %cst_65 : f32 to vector<16x128xf32>
    %92 = arith.mulf %91, %88 : vector<16x128xf32>
    %93 = arith.select %90, %88, %92 : vector<16x128xi1>, vector<16x128xf32>
    %cst_66 = arith.constant dense<0.000000e+00> : vector<16x128xf32>
    %94 = tpu.matmul %6, %93, %cst_66 {dimension_numbers = #tpu.dot_dimension_numbers<[1], [0], [0], [1], [0, 0, 1, 1], [], []>} : vector<16x16xf32>, vector<16x128xf32>, vector<16x128xf32> -> vector<16x128xf32>
    %cst_67 = arith.constant dense<0.000000e+00> : vector<16x128xf32>
    %95 = tpu.matmul %11, %93, %cst_67 {dimension_numbers = #tpu.dot_dimension_numbers<[1], [0], [0], [1], [0, 0, 1, 1], [], []>} : vector<16x16xf32>, vector<16x128xf32>, vector<16x128xf32> -> vector<16x128xf32>
    %c3 = arith.constant 3 : index
    %c0_68 = arith.constant 0 : index
    %c0_69 = arith.constant 0 : index
    %c0_70 = arith.constant 0 : index
    %96 = vector.load %arg2[%c3, %c0_68, %c0_69, %c0_70] : memref<6x3x128x128xf32, #tpu.memory_space<vmem>>, vector<1x1x128x128xf32>
    %97 = vector.shape_cast %96 : vector<1x1x128x128xf32> to vector<128x128xf32>
    %cst_71 = arith.constant dense<0.000000e+00> : vector<16x128xf32>
    %98 = tpu.matmul %94, %97, %cst_71 {dimension_numbers = #tpu.dot_dimension_numbers<[1], [0], [0], [1], [0, 0, 1, 1], [], []>} : vector<16x128xf32>, vector<128x128xf32>, vector<16x128xf32> -> vector<16x128xf32>
    %c3_72 = arith.constant 3 : index
    %c1_73 = arith.constant 1 : index
    %c0_74 = arith.constant 0 : index
    %c0_75 = arith.constant 0 : index
    %99 = vector.load %arg2[%c3_72, %c1_73, %c0_74, %c0_75] : memref<6x3x128x128xf32, #tpu.memory_space<vmem>>, vector<1x1x128x128xf32>
    %100 = vector.shape_cast %99 : vector<1x1x128x128xf32> to vector<128x128xf32>
    %cst_76 = arith.constant dense<0.000000e+00> : vector<16x128xf32>
    %101 = tpu.matmul %93, %100, %cst_76 {dimension_numbers = #tpu.dot_dimension_numbers<[1], [0], [0], [1], [0, 0, 1, 1], [], []>} : vector<16x128xf32>, vector<128x128xf32>, vector<16x128xf32> -> vector<16x128xf32>
    %102 = arith.addf %98, %101 : vector<16x128xf32>
    %c3_77 = arith.constant 3 : index
    %c2_78 = arith.constant 2 : index
    %c0_79 = arith.constant 0 : index
    %c0_80 = arith.constant 0 : index
    %103 = vector.load %arg2[%c3_77, %c2_78, %c0_79, %c0_80] : memref<6x3x128x128xf32, #tpu.memory_space<vmem>>, vector<1x1x128x128xf32>
    %104 = vector.shape_cast %103 : vector<1x1x128x128xf32> to vector<128x128xf32>
    %cst_81 = arith.constant dense<0.000000e+00> : vector<16x128xf32>
    %105 = tpu.matmul %95, %104, %cst_81 {dimension_numbers = #tpu.dot_dimension_numbers<[1], [0], [0], [1], [0, 0, 1, 1], [], []>} : vector<16x128xf32>, vector<128x128xf32>, vector<16x128xf32> -> vector<16x128xf32>
    %106 = arith.addf %102, %105 : vector<16x128xf32>
    %107 = vector.extract_strided_slice %12 {offsets = [3, 0], sizes = [1, 128], strides = [1, 1]} : vector<9x128xf32> to vector<1x128xf32>
    %108 = vector.shape_cast %107 : vector<1x128xf32> to vector<128xf32>
    %109 = vector.shape_cast %108 : vector<128xf32> to vector<1x128xf32>
    %110 = vector.broadcast %109 : vector<1x128xf32> to vector<16x128xf32>
    %111 = arith.addf %106, %110 : vector<16x128xf32>
    %cst_82 = arith.constant 1.000000e-01 : f32
    %112 = vector.broadcast %cst_82 : f32 to vector<16x128xf32>
    %113 = arith.mulf %112, %111 : vector<16x128xf32>
    %114 = arith.addf %70, %113 : vector<16x128xf32>
    %c2_83 = arith.constant 2 : index
    %c0_84 = arith.constant 0 : index
    %c0_85 = arith.constant 0 : index
    %115 = vector.load %arg3[%c2_83, %c0_84, %c0_85] : memref<9x128x128xf32, #tpu.memory_space<vmem>>, vector<1x128x128xf32>
    %116 = vector.shape_cast %115 : vector<1x128x128xf32> to vector<128x128xf32>
    %cst_86 = arith.constant dense<0.000000e+00> : vector<16x128xf32>
    %117 = tpu.matmul %14, %116, %cst_86 {dimension_numbers = #tpu.dot_dimension_numbers<[1], [0], [0], [1], [0, 0, 1, 1], [], []>} : vector<16x128xf32>, vector<128x128xf32>, vector<16x128xf32> -> vector<16x128xf32>
    %c3_87 = arith.constant 3 : index
    %c0_88 = arith.constant 0 : index
    %c0_89 = arith.constant 0 : index
    %118 = vector.load %arg3[%c3_87, %c0_88, %c0_89] : memref<9x128x128xf32, #tpu.memory_space<vmem>>, vector<1x128x128xf32>
    %119 = vector.shape_cast %118 : vector<1x128x128xf32> to vector<128x128xf32>
    %cst_90 = arith.constant dense<0.000000e+00> : vector<16x128xf32>
    %120 = tpu.matmul %58, %119, %cst_90 {dimension_numbers = #tpu.dot_dimension_numbers<[1], [0], [0], [1], [0, 0, 1, 1], [], []>} : vector<16x128xf32>, vector<128x128xf32>, vector<16x128xf32> -> vector<16x128xf32>
    %121 = arith.addf %117, %120 : vector<16x128xf32>
    %c4 = arith.constant 4 : index
    %c0_91 = arith.constant 0 : index
    %c0_92 = arith.constant 0 : index
    %122 = vector.load %arg3[%c4, %c0_91, %c0_92] : memref<9x128x128xf32, #tpu.memory_space<vmem>>, vector<1x128x128xf32>
    %123 = vector.shape_cast %122 : vector<1x128x128xf32> to vector<128x128xf32>
    %cst_93 = arith.constant dense<0.000000e+00> : vector<16x128xf32>
    %124 = tpu.matmul %114, %123, %cst_93 {dimension_numbers = #tpu.dot_dimension_numbers<[1], [0], [0], [1], [0, 0, 1, 1], [], []>} : vector<16x128xf32>, vector<128x128xf32>, vector<16x128xf32> -> vector<16x128xf32>
    %125 = arith.addf %121, %124 : vector<16x128xf32>
    %126 = vector.extract_strided_slice %12 {offsets = [7, 0], sizes = [1, 128], strides = [1, 1]} : vector<9x128xf32> to vector<1x128xf32>
    %127 = vector.shape_cast %126 : vector<1x128xf32> to vector<128xf32>
    %128 = vector.shape_cast %127 : vector<128xf32> to vector<1x128xf32>
    %129 = vector.broadcast %128 : vector<1x128xf32> to vector<16x128xf32>
    %130 = arith.addf %125, %129 : vector<16x128xf32>
    %cst_94 = arith.constant dense<0.000000e+00> : vector<16x128xf32>
    %131 = tpu.matmul %6, %130, %cst_94 {dimension_numbers = #tpu.dot_dimension_numbers<[1], [0], [0], [1], [0, 0, 1, 1], [], []>} : vector<16x16xf32>, vector<16x128xf32>, vector<16x128xf32> -> vector<16x128xf32>
    %cst_95 = arith.constant dense<0.000000e+00> : vector<16x128xf32>
    %132 = tpu.matmul %11, %130, %cst_95 {dimension_numbers = #tpu.dot_dimension_numbers<[1], [0], [0], [1], [0, 0, 1, 1], [], []>} : vector<16x16xf32>, vector<16x128xf32>, vector<16x128xf32> -> vector<16x128xf32>
    %c4_96 = arith.constant 4 : index
    %c0_97 = arith.constant 0 : index
    %c0_98 = arith.constant 0 : index
    %c0_99 = arith.constant 0 : index
    %133 = vector.load %arg2[%c4_96, %c0_97, %c0_98, %c0_99] : memref<6x3x128x128xf32, #tpu.memory_space<vmem>>, vector<1x1x128x128xf32>
    %134 = vector.shape_cast %133 : vector<1x1x128x128xf32> to vector<128x128xf32>
    %cst_100 = arith.constant dense<0.000000e+00> : vector<16x128xf32>
    %135 = tpu.matmul %131, %134, %cst_100 {dimension_numbers = #tpu.dot_dimension_numbers<[1], [0], [0], [1], [0, 0, 1, 1], [], []>} : vector<16x128xf32>, vector<128x128xf32>, vector<16x128xf32> -> vector<16x128xf32>
    %c4_101 = arith.constant 4 : index
    %c1_102 = arith.constant 1 : index
    %c0_103 = arith.constant 0 : index
    %c0_104 = arith.constant 0 : index
    %136 = vector.load %arg2[%c4_101, %c1_102, %c0_103, %c0_104] : memref<6x3x128x128xf32, #tpu.memory_space<vmem>>, vector<1x1x128x128xf32>
    %137 = vector.shape_cast %136 : vector<1x1x128x128xf32> to vector<128x128xf32>
    %cst_105 = arith.constant dense<0.000000e+00> : vector<16x128xf32>
    %138 = tpu.matmul %130, %137, %cst_105 {dimension_numbers = #tpu.dot_dimension_numbers<[1], [0], [0], [1], [0, 0, 1, 1], [], []>} : vector<16x128xf32>, vector<128x128xf32>, vector<16x128xf32> -> vector<16x128xf32>
    %139 = arith.addf %135, %138 : vector<16x128xf32>
    %c4_106 = arith.constant 4 : index
    %c2_107 = arith.constant 2 : index
    %c0_108 = arith.constant 0 : index
    %c0_109 = arith.constant 0 : index
    %140 = vector.load %arg2[%c4_106, %c2_107, %c0_108, %c0_109] : memref<6x3x128x128xf32, #tpu.memory_space<vmem>>, vector<1x1x128x128xf32>
    %141 = vector.shape_cast %140 : vector<1x1x128x128xf32> to vector<128x128xf32>
    %cst_110 = arith.constant dense<0.000000e+00> : vector<16x128xf32>
    %142 = tpu.matmul %132, %141, %cst_110 {dimension_numbers = #tpu.dot_dimension_numbers<[1], [0], [0], [1], [0, 0, 1, 1], [], []>} : vector<16x128xf32>, vector<128x128xf32>, vector<16x128xf32> -> vector<16x128xf32>
    %143 = arith.addf %139, %142 : vector<16x128xf32>
    %144 = vector.extract_strided_slice %12 {offsets = [4, 0], sizes = [1, 128], strides = [1, 1]} : vector<9x128xf32> to vector<1x128xf32>
    %145 = vector.shape_cast %144 : vector<1x128xf32> to vector<128xf32>
    %146 = vector.shape_cast %145 : vector<128xf32> to vector<1x128xf32>
    %147 = vector.broadcast %146 : vector<1x128xf32> to vector<16x128xf32>
    %148 = arith.addf %143, %147 : vector<16x128xf32>
    %cst_111 = arith.constant 0.000000e+00 : f32
    %149 = vector.broadcast %cst_111 : f32 to vector<16x128xf32>
    %150 = arith.cmpf oge, %148, %149 : vector<16x128xf32>
    %cst_112 = arith.constant 0.00999999977 : f32
    %151 = vector.broadcast %cst_112 : f32 to vector<16x128xf32>
    %152 = arith.mulf %151, %148 : vector<16x128xf32>
    %153 = arith.select %150, %148, %152 : vector<16x128xi1>, vector<16x128xf32>
    %cst_113 = arith.constant dense<0.000000e+00> : vector<16x128xf32>
    %154 = tpu.matmul %6, %153, %cst_113 {dimension_numbers = #tpu.dot_dimension_numbers<[1], [0], [0], [1], [0, 0, 1, 1], [], []>} : vector<16x16xf32>, vector<16x128xf32>, vector<16x128xf32> -> vector<16x128xf32>
    %cst_114 = arith.constant dense<0.000000e+00> : vector<16x128xf32>
    %155 = tpu.matmul %11, %153, %cst_114 {dimension_numbers = #tpu.dot_dimension_numbers<[1], [0], [0], [1], [0, 0, 1, 1], [], []>} : vector<16x16xf32>, vector<16x128xf32>, vector<16x128xf32> -> vector<16x128xf32>
    %c5 = arith.constant 5 : index
    %c0_115 = arith.constant 0 : index
    %c0_116 = arith.constant 0 : index
    %c0_117 = arith.constant 0 : index
    %156 = vector.load %arg2[%c5, %c0_115, %c0_116, %c0_117] : memref<6x3x128x128xf32, #tpu.memory_space<vmem>>, vector<1x1x128x128xf32>
    %157 = vector.shape_cast %156 : vector<1x1x128x128xf32> to vector<128x128xf32>
    %cst_118 = arith.constant dense<0.000000e+00> : vector<16x128xf32>
    %158 = tpu.matmul %154, %157, %cst_118 {dimension_numbers = #tpu.dot_dimension_numbers<[1], [0], [0], [1], [0, 0, 1, 1], [], []>} : vector<16x128xf32>, vector<128x128xf32>, vector<16x128xf32> -> vector<16x128xf32>
    %c5_119 = arith.constant 5 : index
    %c1_120 = arith.constant 1 : index
    %c0_121 = arith.constant 0 : index
    %c0_122 = arith.constant 0 : index
    %159 = vector.load %arg2[%c5_119, %c1_120, %c0_121, %c0_122] : memref<6x3x128x128xf32, #tpu.memory_space<vmem>>, vector<1x1x128x128xf32>
    %160 = vector.shape_cast %159 : vector<1x1x128x128xf32> to vector<128x128xf32>
    %cst_123 = arith.constant dense<0.000000e+00> : vector<16x128xf32>
    %161 = tpu.matmul %153, %160, %cst_123 {dimension_numbers = #tpu.dot_dimension_numbers<[1], [0], [0], [1], [0, 0, 1, 1], [], []>} : vector<16x128xf32>, vector<128x128xf32>, vector<16x128xf32> -> vector<16x128xf32>
    %162 = arith.addf %158, %161 : vector<16x128xf32>
    %c5_124 = arith.constant 5 : index
    %c2_125 = arith.constant 2 : index
    %c0_126 = arith.constant 0 : index
    %c0_127 = arith.constant 0 : index
    %163 = vector.load %arg2[%c5_124, %c2_125, %c0_126, %c0_127] : memref<6x3x128x128xf32, #tpu.memory_space<vmem>>, vector<1x1x128x128xf32>
    %164 = vector.shape_cast %163 : vector<1x1x128x128xf32> to vector<128x128xf32>
    %cst_128 = arith.constant dense<0.000000e+00> : vector<16x128xf32>
    %165 = tpu.matmul %155, %164, %cst_128 {dimension_numbers = #tpu.dot_dimension_numbers<[1], [0], [0], [1], [0, 0, 1, 1], [], []>} : vector<16x128xf32>, vector<128x128xf32>, vector<16x128xf32> -> vector<16x128xf32>
    %166 = arith.addf %162, %165 : vector<16x128xf32>
    %167 = vector.extract_strided_slice %12 {offsets = [5, 0], sizes = [1, 128], strides = [1, 1]} : vector<9x128xf32> to vector<1x128xf32>
    %168 = vector.shape_cast %167 : vector<1x128xf32> to vector<128xf32>
    %169 = vector.shape_cast %168 : vector<128xf32> to vector<1x128xf32>
    %170 = vector.broadcast %169 : vector<1x128xf32> to vector<16x128xf32>
    %171 = arith.addf %166, %170 : vector<16x128xf32>
    %cst_129 = arith.constant 1.000000e-01 : f32
    %172 = vector.broadcast %cst_129 : f32 to vector<16x128xf32>
    %173 = arith.mulf %172, %171 : vector<16x128xf32>
    %174 = arith.addf %130, %173 : vector<16x128xf32>
    %c5_130 = arith.constant 5 : index
    %c0_131 = arith.constant 0 : index
    %c0_132 = arith.constant 0 : index
    %175 = vector.load %arg3[%c5_130, %c0_131, %c0_132] : memref<9x128x128xf32, #tpu.memory_space<vmem>>, vector<1x128x128xf32>
    %176 = vector.shape_cast %175 : vector<1x128x128xf32> to vector<128x128xf32>
    %cst_133 = arith.constant dense<0.000000e+00> : vector<16x128xf32>
    %177 = tpu.matmul %14, %176, %cst_133 {dimension_numbers = #tpu.dot_dimension_numbers<[1], [0], [0], [1], [0, 0, 1, 1], [], []>} : vector<16x128xf32>, vector<128x128xf32>, vector<16x128xf32> -> vector<16x128xf32>
    %c6 = arith.constant 6 : index
    %c0_134 = arith.constant 0 : index
    %c0_135 = arith.constant 0 : index
    %178 = vector.load %arg3[%c6, %c0_134, %c0_135] : memref<9x128x128xf32, #tpu.memory_space<vmem>>, vector<1x128x128xf32>
    %179 = vector.shape_cast %178 : vector<1x128x128xf32> to vector<128x128xf32>
    %cst_136 = arith.constant dense<0.000000e+00> : vector<16x128xf32>
    %180 = tpu.matmul %58, %179, %cst_136 {dimension_numbers = #tpu.dot_dimension_numbers<[1], [0], [0], [1], [0, 0, 1, 1], [], []>} : vector<16x128xf32>, vector<128x128xf32>, vector<16x128xf32> -> vector<16x128xf32>
    %181 = arith.addf %177, %180 : vector<16x128xf32>
    %c7 = arith.constant 7 : index
    %c0_137 = arith.constant 0 : index
    %c0_138 = arith.constant 0 : index
    %182 = vector.load %arg3[%c7, %c0_137, %c0_138] : memref<9x128x128xf32, #tpu.memory_space<vmem>>, vector<1x128x128xf32>
    %183 = vector.shape_cast %182 : vector<1x128x128xf32> to vector<128x128xf32>
    %cst_139 = arith.constant dense<0.000000e+00> : vector<16x128xf32>
    %184 = tpu.matmul %114, %183, %cst_139 {dimension_numbers = #tpu.dot_dimension_numbers<[1], [0], [0], [1], [0, 0, 1, 1], [], []>} : vector<16x128xf32>, vector<128x128xf32>, vector<16x128xf32> -> vector<16x128xf32>
    %185 = arith.addf %181, %184 : vector<16x128xf32>
    %c8 = arith.constant 8 : index
    %c0_140 = arith.constant 0 : index
    %c0_141 = arith.constant 0 : index
    %186 = vector.load %arg3[%c8, %c0_140, %c0_141] : memref<9x128x128xf32, #tpu.memory_space<vmem>>, vector<1x128x128xf32>
    %187 = vector.shape_cast %186 : vector<1x128x128xf32> to vector<128x128xf32>
    %cst_142 = arith.constant dense<0.000000e+00> : vector<16x128xf32>
    %188 = tpu.matmul %174, %187, %cst_142 {dimension_numbers = #tpu.dot_dimension_numbers<[1], [0], [0], [1], [0, 0, 1, 1], [], []>} : vector<16x128xf32>, vector<128x128xf32>, vector<16x128xf32> -> vector<16x128xf32>
    %189 = arith.addf %185, %188 : vector<16x128xf32>
    %190 = vector.extract_strided_slice %12 {offsets = [8, 0], sizes = [1, 128], strides = [1, 1]} : vector<9x128xf32> to vector<1x128xf32>
    %191 = vector.shape_cast %190 : vector<1x128xf32> to vector<128xf32>
    %192 = vector.shape_cast %191 : vector<128xf32> to vector<1x128xf32>
    %193 = vector.broadcast %192 : vector<1x128xf32> to vector<16x128xf32>
    %194 = arith.addf %189, %193 : vector<16x128xf32>
    %c0_143 = arith.constant 0 : index
    %c0_144 = arith.constant 0 : index
    %c0_145 = arith.constant 0 : index
    %195 = vector.load %arg5[%c0_143, %c0_144, %c0_145] : memref<1x16x128xf32, #tpu.memory_space<vmem>>, vector<1x16x128xf32>
    %196 = vector.shape_cast %195 : vector<1x16x128xf32> to vector<16x128xf32>
    %197 = vector.shape_cast %194 : vector<16x128xf32> to vector<1x16x128xf32>
    tpu.vector_store %arg5[%c0_143, %c0_144, %c0_145], %197 {strides = array<i32>} : memref<1x16x128xf32, #tpu.memory_space<vmem>>, vector<1x16x128xf32>,
    return
  }
  func.func @transform_0(%arg0: i32) -> (i32, i32, i32) {
    %c0_i32 = arith.constant 0 : i32
    %c0_i32_0 = arith.constant 0 : i32
    %c0_i32_1 = arith.constant 0 : i32
    return %arg0, %c0_i32, %c0_i32_0 : i32, i32, i32
  }
  func.func @transform_1(%arg0: i32) -> (i32, i32, i32, i32) {
    %c0_i32 = arith.constant 0 : i32
    %c0_i32_0 = arith.constant 0 : i32
    %c0_i32_1 = arith.constant 0 : i32
    %c0_i32_2 = arith.constant 0 : i32
    %c0_i32_3 = arith.constant 0 : i32
    return %c0_i32, %c0_i32_0, %c0_i32_1, %c0_i32_2 : i32, i32, i32, i32
  }
  func.func @transform_2(%arg0: i32) -> (i32, i32, i32) {
    %c0_i32 = arith.constant 0 : i32
    %c0_i32_0 = arith.constant 0 : i32
    %c0_i32_1 = arith.constant 0 : i32
    %c0_i32_2 = arith.constant 0 : i32
    return %c0_i32, %c0_i32_0, %c0_i32_1 : i32, i32, i32
  }
  func.func @transform_3(%arg0: i32) -> (i32, i32) {
    %c0_i32 = arith.constant 0 : i32
    %c0_i32_0 = arith.constant 0 : i32
    %c0_i32_1 = arith.constant 0 : i32
    return %c0_i32, %c0_i32_0 : i32, i32
  }
  func.func @transform_4(%arg0: i32) -> (i32, i32, i32) {
    %c0_i32 = arith.constant 0 : i32
    %c0_i32_0 = arith.constant 0 : i32
    %c0_i32_1 = arith.constant 0 : i32
    return %arg0, %c0_i32, %c0_i32_0 : i32, i32, i32
  }
}

</mosaic_0001>

<bundles_post_ra>
// kernel: cascading_block.1
= control target key start
LH: loop header
LB: loop body
LE: loop exit
PB: predicated region body
PF: predicated region fallthrough
CT: control target
= control target key end

     0   :  { %9 = vsyncpa [#allocation3], 0  ;;  %s5896_s0 = inlined_call_operand.vmem [shape: f32[2,16,128], index: 0, kind: input, shape index: {}]   ;;  %s5897_s1 = inlined_call_operand.hbm [shape: f32[6,3,128,128], index: 1, kind: input, shape index: {}]   ;;  %s5898_s2 = inlined_call_operand.hbm [shape: f32[9,128,128], index: 2, kind: input, shape index: {}]   ;;  %s5899_s3 = inlined_call_operand.hbm [shape: f32[9,128], index: 3, kind: input, shape index: {}]   ;;  %s5900_s4 = inlined_call_operand.vmem [shape: f32[2,16,128], index: 4, kind: output, shape index: {}]  }
   0x1   :  { %10 = vsyncpa [#allocation5], 0  ;;  %s5635_s15 = smov 0  }
   0x2 LB: > { %s5641_s16 = sadd.s32 4294967295, %s5602_s15   ;;  %p3853_p0 = scmp.ge.s32.totalorder %s5602_s15, 1  ;;  %s5602_s15 = sphi %s5635_s15, %s16_s15  }
   0x3   : > { %p136_p1 = scmp.lt.s32.totalorder %s5602_s15, 3  ;;  %p5484_p2 = scmp.eq.s32.totalorder %s5641_s16, 0 }
   0x4   : > { %s5604_s18 = smov [#allocation4]   ;;  %s5605_s20 = smov [#allocation2]  }
   0x5   : > { %p5646_p3 = pnand %p3853_p0, %p136_p1  ;;  %s161_s19 = sshll.u32 %s5604_s18, 4  ;;  %s162_s19 = int_to_ptr.vmem [resolvable:$true] %s161_s19 }
   0x6   : > { %s148_s21 = sshll.u32 %s5605_s20, 4  ;;  %s5606_s23 = smov [#allocation6]   ;;  %s149_s21 = int_to_ptr.vmem [resolvable:$true] %s148_s21 }
   0x7   : > { %p5474_p4 = pneg %p5646_p3  ;;  %s174_s24 = sshll.u32 %s5606_s23, 4  ;;  %s5658_s24 = int_to_ptr.vmem [resolvable:$true] %s174_s24 }
   0x8   : > { %s5521_s25 = scalar_lea.vmem %s162_s19, 18432  ;;  %p5529_p10 = scmp.lt.s32.totalorder %s162_s19, %s162_s19 }
   0x9   : > { %p5654_p5 = pnand %p5484_p2, %p5474_p4  ;;  %p5522_p7 = scmp.ne.s32.totalorder %s162_s19, %s5521_s25 }
   0xa   : > { %p5530_p11 = scmp.lt.s32.totalorder %s5521_s25, %s5521_s25 }
   0xb   : > { %p5512_p6 = pneg %p5654_p5 }
   0xc   : > { %p5531_p12 = por %p5530_p11, %p5529_p10 }
   0xd   : > { %p5524_p8 = pnand %p5522_p7, %p5512_p6 }
   0xf   : > { %p5525_p9 = pneg %p5524_p8 }
  0x11   : > { %p5532_p13 = pnand %p5531_p12, %p5525_p9 }
  0x13   : > { %5535 = shalt.err (!%p5532_p13)
}
  0x14   : > { %s5607_s26 = smov 128   ;;  %s5608_s27 = smov 8  }
  0x15   : > { %5480 = dma.hbm_to_vmem [thread:$0]  (!%p5654_p5), %s5898_s2, 18432, %s162_s19, [#allocation5], %s5607_s26, %s5607_s26, %s5608_s27  }
  0x16   : > { %s5547_s30 = scalar_lea.vmem %s149_s21, 36864  ;;  %p5555_p7 = scmp.lt.s32.totalorder %s149_s21, %s149_s21 }
  0x17   : > { %p5548_p0 = scmp.ne.s32.totalorder %s149_s21, %s5547_s30  ;;  %p5556_p8 = scmp.lt.s32.totalorder %s5547_s30, %s5547_s30 }
  0x19   : > { %p5550_p1 = pnand %p5548_p0, %p5512_p6  ;;  %p5557_p10 = por %p5556_p8, %p5555_p7 }
  0x1b   : > { %p5551_p4 = pneg %p5550_p1 }
  0x1d   : > { %p5558_p9 = pnand %p5557_p10, %p5551_p4 }
  0x1f   : > { %5561 = shalt.err (!%p5558_p9)
}
  0x20   : > { %5477 = dma.hbm_to_vmem [thread:$0]  (!%p5654_p5), %s5897_s1, 36864, %s149_s21, [#allocation3], %s5607_s26, %s5607_s26, %s5608_s27  }
  0x21   : > { %s5573_s7 = scalar_lea.vmem %s5658_s24, 256  ;;  %p5581_p0 = scmp.lt.s32.totalorder %s5658_s24, %s5658_s24 }
  0x22   : > { %p5574_p11 = scmp.ne.s32.totalorder %s5658_s24, %s5573_s7  ;;  %p5582_p1 = scmp.lt.s32.totalorder %s5573_s7, %s5573_s7 }
  0x24   : > { %p5576_p12 = pnand %p5574_p11, %p5512_p6  ;;  %p5583_p4 = por %p5582_p1, %p5581_p0 }
  0x26   : > { %p5577_p13 = pneg %p5576_p12 }
  0x28   : > { %p5584_p7 = pnand %p5583_p4, %p5577_p13 }
  0x2a   : > { %5587 = shalt.err (!%p5584_p7)
}
  0x2b   : > { %5483 = dma.hbm_to_vmem [thread:$0]  (!%p5654_p5), %s5899_s3, 256, %s5658_s24, [#allocation5], %s5607_s26, %s5607_s26, %s5608_s27  }
  0x2c   : > { %198 = sbr.rel (%p5646_p3) target bundleno = 3088 (0xc10), region = 36 }
  0x31   : > { %5593 = dma.done.wait (%p5484_p2), [#allocation3], 36864  }
  0x32   : > { %5595 = vsyncadd (%p5484_p2), [#allocation3], 4294930432 }
  0x33   : > { %5597 = dma.done.wait (%p5484_p2), [#allocation5], 18688  }
  0x34   : > { %5599 = vsyncadd (%p5484_p2), [#allocation5], 4294948608  ;;  %p232_p6 = scmp.lt.s32.totalorder %s5641_s16, 1  ;;  %v242_v0 = vlaneseq  ;;  %vm266_vm0 = vcmask 130048   ;;  %v5609_v9 = vmov 0.0   ;;  %v461_v11 = vld [vmem:[#allocation2 + $0xf8] sm:$0xff] }
  0x35   : > { %v460_v12 = vld [vmem:[#allocation2 + $0xf0] sm:$0xff]  ;;  %4447 = vmatprep.subr.mxu0 %v461_v11  ;;  %v459_v15 = vld [vmem:[#allocation2 + $0xe8] sm:$0xff]  ;;  %v458_v17 = vld [vmem:[#allocation2 + $0xe0] sm:$0xff] }
  0x36   : > { %s5904_s16 = smov (!%p232_p6, %s5641_s16), 1  ;;  %v5705_v1 = vshrl.u32 %v242_v0, 7  ;;  %v246_v2 = vand.u32 127, %v242_v0  ;;  %4448 = vmatpush3.msra.mxu0 %v461_v11  ;;  %v444_v18 = vld [vmem:[#allocation2 + $0x78] sm:$0xff]  ;;  %v443_v20 = vld [vmem:[#allocation2 + $0x70] sm:$0xff]  ;;  %v442_v22 = vld [vmem:[#allocation2 + $0x68] sm:$0xff] }
  0x37   : > { %s3897_s10 = sshll.u32 %s5904_s16, 4  ;;  %4449 = vmatprep.subr.mxu0 %v460_v12  ;;  %v457_v19 = vld [vmem:[#allocation2 + $0xd8] sm:$0xff]  ;;  %v456_v21 = vld [vmem:[#allocation2 + $0xd0] sm:$0xff]  ;;  %v455_v23 = vld [vmem:[#allocation2 + $0xc8] sm:$0xff] }
  0x38   : > { %v247_v3 = vadd.s32 1, %v246_v2  ;;  %v244_v4 = vadd.s32 8, %v5705_v1  ;;  %v254_v5 = vadd.s32 1, %v5705_v1  ;;  %s5715_s13 = scalar_lea.vmem %s5896_s0, %s3897_s10  ;;  %4450 = vmatpush3.msra.mxu0 %v460_v12  ;;  %v441_v24 = vld [vmem:[#allocation2 + $0x60] sm:$0xff]  ;;  %v440_v26 = vld [vmem:[#allocation2 + $0x58] sm:$0xff]  ;;  %v439_v28 = vld [vmem:[#allocation2 + $0x50] sm:$0xff]  ;;  %s241_s18 = scalar_lea.vmem %s5900_s4, %s3897_s10 }
  0x39   : > { %v5719_v7 = vld [vmem:[%s5715_s13 + $0x8] sm:$0xff]  ;;  %v5722_v8 = vld [vmem:[%s5715_s13] sm:$0xff]  ;;  %4451 = vmatprep.subr.mxu0 %v459_v15  ;;  %v453_v27 = vld [vmem:[#allocation2 + $0xb8] sm:$0xff] }
  0x3a   : > { %vm248_vm1 = vcmp.eq.s32.totalorder %v5705_v1, %v247_v3  ;;  %vm249_vm2 = vcmp.eq.s32.totalorder %v244_v4, %v247_v3  ;;  %v255_v6 = vadd.s32 1, %v244_v4  ;;  %vm256_vm3 = vcmp.eq.s32.totalorder %v246_v2, %v254_v5  ;;  %4433 = vmatprep.subr.mxu1 %v5719_v7  ;;  %4452 = vmatpush3.msra.mxu0 %v459_v15  ;;  %v454_v25 = vld [vmem:[#allocation2 + $0xc0] sm:$0xff]  ;;  %v452_v29 = vld [vmem:[#allocation2 + $0xb0] sm:$0xff]  ;;  %v438_v30 = vld [vmem:[#allocation2 + $0x48] sm:$0xff] }
  0x3b   : > { %v5724_v10 = vsel %vm248_vm1, 1.0, %v5609_v9  ;;  %4434 = vmatpush3.msra.mxu1 %v5719_v7  ;;  %v5730_v13 = vsel %vm249_vm2, 1.0, %v5609_v9  ;;  %v5733_v14 = vsel %vm256_vm3, 1.0, %v5609_v9  ;;  %4453 = vmatprep.subr.mxu0 %v458_v17  ;;  %v451_v31 = vld [vmem:[#allocation2 + $0xa8] sm:$0xff]  ;;  %v437_v32 = vld [vmem:[#allocation2 + $0x40] sm:$0xff]  ;;  %v436_v34 = vld [vmem:[#allocation2 + $0x38] sm:$0xff] }
  0x3c   : > { %4437 = vmatprep.mubr.msk.f32.mxu1 %vm266_vm0, %v5724_v10  ;;  %4435 = vmatprep.subr.mxu1 %v5722_v8  ;;  %vm257_vm4 = vcmp.eq.s32.totalorder %v246_v2, %v255_v6  ;;  %v450_v33 = vld [vmem:[#allocation2 + $0xa0] sm:$0xff]  ;;  %v449_v35 = vld [vmem:[#allocation2 + $0x98] sm:$0xff]  ;;  %v435_v36 = vld [vmem:[#allocation2 + $0x30] sm:$0xff] }
  0x3d   : > { %4436 = vmatpush3.msra.mxu1 %v5722_v8  ;;  %v5742_v16 = vsel %vm257_vm4, 1.0, %v5609_v9  ;;  %4454 = vmatpush3.msra.mxu0 %v458_v17  ;;  %v448_v37 = vld [vmem:[#allocation2 + $0x90] sm:$0xff]  ;;  %v434_v38 = vld [vmem:[#allocation2 + $0x28] sm:$0xff]  ;;  %v433_v40 = vld [vmem:[#allocation2 + $0x20] sm:$0xff] }
  0x3e   : > { %4438 = vmatmul.mubr.msk.f32.vlgmr.msra.gmra.mxu1 %vm266_vm0, %v5730_v13  ;;  %4440 = vmatprep.subr.mxu1 %v5719_v7  ;;  %v447_v39 = vld [vmem:[#allocation2 + $0x88] sm:$0xff]  ;;  %v446_v41 = vld [vmem:[#allocation2 + $0x80] sm:$0xff]  ;;  %v432_v42 = vld [vmem:[#allocation2 + $0x18] sm:$0xff] }
  0x3f   : > { %4441 = vmatpush3.msra.mxu1 %v5719_v7  ;;  %4444 = vmatprep.mubr.msk.f32.mxu1 %vm266_vm0, %v5733_v14  ;;  %v628_v43 = vld [vmem:[#allocation2 + $0x178] sm:$0xff]  ;;  %v627_v44 = vld [vmem:[#allocation2 + $0x170] sm:$0xff]  ;;  %v626_v46 = vld [vmem:[#allocation2 + $0x168] sm:$0xff] }
  0x40   : > { %4442 = vmatprep.subr.mxu1 %v5722_v8  ;;  %4455 = vmatprep.subr.mxu0 %v457_v19  ;;  %v431_v45 = vld [vmem:[#allocation2 + $0x10] sm:$0xff]  ;;  %v625_v47 = vld [vmem:[#allocation2 + $0x160] sm:$0xff]  ;;  %v624_v48 = vld [vmem:[#allocation2 + $0x158] sm:$0xff] }
  0x41   : > { %4443 = vmatpush3.msra.mxu1 %v5722_v8  ;;  %4479 = vmatprep.mubr.f32.mxu0 %v5722_v8  ;;  %v623_v49 = vld [vmem:[#allocation2 + $0x150] sm:$0xff]  ;;  %v622_v50 = vld [vmem:[#allocation2 + $0x148] sm:$0xff]  ;;  %v621_v51 = vld [vmem:[#allocation2 + $0x140] sm:$0xff] }
  0x42   : > { %4445 = vmatmul.mubr.msk.f32.vlgmr.msra.gmra.mxu1 %vm266_vm0, %v5742_v16  ;;  %4482 = vmatprep.subr.mxu1 %v444_v18  ;;  %v620_v52 = vld [vmem:[#allocation2 + $0x138] sm:$0xff]  ;;  %v619_v53 = vld [vmem:[#allocation2 + $0x130] sm:$0xff]  ;;  %v618_v54 = vld [vmem:[#allocation2 + $0x128] sm:$0xff] }
  0x43   : > { %4483 = vmatpush3.msra.mxu1 %v444_v18  ;;  %4456 = vmatpush3.msra.mxu0 %v457_v19  ;;  %v617_v55 = vld [vmem:[#allocation2 + $0x120] sm:$0xff]  ;;  %v430_v56 = vld [vmem:[#allocation2 + $0x8] sm:$0xff]  ;;  %v616_v57 = vld [vmem:[#allocation2 + $0x118] sm:$0xff] }
  0x44   : > { %4484 = vmatprep.subr.mxu1 %v443_v20  ;;  %4457 = vmatprep.subr.mxu0 %v456_v21  ;;  %v429_v58 = vld [vmem:[#allocation2] sm:$0xff]  ;;  %v615_v59 = vld [vmem:[#allocation2 + $0x110] sm:$0xff]  ;;  %v614_v60 = vld [vmem:[#allocation2 + $0x108] sm:$0xff] }
  0x45   : > { %4485 = vmatpush3.msra.mxu1 %v443_v20  ;;  %4458 = vmatpush3.msra.mxu0 %v456_v21  ;;  %v613_v61 = vld [vmem:[#allocation2 + $0x100] sm:$0xff]  ;;  %v884_v3 = vld [vmem:[#allocation2 + $0x1f8] sm:$0xff]  ;;  %v883_v4 = vld [vmem:[#allocation2 + $0x1f0] sm:$0xff] }
  0x46   : > { %4486 = vmatprep.subr.mxu1 %v442_v22  ;;  %4459 = vmatprep.subr.mxu0 %v455_v23  ;;  %v882_v5 = vld [vmem:[#allocation2 + $0x1e8] sm:$0xff]  ;;  %v881_v6 = vld [vmem:[#allocation2 + $0x1e0] sm:$0xff]  ;;  %v880_v9 = vld [vmem:[#allocation2 + $0x1d8] sm:$0xff] }
  0x47   : > { %4487 = vmatpush3.msra.mxu1 %v442_v22  ;;  %4460 = vmatpush3.msra.mxu0 %v455_v23  ;;  %v879_v11 = vld [vmem:[#allocation2 + $0x1d0] sm:$0xff]  ;;  %v878_v12 = vld [vmem:[#allocation2 + $0x1c8] sm:$0xff]  ;;  %v877_v15 = vld [vmem:[#allocation2 + $0x1c0] sm:$0xff] }
  0x48   : > { %4488 = vmatprep.subr.mxu1 %v441_v24  ;;  %4461 = vmatprep.subr.mxu0 %v454_v25  ;;  %v876_v17 = vld [vmem:[#allocation2 + $0x1b8] sm:$0xff]  ;;  %v875_v18 = vld [vmem:[#allocation2 + $0x1b0] sm:$0xff]  ;;  %v874_v19 = vld [vmem:[#allocation2 + $0x1a8] sm:$0xff] }
  0x49   : > { %4489 = vmatpush3.msra.mxu1 %v441_v24  ;;  %4462 = vmatpush3.msra.mxu0 %v454_v25  ;;  %v873_v20 = vld [vmem:[#allocation2 + $0x1a0] sm:$0xff]  ;;  %v872_v21 = vld [vmem:[#allocation2 + $0x198] sm:$0xff]  ;;  %v871_v22 = vld [vmem:[#allocation2 + $0x190] sm:$0xff]  ;;  %v708_v24 = vsub.s32 0, %v5705_v1 }
  0x4a   : > { %4490 = vmatprep.subr.mxu1 %v440_v26  ;;  %4463 = vmatprep.subr.mxu0 %v453_v27 }
  0x4b   : > { %4491 = vmatpush3.msra.mxu1 %v440_v26  ;;  %4464 = vmatpush3.msra.mxu0 %v453_v27  ;;  %v5753_v26 = vld [vmem:[#allocation6] sm:$0xff] }
  0x4c   : > { %4492 = vmatprep.subr.mxu1 %v439_v28  ;;  %4465 = vmatprep.subr.mxu0 %v452_v29 }
  0x4d   : > { %4493 = vmatpush3.msra.mxu1 %v439_v28  ;;  %4466 = vmatpush3.msra.mxu0 %v452_v29 }
  0x4e   : > { %4494 = vmatprep.subr.mxu1 %v438_v30  ;;  %4467 = vmatprep.subr.mxu0 %v451_v31 }
  0x4f   : > { %4495 = vmatpush3.msra.mxu1 %v438_v30  ;;  %4468 = vmatpush3.msra.mxu0 %v451_v31  ;;  %v709_v30 = vrot.slane %v5753_v26, %v708_v24 }
  0x50   : > { %4496 = vmatprep.subr.mxu1 %v437_v32  ;;  %4469 = vmatprep.subr.mxu0 %v450_v33 }
  0x51   : > { %4497 = vmatpush3.msra.mxu1 %v437_v32  ;;  %4470 = vmatpush3.msra.mxu0 %v450_v33 }
  0x52   : > { %4498 = vmatprep.subr.mxu1 %v436_v34  ;;  %4471 = vmatprep.subr.mxu0 %v449_v35 }
  0x53   : > { %4499 = vmatpush3.msra.mxu1 %v436_v34  ;;  %4472 = vmatpush3.msra.mxu0 %v449_v35 }
  0x54   : > { %4500 = vmatprep.subr.mxu1 %v435_v36  ;;  %4473 = vmatprep.subr.mxu0 %v448_v37 }
  0x55   : > { %4501 = vmatpush3.msra.mxu1 %v435_v36  ;;  %4474 = vmatpush3.msra.mxu0 %v448_v37 }
  0x56   : > { %4502 = vmatprep.subr.mxu1 %v434_v38  ;;  %4475 = vmatprep.subr.mxu0 %v447_v39 }
  0x57   : > { %4503 = vmatpush3.msra.mxu1 %v434_v38  ;;  %4476 = vmatpush3.msra.mxu0 %v447_v39 }
  0x58   : > { %4504 = vmatprep.subr.mxu1 %v433_v40  ;;  %4477 = vmatprep.subr.mxu0 %v446_v41 }
  0x59   : > { %4505 = vmatpush3.msra.mxu1 %v433_v40  ;;  %4478 = vmatpush3.msra.mxu0 %v446_v41 }
  0x5a   : > { %4506 = vmatprep.subr.mxu1 %v432_v42  ;;  %4480 = vmatmul.mubr.f32.vlgmr.msra.gmra.mxu0 %v5719_v7 }
  0x5b   : > { %4517 = vmatprep.subr.mxu0 %v628_v43  ;;  %4507 = vmatpush3.msra.mxu1 %v432_v42  ;;  %v901_v42 = vld [vmem:[#allocation2 + $0x278] sm:$0xff] }
  0x5c   : > { %4518 = vmatpush3.msra.mxu0 %v628_v43  ;;  %4508 = vmatprep.subr.mxu1 %v431_v45  ;;  %v900_v43 = vld [vmem:[#allocation2 + $0x270] sm:$0xff] }
  0x5d   : > { %4519 = vmatprep.subr.mxu0 %v627_v44  ;;  %4509 = vmatpush3.msra.mxu1 %v431_v45  ;;  %v898_v45 = vld [vmem:[#allocation2 + $0x260] sm:$0xff] }
  0x5e   : > { %4520 = vmatpush3.msra.mxu0 %v627_v44  ;;  %4510 = vmatprep.subr.mxu1 %v430_v56  ;;  %v899_v44 = vld [vmem:[#allocation2 + $0x268] sm:$0xff] }
  0x5f   : > { %4521 = vmatprep.subr.mxu0 %v626_v46  ;;  %4511 = vmatpush3.msra.mxu1 %v430_v56  ;;  %v887_v56 = vld [vmem:[#allocation2 + $0x208] sm:$0xff] }
  0x60   : > { %4522 = vmatpush3.msra.mxu0 %v626_v46  ;;  %4512 = vmatprep.subr.mxu1 %v429_v58  ;;  %v897_v46 = vld [vmem:[#allocation2 + $0x258] sm:$0xff] }
  0x61   : > { %4523 = vmatprep.subr.mxu0 %v625_v47  ;;  %4513 = vmatpush3.msra.mxu1 %v429_v58  ;;  %v1068_v58 = vld [vmem:[#allocation2 + $0x2f8] sm:$0xff] }
  0x62   : > { %4524 = vmatpush3.msra.mxu0 %v625_v47  ;;  %v896_v47 = vld [vmem:[#allocation2 + $0x250] sm:$0xff] }
  0x63   : > { %4525 = vmatprep.subr.mxu0 %v624_v48 }
  0x64   : > { %4526 = vmatpush3.msra.mxu0 %v624_v48  ;;  %v895_v48 = vld [vmem:[#allocation2 + $0x248] sm:$0xff] }
  0x65   : > { %4527 = vmatprep.subr.mxu0 %v623_v49 }
  0x66   : > { %4528 = vmatpush3.msra.mxu0 %v623_v49  ;;  %v894_v49 = vld [vmem:[#allocation2 + $0x240] sm:$0xff] }
  0x67   : > { %4529 = vmatprep.subr.mxu0 %v622_v50 }
  0x68   : > { %4530 = vmatpush3.msra.mxu0 %v622_v50  ;;  %v893_v50 = vld [vmem:[#allocation2 + $0x238] sm:$0xff] }
  0x69   : > { %4531 = vmatprep.subr.mxu0 %v621_v51 }
  0x6a   : > { %4532 = vmatpush3.msra.mxu0 %v621_v51  ;;  %v892_v51 = vld [vmem:[#allocation2 + $0x230] sm:$0xff] }
  0x6b   : > { %4533 = vmatprep.subr.mxu0 %v620_v52 }
  0x6c   : > { %4534 = vmatpush3.msra.mxu0 %v620_v52  ;;  %v891_v52 = vld [vmem:[#allocation2 + $0x228] sm:$0xff] }
  0x6d   : > { %4535 = vmatprep.subr.mxu0 %v619_v53 }
  0x6e   : > { %4536 = vmatpush3.msra.mxu0 %v619_v53  ;;  %v890_v53 = vld [vmem:[#allocation2 + $0x220] sm:$0xff] }
  0x6f   : > { %4537 = vmatprep.subr.mxu0 %v618_v54 }
  0x70   : > { %4538 = vmatpush3.msra.mxu0 %v618_v54  ;;  %v889_v54 = vld [vmem:[#allocation2 + $0x218] sm:$0xff] }
  0x71   : > { %4539 = vmatprep.subr.mxu0 %v617_v55 }
  0x72   : > { %4540 = vmatpush3.msra.mxu0 %v617_v55  ;;  %v888_v55 = vld [vmem:[#allocation2 + $0x210] sm:$0xff] }
  0x73   : > { %4541 = vmatprep.subr.mxu0 %v616_v57 }
  0x74   : > { %4542 = vmatpush3.msra.mxu0 %v616_v57  ;;  %v886_v57 = vld [vmem:[#allocation2 + $0x200] sm:$0xff] }
  0x75   : > { %4543 = vmatprep.subr.mxu0 %v615_v59 }
  0x76   : > { %4544 = vmatpush3.msra.mxu0 %v615_v59  ;;  %v1067_v59 = vld [vmem:[#allocation2 + $0x2f0] sm:$0xff] }
  0x77   : > { %4545 = vmatprep.subr.mxu0 %v614_v60 }
  0x78   : > { %4546 = vmatpush3.msra.mxu0 %v614_v60  ;;  %v1066_v60 = vld [vmem:[#allocation2 + $0x2e8] sm:$0xff] }
  0x79   : > { %4547 = vmatprep.subr.mxu0 %v613_v61 }
  0x7a   : > { %4548 = vmatpush3.msra.mxu0 %v613_v61  ;;  %v1065_v61 = vld [vmem:[#allocation2 + $0x2e0] sm:$0xff] }
  0x7b   : > { %4601 = vmatprep.subr.mxu0 %v884_v3 }
  0xfe   : > { %v4439_v62 = vpop.f32.mrf.mxu1 }
 0x100   : > { %v339_v63 = vpop.f32.mrf.mxu1 }
 0x101   : > { %4514 = vmatprep.mubr.f32.mxu1 %v339_v63  ;;  %v1063_v63 = vld [vmem:[#allocation2 + $0x2d0] sm:$0xff] }
 0x102   : > { %v4446_v0 = vpop.f32.mrf.mxu1  ;;  %4515 = vmatmul.mubr.f32.vlgmr.msra.gmra.mxu1 %v4439_v62  ;;  %v1064_v62 = vld [vmem:[#allocation2 + $0x2d8] sm:$0xff] }
 0x103   : > { %4556 = vmatprep.mubr.msk.f32.mxu1 %vm266_vm0, %v5724_v10 }
 0x104   : > { %v420_v2 = vpop.f32.mrf.mxu1 }
 0x105   : > { %4549 = vmatprep.mubr.f32.mxu0 %v420_v2  ;;  %v1061_v2 = vld [vmem:[#allocation2 + $0x2c0] sm:$0xff] }
 0x106   : > { %4550 = vmatmul.mubr.f32.vlgmr.msra.gmra.mxu0 %v4446_v0  ;;  %v1062_v0 = vld [vmem:[#allocation2 + $0x2c8] sm:$0xff] }
 0x107   : > { %4602 = vmatpush3.msra.mxu0 %v884_v3  ;;  %v1060_v3 = vld [vmem:[#allocation2 + $0x2b8] sm:$0xff] }
 0x108   : > { %4603 = vmatprep.subr.mxu0 %v883_v4 }
 0x109   : > { %4604 = vmatpush3.msra.mxu0 %v883_v4  ;;  %v1059_v4 = vld [vmem:[#allocation2 + $0x2b0] sm:$0xff] }
 0x10a   : > { %4605 = vmatprep.subr.mxu0 %v882_v5 }
 0x10b   : > { %4606 = vmatpush3.msra.mxu0 %v882_v5  ;;  %v1058_v5 = vld [vmem:[#allocation2 + $0x2a8] sm:$0xff] }
 0x10c   : > { %4607 = vmatprep.subr.mxu0 %v881_v6 }
 0x10d   : > { %4608 = vmatpush3.msra.mxu0 %v881_v6  ;;  %v1057_v6 = vld [vmem:[#allocation2 + $0x2a0] sm:$0xff] }
 0x10e   : > { %4609 = vmatprep.subr.mxu0 %v880_v9 }
 0x10f   : > { %4610 = vmatpush3.msra.mxu0 %v880_v9  ;;  %v870_v9 = vld [vmem:[#allocation2 + $0x188] sm:$0xff] }
 0x110   : > { %4611 = vmatprep.subr.mxu0 %v879_v11 }
 0x111   : > { %4612 = vmatpush3.msra.mxu0 %v879_v11  ;;  %v1056_v11 = vld [vmem:[#allocation2 + $0x298] sm:$0xff] }
 0x112   : > { %4613 = vmatprep.subr.mxu0 %v878_v12 }
 0x113   : > { %4614 = vmatpush3.msra.mxu0 %v878_v12  ;;  %v869_v12 = vld [vmem:[#allocation2 + $0x180] sm:$0xff] }
 0x114   : > { %4615 = vmatprep.subr.mxu0 %v877_v15 }
 0x115   : > { %4616 = vmatpush3.msra.mxu0 %v877_v15  ;;  %v1055_v15 = vld [vmem:[#allocation2 + $0x290] sm:$0xff] }
 0x116   : > { %4617 = vmatprep.subr.mxu0 %v876_v17 }
 0x117   : > { %4618 = vmatpush3.msra.mxu0 %v876_v17  ;;  %v1054_v17 = vld [vmem:[#allocation2 + $0x288] sm:$0xff] }
 0x118   : > { %4619 = vmatprep.subr.mxu0 %v875_v18 }
 0x119   : > { %4620 = vmatpush3.msra.mxu0 %v875_v18  ;;  %v1053_v18 = vld [vmem:[#allocation2 + $0x280] sm:$0xff] }
 0x11a   : > { %4621 = vmatprep.subr.mxu0 %v874_v19  ;;  %v4481_v23 = vpop.f32.mrf.mxu0 }
 0x11b   : > { %4622 = vmatpush3.msra.mxu0 %v874_v19  ;;  %v1171_v19 = vld [vmem:[#allocation4 + $0x78] sm:$0xff] }
 0x11c   : > { %4623 = vmatprep.subr.mxu0 %v873_v20  ;;  %v528_v27 = vpop.f32.mrf.mxu0 }
 0x11d   : > { %4624 = vmatpush3.msra.mxu0 %v873_v20  ;;  %v1188_v20 = vld [vmem:[#allocation4 + $0xf8] sm:$0xff] }
 0x11e   : > { %4625 = vmatprep.subr.mxu0 %v872_v21 }
 0x11f   : > { %4626 = vmatpush3.msra.mxu0 %v872_v21 }
 0x120   : > { %4627 = vmatprep.subr.mxu0 %v871_v22 }
 0x121   : > { %4628 = vmatpush3.msra.mxu0 %v871_v22 }
 0x122   : > { %4629 = vmatprep.subr.mxu0 %v870_v9 }
 0x123   : > { %4630 = vmatpush3.msra.mxu0 %v870_v9 }
 0x124   : > { %4631 = vmatprep.subr.mxu0 %v869_v12 }
 0x125   : > { %4632 = vmatpush3.msra.mxu0 %v869_v12 }
 0x126   : > { %4671 = vmatprep.subr.mxu0 %v1188_v20 }
 0x1c2   : > { %v4516_v25 = vpop.f32.mrf.mxu1 }
 0x1c3   : > { %v609_v29 = vadd.f32 %v4516_v25, %v4481_v23  ;;  %v1187_v23 = vld [vmem:[#allocation4 + $0xf0] sm:$0xff]  ;;  %v1186_v25 = vld [vmem:[#allocation4 + $0xe8] sm:$0xff] }
 0x1c4   : > { %v603_v28 = vpop.f32.mrf.mxu1 }
 0x1c5   : > { %v604_v32 = vadd.f32 %v603_v28, %v528_v27  ;;  %v1170_v28 = vld [vmem:[#allocation4 + $0x70] sm:$0xff] }
 0x1c6   : > { %v4551_v31 = vpop.f32.mrf.mxu0 }
 0x1c7   : > { %v705_v33 = vadd.f32 %v4551_v31, %v609_v29  ;;  %v1185_v29 = vld [vmem:[#allocation4 + $0xe0] sm:$0xff]  ;;  %v1184_v31 = vld [vmem:[#allocation4 + $0xd8] sm:$0xff] }
 0x1c8   : > { %v695_v34 = vpop.f32.mrf.mxu0 }
 0x1c9   : > { %v711_v35 = vadd.f32 %v709_v30, %v705_v33  ;;  %v704_v36 = vadd.f32 %v695_v34, %v604_v32  ;;  %v1168_v32 = vld [vmem:[#allocation4 + $0x60] sm:$0xff]  ;;  %v1183_v33 = vld [vmem:[#allocation4 + $0xd0] sm:$0xff]  ;;  %v1167_v34 = vld [vmem:[#allocation4 + $0x58] sm:$0xff] }
 0x1cb   : > { %vm713_vm5 = vcmp.ge.f32.partialorder %v711_v35, 0.0  ;;  %v715_v37 = vmul.f32 0.01, %v711_v35  ;;  %v710_v38 = vadd.f32 %v709_v30, %v704_v36  ;;  %v1169_v30 = vld [vmem:[#allocation4 + $0x68] sm:$0xff]  ;;  %v1166_v36 = vld [vmem:[#allocation4 + $0x50] sm:$0xff] }
 0x1cd   : > { %vm712_vm6 = vcmp.ge.f32.partialorder %v710_v38, 0.0  ;;  %v714_v39 = vmul.f32 0.01, %v710_v38  ;;  %v5756_v40 = vsel %vm713_vm5, %v711_v35, %v715_v37  ;;  %v1182_v35 = vld [vmem:[#allocation4 + $0xc8] sm:$0xff]  ;;  %v1181_v37 = vld [vmem:[#allocation4 + $0xc0] sm:$0xff] }
 0x1ce   : > { %4552 = vmatprep.subr.mxu1 %v5756_v40 }
 0x1cf   : > { %4553 = vmatpush3.msra.mxu1 %v5756_v40  ;;  %v716_v41 = vsel %vm712_vm6, %v710_v38, %v714_v39  ;;  %v1165_v38 = vld [vmem:[#allocation4 + $0x48] sm:$0xff]  ;;  %v1164_v39 = vld [vmem:[#allocation4 + $0x40] sm:$0xff] }
 0x1d0   : > { %4554 = vmatprep.subr.mxu1 %v716_v41 }
 0x1d1   : > { %4555 = vmatpush3.msra.mxu1 %v716_v41 }
 0x1d2   : > { %4557 = vmatmul.mubr.msk.f32.vlgmr.msra.gmra.mxu1 %vm266_vm0, %v5730_v13  ;;  %4559 = vmatprep.subr.mxu1 %v5756_v40 }
 0x1d3   : > { %4560 = vmatpush3.msra.mxu1 %v5756_v40  ;;  %4563 = vmatprep.mubr.msk.f32.mxu1 %vm266_vm0, %v5733_v14 }
 0x1d4   : > { %4561 = vmatprep.subr.mxu1 %v716_v41 }
 0x1d5   : > { %4562 = vmatpush3.msra.mxu1 %v716_v41 }
 0x1d6   : > { %4564 = vmatmul.mubr.msk.f32.vlgmr.msra.gmra.mxu1 %vm266_vm0, %v5742_v16  ;;  %4566 = vmatprep.subr.mxu1 %v901_v42 }
 0x1d7   : > { %4567 = vmatpush3.msra.mxu1 %v901_v42  ;;  %4598 = vmatprep.mubr.f32.mxu1 %v716_v41  ;;  %v1180_v41 = vld [vmem:[#allocation4 + $0xb8] sm:$0xff]  ;;  %v1162_v42 = vld [vmem:[#allocation4 + $0x30] sm:$0xff] }
 0x1d8   : > { %4568 = vmatprep.subr.mxu1 %v900_v43 }
 0x1d9   : > { %4569 = vmatpush3.msra.mxu1 %v900_v43  ;;  %v1179_v43 = vld [vmem:[#allocation4 + $0xb0] sm:$0xff] }
 0x1da   : > { %4570 = vmatprep.subr.mxu1 %v899_v44 }
 0x1db   : > { %4571 = vmatpush3.msra.mxu1 %v899_v44  ;;  %v1161_v44 = vld [vmem:[#allocation4 + $0x28] sm:$0xff] }
 0x1dc   : > { %4572 = vmatprep.subr.mxu1 %v898_v45 }
 0x1dd   : > { %4573 = vmatpush3.msra.mxu1 %v898_v45  ;;  %v1178_v45 = vld [vmem:[#allocation4 + $0xa8] sm:$0xff] }
 0x1de   : > { %4574 = vmatprep.subr.mxu1 %v897_v46 }
 0x1df   : > { %4575 = vmatpush3.msra.mxu1 %v897_v46  ;;  %v1160_v46 = vld [vmem:[#allocation4 + $0x20] sm:$0xff] }
 0x1e0   : > { %4576 = vmatprep.subr.mxu1 %v896_v47 }
 0x1e1   : > { %4577 = vmatpush3.msra.mxu1 %v896_v47  ;;  %v1177_v47 = vld [vmem:[#allocation4 + $0xa0] sm:$0xff] }
 0x1e2   : > { %4578 = vmatprep.subr.mxu1 %v895_v48 }
 0x1e3   : > { %4579 = vmatpush3.msra.mxu1 %v895_v48  ;;  %v1159_v48 = vld [vmem:[#allocation4 + $0x18] sm:$0xff] }
 0x1e4   : > { %4580 = vmatprep.subr.mxu1 %v894_v49 }
 0x1e5   : > { %4581 = vmatpush3.msra.mxu1 %v894_v49  ;;  %v1176_v49 = vld [vmem:[#allocation4 + $0x98] sm:$0xff] }
 0x1e6   : > { %4582 = vmatprep.subr.mxu1 %v893_v50 }
 0x1e7   : > { %4583 = vmatpush3.msra.mxu1 %v893_v50  ;;  %v1158_v50 = vld [vmem:[#allocation4 + $0x10] sm:$0xff] }
 0x1e8   : > { %4584 = vmatprep.subr.mxu1 %v892_v51 }
 0x1e9   : > { %4585 = vmatpush3.msra.mxu1 %v892_v51  ;;  %v1175_v51 = vld [vmem:[#allocation4 + $0x90] sm:$0xff] }
 0x1ea   : > { %4586 = vmatprep.subr.mxu1 %v891_v52 }
 0x1eb   : > { %4587 = vmatpush3.msra.mxu1 %v891_v52  ;;  %v1157_v52 = vld [vmem:[#allocation4 + $0x8] sm:$0xff] }
 0x1ec   : > { %4588 = vmatprep.subr.mxu1 %v890_v53 }
 0x1ed   : > { %4589 = vmatpush3.msra.mxu1 %v890_v53  ;;  %v1174_v53 = vld [vmem:[#allocation4 + $0x88] sm:$0xff] }
 0x1ee   : > { %4590 = vmatprep.subr.mxu1 %v889_v54 }
 0x1ef   : > { %4591 = vmatpush3.msra.mxu1 %v889_v54  ;;  %v1156_v54 = vld [vmem:[#allocation4] sm:$0xff] }
 0x1f0   : > { %4592 = vmatprep.subr.mxu1 %v888_v55 }
 0x1f1   : > { %4593 = vmatpush3.msra.mxu1 %v888_v55  ;;  %v1173_v55 = vld [vmem:[#allocation4 + $0x80] sm:$0xff] }
 0x1f2   : > { %4594 = vmatprep.subr.mxu1 %v887_v56 }
 0x1f3   : > { %4595 = vmatpush3.msra.mxu1 %v887_v56  ;;  %v1528_v56 = vld [vmem:[#allocation2 + $0x3f8] sm:$0xff] }
 0x1f4   : > { %4596 = vmatprep.subr.mxu1 %v886_v57 }
 0x1f5   : > { %4597 = vmatpush3.msra.mxu1 %v886_v57 }
 0x1f6   : > { %4599 = vmatmul.mubr.f32.vlgmr.msra.gmra.mxu1 %v5756_v40  ;;  %4636 = vmatprep.subr.mxu1 %v1068_v58  ;;  %v1163_v40 = vld [vmem:[#allocation4 + $0x38] sm:$0xff] }
 0x1f7   : > { %4637 = vmatpush3.msra.mxu1 %v1068_v58  ;;  %v1148_v58 = vsub.s32 1, %v5705_v1 }
 0x1f8   : > { %4638 = vmatprep.subr.mxu1 %v1067_v59 }
 0x1f9   : > { %4639 = vmatpush3.msra.mxu1 %v1067_v59 }
 0x1fa   : > { %4640 = vmatprep.subr.mxu1 %v1066_v60 }
 0x1fb   : > { %4641 = vmatpush3.msra.mxu1 %v1066_v60 }
 0x1fc   : > { %4642 = vmatprep.subr.mxu1 %v1065_v61 }
 0x1fd   : > { %4643 = vmatpush3.msra.mxu1 %v1065_v61 }
 0x1fe   : > { %4644 = vmatprep.subr.mxu1 %v1064_v62 }
 0x1ff   : > { %4645 = vmatpush3.msra.mxu1 %v1064_v62 }
 0x200   : > { %4646 = vmatprep.subr.mxu1 %v1063_v63 }
 0x201   : > { %4647 = vmatpush3.msra.mxu1 %v1063_v63  ;;  %v1149_v63 = vrot.slane %v5753_v26, %v1148_v58  ;;  %v1687_v58 = vld [vmem:[#allocation2 + $0x438] sm:$0xff] }
 0x202   : > { %4648 = vmatprep.subr.mxu1 %v1062_v0 }
 0x203   : > { %4649 = vmatpush3.msra.mxu1 %v1062_v0 }
 0x204   : > { %4650 = vmatprep.subr.mxu1 %v1061_v2 }
 0x205   : > { %4651 = vmatpush3.msra.mxu1 %v1061_v2 }
 0x206   : > { %4652 = vmatprep.subr.mxu1 %v1060_v3 }
 0x207   : > { %4653 = vmatpush3.msra.mxu1 %v1060_v3 }
 0x208   : > { %4654 = vmatprep.subr.mxu1 %v1059_v4 }
 0x209   : > { %4655 = vmatpush3.msra.mxu1 %v1059_v4 }
 0x20a   : > { %4656 = vmatprep.subr.mxu1 %v1058_v5 }
 0x20b   : > { %4657 = vmatpush3.msra.mxu1 %v1058_v5 }
 0x20c   : > { %4658 = vmatprep.subr.mxu1 %v1057_v6 }
 0x20d   : > { %4659 = vmatpush3.msra.mxu1 %v1057_v6 }
 0x20e   : > { %4660 = vmatprep.subr.mxu1 %v1056_v11 }
 0x20f   : > { %4661 = vmatpush3.msra.mxu1 %v1056_v11 }
 0x210   : > { %4662 = vmatprep.subr.mxu1 %v1055_v15 }
 0x211   : > { %4663 = vmatpush3.msra.mxu1 %v1055_v15 }
 0x212   : > { %4664 = vmatprep.subr.mxu1 %v1054_v17 }
 0x213   : > { %4665 = vmatpush3.msra.mxu1 %v1054_v17 }
 0x214   : > { %4666 = vmatprep.subr.mxu1 %v1053_v18 }
 0x215   : > { %4667 = vmatpush3.msra.mxu1 %v1053_v18  ;;  %v1527_v18 = vld [vmem:[#allocation2 + $0x3f0] sm:$0xff] }
 0x216   : > { %4706 = vmatprep.subr.mxu1 %v1171_v19 }
 0x292   : > { %v4558_v21 = vpop.f32.mrf.mxu1 }
 0x294   : > { %v784_v22 = vpop.f32.mrf.mxu1 }
 0x295   : > { %4633 = vmatprep.mubr.f32.mxu0 %v784_v22  ;;  %v1521_v22 = vld [vmem:[#allocation2 + $0x3c0] sm:$0xff] }
 0x296   : > { %v4565_v24 = vpop.f32.mrf.mxu1  ;;  %4634 = vmatmul.mubr.f32.vlgmr.msra.gmra.mxu0 %v4558_v21  ;;  %v1524_v21 = vld [vmem:[#allocation2 + $0x3d8] sm:$0xff] }
 0x297   : > { %4672 = vmatpush3.msra.mxu0 %v1188_v20  ;;  %v1525_v20 = vld [vmem:[#allocation2 + $0x3e0] sm:$0xff] }
 0x298   : > { %v859_v27 = vpop.f32.mrf.mxu1  ;;  %4673 = vmatprep.subr.mxu0 %v1187_v23 }
 0x299   : > { %4668 = vmatprep.mubr.f32.mxu1 %v859_v27  ;;  %4674 = vmatpush3.msra.mxu0 %v1187_v23  ;;  %v1520_v23 = vld [vmem:[#allocation2 + $0x3b8] sm:$0xff]  ;;  %v1517_v27 = vld [vmem:[#allocation2 + $0x3a0] sm:$0xff] }
 0x29a   : > { %4669 = vmatmul.mubr.f32.vlgmr.msra.gmra.mxu1 %v4565_v24  ;;  %4675 = vmatprep.subr.mxu0 %v1186_v25  ;;  %v1519_v24 = vld [vmem:[#allocation2 + $0x3b0] sm:$0xff] }
 0x29b   : > { %4707 = vmatpush3.msra.mxu1 %v1171_v19  ;;  %4676 = vmatpush3.msra.mxu0 %v1186_v25  ;;  %v1526_v19 = vld [vmem:[#allocation2 + $0x3e8] sm:$0xff] }
 0x29c   : > { %4708 = vmatprep.subr.mxu1 %v1170_v28  ;;  %4677 = vmatprep.subr.mxu0 %v1185_v29  ;;  %v1518_v25 = vld [vmem:[#allocation2 + $0x3a8] sm:$0xff] }
 0x29d   : > { %4709 = vmatpush3.msra.mxu1 %v1170_v28  ;;  %4678 = vmatpush3.msra.mxu0 %v1185_v29  ;;  %v1516_v28 = vld [vmem:[#allocation2 + $0x398] sm:$0xff]  ;;  %v1515_v29 = vld [vmem:[#allocation2 + $0x390] sm:$0xff] }
 0x29e   : > { %4710 = vmatprep.subr.mxu1 %v1169_v30  ;;  %4679 = vmatprep.subr.mxu0 %v1184_v31 }
 0x29f   : > { %4711 = vmatpush3.msra.mxu1 %v1169_v30  ;;  %4680 = vmatpush3.msra.mxu0 %v1184_v31  ;;  %v1514_v30 = vld [vmem:[#allocation2 + $0x388] sm:$0xff]  ;;  %v1513_v31 = vld [vmem:[#allocation2 + $0x380] sm:$0xff] }
 0x2a0   : > { %4712 = vmatprep.subr.mxu1 %v1168_v32  ;;  %4681 = vmatprep.subr.mxu0 %v1183_v33 }
 0x2a1   : > { %4713 = vmatpush3.msra.mxu1 %v1168_v32  ;;  %4682 = vmatpush3.msra.mxu0 %v1183_v33  ;;  %v1695_v32 = vld [vmem:[#allocation2 + $0x478] sm:$0xff]  ;;  %v1341_v33 = vsub.s32 6, %v5705_v1 }
 0x2a2   : > { %4714 = vmatprep.subr.mxu1 %v1167_v34  ;;  %4683 = vmatprep.subr.mxu0 %v1182_v35 }
 0x2a3   : > { %4715 = vmatpush3.msra.mxu1 %v1167_v34  ;;  %4684 = vmatpush3.msra.mxu0 %v1182_v35  ;;  %v1342_v35 = vrot.slane %v5753_v26, %v1341_v33  ;;  %v1940_v33 = vld [vmem:[#allocation2 + $0x4a0] sm:$0xff] }
 0x2a4   : > { %4716 = vmatprep.subr.mxu1 %v1166_v36  ;;  %4685 = vmatprep.subr.mxu0 %v1181_v37 }
 0x2a5   : > { %4717 = vmatpush3.msra.mxu1 %v1166_v36  ;;  %4686 = vmatpush3.msra.mxu0 %v1181_v37 }
 0x2a6   : > { %4718 = vmatprep.subr.mxu1 %v1165_v38  ;;  %4738 = vmatprep.mubr.f32.mxu1 %v5722_v8 }
 0x2a7   : > { %4719 = vmatpush3.msra.mxu1 %v1165_v38  ;;  %4687 = vmatprep.subr.mxu0 %v1180_v41 }
 0x2a8   : > { %4720 = vmatprep.subr.mxu1 %v1164_v39  ;;  %4688 = vmatpush3.msra.mxu0 %v1180_v41 }
 0x2a9   : > { %4721 = vmatpush3.msra.mxu1 %v1164_v39  ;;  %4689 = vmatprep.subr.mxu0 %v1179_v43 }
 0x2aa   : > { %4722 = vmatprep.subr.mxu1 %v1163_v40  ;;  %4690 = vmatpush3.msra.mxu0 %v1179_v43  ;;  %v1694_v43 = vld [vmem:[#allocation2 + $0x470] sm:$0xff] }
 0x2ab   : > { %4723 = vmatpush3.msra.mxu1 %v1163_v40  ;;  %4691 = vmatprep.subr.mxu0 %v1178_v45 }
 0x2ac   : > { %4724 = vmatprep.subr.mxu1 %v1162_v42  ;;  %4692 = vmatpush3.msra.mxu0 %v1178_v45  ;;  %v1510_v45 = vld [vmem:[#allocation2 + $0x370] sm:$0xff] }
 0x2ad   : > { %4725 = vmatpush3.msra.mxu1 %v1162_v42  ;;  %4693 = vmatprep.subr.mxu0 %v1177_v47 }
 0x2ae   : > { %4726 = vmatprep.subr.mxu1 %v1161_v44  ;;  %4694 = vmatpush3.msra.mxu0 %v1177_v47  ;;  %v1509_v47 = vld [vmem:[#allocation2 + $0x368] sm:$0xff] }
 0x2af   : > { %4727 = vmatpush3.msra.mxu1 %v1161_v44  ;;  %4695 = vmatprep.subr.mxu0 %v1176_v49  ;;  %v1511_v44 = vld [vmem:[#allocation2 + $0x378] sm:$0xff] }
 0x2b0   : > { %4728 = vmatprep.subr.mxu1 %v1160_v46  ;;  %4696 = vmatpush3.msra.mxu0 %v1176_v49  ;;  %v1508_v49 = vld [vmem:[#allocation2 + $0x360] sm:$0xff] }
 0x2b1   : > { %4729 = vmatpush3.msra.mxu1 %v1160_v46  ;;  %4697 = vmatprep.subr.mxu0 %v1175_v51  ;;  %v1693_v46 = vld [vmem:[#allocation2 + $0x468] sm:$0xff] }
 0x2b2   : > { %4730 = vmatprep.subr.mxu1 %v1159_v48  ;;  %4698 = vmatpush3.msra.mxu0 %v1175_v51  ;;  %v1507_v51 = vld [vmem:[#allocation2 + $0x358] sm:$0xff] }
 0x2b3   : > { %4731 = vmatpush3.msra.mxu1 %v1159_v48  ;;  %4699 = vmatprep.subr.mxu0 %v1174_v53  ;;  %v1692_v48 = vld [vmem:[#allocation2 + $0x460] sm:$0xff] }
 0x2b4   : > { %4732 = vmatprep.subr.mxu1 %v1158_v50  ;;  %4700 = vmatpush3.msra.mxu0 %v1174_v53  ;;  %v1506_v53 = vld [vmem:[#allocation2 + $0x350] sm:$0xff] }
 0x2b5   : > { %4733 = vmatpush3.msra.mxu1 %v1158_v50  ;;  %4701 = vmatprep.subr.mxu0 %v1173_v55  ;;  %v1691_v50 = vld [vmem:[#allocation2 + $0x458] sm:$0xff] }
 0x2b6   : > { %4734 = vmatprep.subr.mxu1 %v1157_v52  ;;  %4702 = vmatpush3.msra.mxu0 %v1173_v55  ;;  %v4600_v57 = vpop.f32.mrf.mxu1  ;;  %v1505_v55 = vld [vmem:[#allocation2 + $0x348] sm:$0xff] }
 0x2b7   : > { %4735 = vmatpush3.msra.mxu1 %v1157_v52  ;;  %4755 = vmatprep.subr.mxu0 %v1528_v56  ;;  %v1690_v52 = vld [vmem:[#allocation2 + $0x450] sm:$0xff] }
 0x2b8   : > { %4736 = vmatprep.subr.mxu1 %v1156_v54  ;;  %v968_v60 = vpop.f32.mrf.mxu1 }
 0x2b9   : > { %4737 = vmatpush3.msra.mxu1 %v1156_v54  ;;  %v1689_v54 = vld [vmem:[#allocation2 + $0x448] sm:$0xff] }
 0x2ba   : > { %4739 = vmatmul.mubr.f32.vlgmr.msra.gmra.mxu1 %v5719_v7 }
 0x2bb   : > { %4745 = vmatprep.mubr.msk.f32.mxu1 %vm266_vm0, %v5724_v10 }
 0x356   : > { %v4635_v59 = vpop.f32.mrf.mxu0 }
 0x357   : > { %v1049_v62 = vadd.f32 %v4635_v59, %v4600_v57  ;;  %v1504_v57 = vld [vmem:[#allocation2 + $0x340] sm:$0xff]  ;;  %v1503_v59 = vld [vmem:[#allocation2 + $0x338] sm:$0xff] }
 0x358   : > { %v1043_v61 = vpop.f32.mrf.mxu0 }
 0x359   : > { %v1044_v2 = vadd.f32 %v1043_v61, %v968_v60  ;;  %v1686_v60 = vld [vmem:[#allocation2 + $0x430] sm:$0xff] }
 0x35a   : > { %v4670_v0 = vpop.f32.mrf.mxu1  ;;  %v1502_v61 = vld [vmem:[#allocation2 + $0x330] sm:$0xff] }
 0x35b   : > { %v1145_v3 = vadd.f32 %v4670_v0, %v1049_v62  ;;  %v1685_v62 = vld [vmem:[#allocation2 + $0x428] sm:$0xff]  ;;  %v1684_v0 = vld [vmem:[#allocation2 + $0x420] sm:$0xff] }
 0x35c   : > { %v1135_v4 = vpop.f32.mrf.mxu1 }
 0x35d   : > { %v1151_v5 = vadd.f32 %v1149_v63, %v1145_v3  ;;  %v1144_v6 = vadd.f32 %v1135_v4, %v1044_v2  ;;  %v1500_v2 = vld [vmem:[#allocation2 + $0x320] sm:$0xff]  ;;  %v1499_v3 = vld [vmem:[#allocation2 + $0x318] sm:$0xff]  ;;  %v1498_v4 = vld [vmem:[#allocation2 + $0x310] sm:$0xff] }
 0x35f   : > { %v1150_v9 = vadd.f32 %v1149_v63, %v1144_v6  ;;  %v1153_v11 = vmul.f32 0.1, %v1151_v5  ;;  %v1501_v63 = vld [vmem:[#allocation2 + $0x328] sm:$0xff]  ;;  %v1683_v6 = vld [vmem:[#allocation2 + $0x418] sm:$0xff] }
 0x360   : > { %v1497_v5 = vld [vmem:[#allocation2 + $0x308] sm:$0xff] }
 0x361   : > { %v1152_v12 = vmul.f32 0.1, %v1150_v9  ;;  %v5779_v17 = vadd.f32 %v1153_v11, %v5719_v7  ;;  %v1522_v7 = vld [vmem:[#allocation2 + $0x3c8] sm:$0xff]  ;;  %v1496_v9 = vld [vmem:[#allocation2 + $0x300] sm:$0xff]  ;;  %v1682_v11 = vld [vmem:[#allocation2 + $0x410] sm:$0xff] }
 0x363   : > { %v5776_v15 = vadd.f32 %v1152_v12, %v5722_v8  ;;  %v1523_v8 = vld [vmem:[#allocation2 + $0x3d0] sm:$0xff]  ;;  %v1681_v12 = vld [vmem:[#allocation2 + $0x408] sm:$0xff] }
 0x365   : > { %4703 = vmatprep.mubr.f32.mxu0 %v5776_v15 }
 0x366   : > { %4704 = vmatmul.mubr.f32.vlgmr.msra.gmra.mxu0 %v5779_v17 }
 0x367   : > { %4756 = vmatpush3.msra.mxu0 %v1528_v56  ;;  %v1688_v56 = vld [vmem:[#allocation2 + $0x440] sm:$0xff] }
 0x368   : > { %4757 = vmatprep.subr.mxu0 %v1527_v18 }
 0x369   : > { %4758 = vmatpush3.msra.mxu0 %v1527_v18  ;;  %v1680_v18 = vld [vmem:[#allocation2 + $0x400] sm:$0xff] }
 0x36a   : > { %4759 = vmatprep.subr.mxu0 %v1526_v19 }
 0x36b   : > { %4760 = vmatpush3.msra.mxu0 %v1526_v19 }
 0x36c   : > { %4761 = vmatprep.subr.mxu0 %v1525_v20 }
 0x36d   : > { %4762 = vmatpush3.msra.mxu0 %v1525_v20 }
 0x36e   : > { %4763 = vmatprep.subr.mxu0 %v1524_v21 }
 0x36f   : > { %4764 = vmatpush3.msra.mxu0 %v1524_v21 }
 0x370   : > { %4765 = vmatprep.subr.mxu0 %v1523_v8 }
 0x371   : > { %4766 = vmatpush3.msra.mxu0 %v1523_v8 }
 0x372   : > { %4767 = vmatprep.subr.mxu0 %v1522_v7 }
 0x373   : > { %4768 = vmatpush3.msra.mxu0 %v1522_v7  ;;  %v1951_v7 = vld [vmem:[#allocation2 + $0x4f8] sm:$0xff] }
 0x374   : > { %4769 = vmatprep.subr.mxu0 %v1521_v22 }
 0x375   : > { %4770 = vmatpush3.msra.mxu0 %v1521_v22  ;;  %v1950_v22 = vld [vmem:[#allocation2 + $0x4f0] sm:$0xff] }
 0x376   : > { %4771 = vmatprep.subr.mxu0 %v1520_v23 }
 0x377   : > { %4772 = vmatpush3.msra.mxu0 %v1520_v23  ;;  %v1949_v23 = vld [vmem:[#allocation2 + $0x4e8] sm:$0xff] }
 0x378   : > { %4773 = vmatprep.subr.mxu0 %v1519_v24 }
 0x379   : > { %4774 = vmatpush3.msra.mxu0 %v1519_v24  ;;  %v1948_v24 = vld [vmem:[#allocation2 + $0x4e0] sm:$0xff] }
 0x37a   : > { %4775 = vmatprep.subr.mxu0 %v1518_v25  ;;  %v4740_v34 = vpop.f32.mrf.mxu1 }
 0x37b   : > { %4776 = vmatpush3.msra.mxu0 %v1518_v25  ;;  %v1947_v25 = vld [vmem:[#allocation2 + $0x4d8] sm:$0xff] }
 0x37c   : > { %4777 = vmatprep.subr.mxu0 %v1517_v27  ;;  %v1330_v38 = vpop.f32.mrf.mxu1 }
 0x37d   : > { %4778 = vmatpush3.msra.mxu0 %v1517_v27  ;;  %v1946_v27 = vld [vmem:[#allocation2 + $0x4d0] sm:$0xff] }
 0x37e   : > { %4779 = vmatprep.subr.mxu0 %v1516_v28 }
 0x37f   : > { %4780 = vmatpush3.msra.mxu0 %v1516_v28  ;;  %v1945_v28 = vld [vmem:[#allocation2 + $0x4c8] sm:$0xff] }
 0x380   : > { %4781 = vmatprep.subr.mxu0 %v1515_v29 }
 0x381   : > { %4782 = vmatpush3.msra.mxu0 %v1515_v29  ;;  %v1944_v29 = vld [vmem:[#allocation2 + $0x4c0] sm:$0xff] }
 0x382   : > { %4783 = vmatprep.subr.mxu0 %v1514_v30 }
 0x383   : > { %4784 = vmatpush3.msra.mxu0 %v1514_v30  ;;  %v1943_v30 = vld [vmem:[#allocation2 + $0x4b8] sm:$0xff] }
 0x384   : > { %4785 = vmatprep.subr.mxu0 %v1513_v31 }
 0x385   : > { %4786 = vmatpush3.msra.mxu0 %v1513_v31  ;;  %v1942_v31 = vld [vmem:[#allocation2 + $0x4b0] sm:$0xff] }
 0x386   : > { %4825 = vmatprep.subr.mxu0 %v1695_v32 }
 0x426   : > { %v4705_v36 = vpop.f32.mrf.mxu0 }
 0x427   : > { %v1336_v37 = vadd.f32 %v4740_v34, %v4705_v36  ;;  %v1939_v34 = vld [vmem:[#allocation2 + $0x498] sm:$0xff]  ;;  %v1937_v36 = vld [vmem:[#allocation2 + $0x488] sm:$0xff] }
 0x428   : > { %v1255_v39 = vpop.f32.mrf.mxu0 }
 0x429   : > { %v5785_v40 = vadd.f32 %v1342_v35, %v1336_v37  ;;  %v1331_v41 = vadd.f32 %v1330_v38, %v1255_v39  ;;  %v1775_v38 = vsub.s32 2, %v5705_v1 }
 0x42b   : > { %v5787_v42 = vadd.f32 %v1342_v35, %v1331_v41  ;;  %4741 = vmatprep.subr.mxu1 %v5785_v40  ;;  %v1938_v35 = vld [vmem:[#allocation2 + $0x490] sm:$0xff] }
 0x42c   : > { %4742 = vmatpush3.msra.mxu1 %v5785_v40 }
 0x42d   : > { %4743 = vmatprep.subr.mxu1 %v5787_v42  ;;  %4787 = vmatprep.mubr.f32.mxu0 %v5787_v42 }
 0x42e   : > { %4744 = vmatpush3.msra.mxu1 %v5787_v42  ;;  %4788 = vmatmul.mubr.f32.vlgmr.msra.gmra.mxu0 %v5785_v40 }
 0x42f   : > { %4746 = vmatmul.mubr.msk.f32.vlgmr.msra.gmra.mxu1 %vm266_vm0, %v5730_v13  ;;  %4748 = vmatprep.subr.mxu1 %v5785_v40 }
 0x430   : > { %4749 = vmatpush3.msra.mxu1 %v5785_v40  ;;  %4752 = vmatprep.mubr.msk.f32.mxu1 %vm266_vm0, %v5733_v14 }
 0x431   : > { %4750 = vmatprep.subr.mxu1 %v5787_v42  ;;  %4826 = vmatpush3.msra.mxu0 %v1695_v32  ;;  %v1941_v32 = vld [vmem:[#allocation2 + $0x4a8] sm:$0xff] }
 0x432   : > { %4751 = vmatpush3.msra.mxu1 %v5787_v42  ;;  %4827 = vmatprep.subr.mxu0 %v1694_v43 }
 0x433   : > { %4753 = vmatmul.mubr.msk.f32.vlgmr.msra.gmra.mxu1 %vm266_vm0, %v5742_v16  ;;  %4790 = vmatprep.subr.mxu1 %v1511_v44 }
 0x434   : > { %4791 = vmatpush3.msra.mxu1 %v1511_v44  ;;  %4828 = vmatpush3.msra.mxu0 %v1694_v43 }
 0x435   : > { %4792 = vmatprep.subr.mxu1 %v1510_v45  ;;  %4829 = vmatprep.subr.mxu0 %v1693_v46 }
 0x436   : > { %4793 = vmatpush3.msra.mxu1 %v1510_v45  ;;  %4830 = vmatpush3.msra.mxu0 %v1693_v46  ;;  %v1776_v45 = vrot.slane %v5753_v26, %v1775_v38  ;;  %v1968_v26 = vld [vmem:[#allocation2 + $0x578] sm:$0xff] }
 0x437   : > { %4794 = vmatprep.subr.mxu1 %v1509_v47  ;;  %4831 = vmatprep.subr.mxu0 %v1692_v48 }
 0x438   : > { %4795 = vmatpush3.msra.mxu1 %v1509_v47  ;;  %4832 = vmatpush3.msra.mxu0 %v1692_v48 }
 0x439   : > { %4796 = vmatprep.subr.mxu1 %v1508_v49  ;;  %4833 = vmatprep.subr.mxu0 %v1691_v50 }
 0x43a   : > { %4797 = vmatpush3.msra.mxu1 %v1508_v49  ;;  %4834 = vmatpush3.msra.mxu0 %v1691_v50 }
 0x43b   : > { %4798 = vmatprep.subr.mxu1 %v1507_v51  ;;  %4835 = vmatprep.subr.mxu0 %v1690_v52 }
 0x43c   : > { %4799 = vmatpush3.msra.mxu1 %v1507_v51  ;;  %4836 = vmatpush3.msra.mxu0 %v1690_v52 }
 0x43d   : > { %4800 = vmatprep.subr.mxu1 %v1506_v53  ;;  %4837 = vmatprep.subr.mxu0 %v1689_v54 }
 0x43e   : > { %4801 = vmatpush3.msra.mxu1 %v1506_v53  ;;  %4838 = vmatpush3.msra.mxu0 %v1689_v54 }
 0x43f   : > { %4802 = vmatprep.subr.mxu1 %v1505_v55  ;;  %4839 = vmatprep.subr.mxu0 %v1688_v56 }
 0x440   : > { %4803 = vmatpush3.msra.mxu1 %v1505_v55  ;;  %4840 = vmatpush3.msra.mxu0 %v1688_v56 }
 0x441   : > { %4804 = vmatprep.subr.mxu1 %v1504_v57  ;;  %4841 = vmatprep.subr.mxu0 %v1687_v58 }
 0x442   : > { %4805 = vmatpush3.msra.mxu1 %v1504_v57  ;;  %4842 = vmatpush3.msra.mxu0 %v1687_v58  ;;  %v1967_v57 = vld [vmem:[#allocation2 + $0x570] sm:$0xff]  ;;  %v1966_v58 = vld [vmem:[#allocation2 + $0x568] sm:$0xff] }
 0x443   : > { %4806 = vmatprep.subr.mxu1 %v1503_v59  ;;  %4843 = vmatprep.subr.mxu0 %v1686_v60 }
 0x444   : > { %4807 = vmatpush3.msra.mxu1 %v1503_v59  ;;  %4844 = vmatpush3.msra.mxu0 %v1686_v60  ;;  %v1965_v59 = vld [vmem:[#allocation2 + $0x560] sm:$0xff]  ;;  %v1964_v60 = vld [vmem:[#allocation2 + $0x558] sm:$0xff] }
 0x445   : > { %4808 = vmatprep.subr.mxu1 %v1502_v61  ;;  %4845 = vmatprep.subr.mxu0 %v1685_v62 }
 0x446   : > { %4809 = vmatpush3.msra.mxu1 %v1502_v61  ;;  %4846 = vmatpush3.msra.mxu0 %v1685_v62  ;;  %v1963_v61 = vld [vmem:[#allocation2 + $0x550] sm:$0xff]  ;;  %v1962_v62 = vld [vmem:[#allocation2 + $0x548] sm:$0xff] }
 0x447   : > { %4810 = vmatprep.subr.mxu1 %v1501_v63  ;;  %4847 = vmatprep.subr.mxu0 %v1684_v0 }
 0x448   : > { %4811 = vmatpush3.msra.mxu1 %v1501_v63  ;;  %4848 = vmatpush3.msra.mxu0 %v1684_v0  ;;  %v1961_v63 = vld [vmem:[#allocation2 + $0x540] sm:$0xff]  ;;  %v1960_v0 = vld [vmem:[#allocation2 + $0x538] sm:$0xff] }
 0x449   : > { %4812 = vmatprep.subr.mxu1 %v1500_v2  ;;  %4849 = vmatprep.subr.mxu0 %v1683_v6 }
 0x44a   : > { %4813 = vmatpush3.msra.mxu1 %v1500_v2  ;;  %4850 = vmatpush3.msra.mxu0 %v1683_v6  ;;  %v1959_v2 = vld [vmem:[#allocation2 + $0x530] sm:$0xff] }
 0x44b   : > { %4814 = vmatprep.subr.mxu1 %v1499_v3  ;;  %4851 = vmatprep.subr.mxu0 %v1682_v11  ;;  %v1955_v6 = vld [vmem:[#allocation2 + $0x510] sm:$0xff] }
 0x44c   : > { %4815 = vmatpush3.msra.mxu1 %v1499_v3  ;;  %4852 = vmatpush3.msra.mxu0 %v1682_v11  ;;  %v1958_v3 = vld [vmem:[#allocation2 + $0x528] sm:$0xff]  ;;  %v1953_v11 = vld [vmem:[#allocation2 + $0x500] sm:$0xff] }
 0x44d   : > { %4816 = vmatprep.subr.mxu1 %v1498_v4  ;;  %4853 = vmatprep.subr.mxu0 %v1681_v12 }
 0x44e   : > { %4817 = vmatpush3.msra.mxu1 %v1498_v4  ;;  %4854 = vmatpush3.msra.mxu0 %v1681_v12  ;;  %v1957_v4 = vld [vmem:[#allocation2 + $0x520] sm:$0xff]  ;;  %v2135_v12 = vld [vmem:[#allocation2 + $0x5f8] sm:$0xff] }
 0x44f   : > { %4818 = vmatprep.subr.mxu1 %v1497_v5  ;;  %4855 = vmatprep.subr.mxu0 %v1680_v18 }
 0x450   : > { %4819 = vmatpush3.msra.mxu1 %v1497_v5  ;;  %4856 = vmatpush3.msra.mxu0 %v1680_v18  ;;  %v1956_v5 = vld [vmem:[#allocation2 + $0x518] sm:$0xff]  ;;  %v2134_v18 = vld [vmem:[#allocation2 + $0x5f0] sm:$0xff] }
 0x451   : > { %4820 = vmatprep.subr.mxu1 %v1496_v9  ;;  %4909 = vmatprep.subr.mxu0 %v1951_v7 }
 0x452   : > { %4821 = vmatpush3.msra.mxu1 %v1496_v9  ;;  %v1954_v9 = vld [vmem:[#allocation2 + $0x508] sm:$0xff] }
 0x4ee   : > { %v4789_v37 = vpop.f32.mrf.mxu0 }
 0x4ef   : > { %v4747_v19 = vpop.f32.mrf.mxu1 }
 0x4f0   : > { %v1595_v41 = vpop.f32.mrf.mxu0 }
 0x4f1   : > { %v1411_v20 = vpop.f32.mrf.mxu1 }
 0x4f2   : > { %4822 = vmatprep.mubr.f32.mxu1 %v1411_v20  ;;  %v2132_v20 = vld [vmem:[#allocation2 + $0x5e0] sm:$0xff] }
 0x4f3   : > { %v4754_v21 = vpop.f32.mrf.mxu1  ;;  %4823 = vmatmul.mubr.f32.vlgmr.msra.gmra.mxu1 %v4747_v19  ;;  %v2133_v19 = vld [vmem:[#allocation2 + $0x5e8] sm:$0xff] }
 0x4f4   : > { %4864 = vmatprep.mubr.msk.f32.mxu1 %vm266_vm0, %v5724_v10 }
 0x4f5   : > { %v1486_v8 = vpop.f32.mrf.mxu1 }
 0x4f6   : > { %4857 = vmatprep.mubr.f32.mxu0 %v1486_v8  ;;  %v2130_v8 = vld [vmem:[#allocation2 + $0x5d0] sm:$0xff] }
 0x4f7   : > { %4858 = vmatmul.mubr.f32.vlgmr.msra.gmra.mxu0 %v4754_v21  ;;  %v2131_v21 = vld [vmem:[#allocation2 + $0x5d8] sm:$0xff] }
 0x4f8   : > { %4910 = vmatpush3.msra.mxu0 %v1951_v7  ;;  %v2129_v7 = vld [vmem:[#allocation2 + $0x5c8] sm:$0xff] }
 0x4f9   : > { %4911 = vmatprep.subr.mxu0 %v1950_v22 }
 0x4fa   : > { %4912 = vmatpush3.msra.mxu0 %v1950_v22  ;;  %v2128_v22 = vld [vmem:[#allocation2 + $0x5c0] sm:$0xff] }
 0x4fb   : > { %4913 = vmatprep.subr.mxu0 %v1949_v23 }
 0x4fc   : > { %4914 = vmatpush3.msra.mxu0 %v1949_v23  ;;  %v2127_v23 = vld [vmem:[#allocation2 + $0x5b8] sm:$0xff] }
 0x4fd   : > { %4915 = vmatprep.subr.mxu0 %v1948_v24 }
 0x4fe   : > { %4916 = vmatpush3.msra.mxu0 %v1948_v24  ;;  %v2126_v24 = vld [vmem:[#allocation2 + $0x5b0] sm:$0xff] }
 0x4ff   : > { %4917 = vmatprep.subr.mxu0 %v1947_v25 }
 0x500   : > { %4918 = vmatpush3.msra.mxu0 %v1947_v25  ;;  %v2125_v25 = vld [vmem:[#allocation2 + $0x5a8] sm:$0xff] }
 0x501   : > { %4919 = vmatprep.subr.mxu0 %v1946_v27 }
 0x502   : > { %4920 = vmatpush3.msra.mxu0 %v1946_v27  ;;  %v2124_v27 = vld [vmem:[#allocation2 + $0x5a0] sm:$0xff] }
 0x503   : > { %4921 = vmatprep.subr.mxu0 %v1945_v28 }
 0x504   : > { %4922 = vmatpush3.msra.mxu0 %v1945_v28  ;;  %v2123_v28 = vld [vmem:[#allocation2 + $0x598] sm:$0xff] }
 0x505   : > { %4923 = vmatprep.subr.mxu0 %v1944_v29 }
 0x506   : > { %4924 = vmatpush3.msra.mxu0 %v1944_v29  ;;  %v1936_v29 = vld [vmem:[#allocation2 + $0x480] sm:$0xff] }
 0x507   : > { %4925 = vmatprep.subr.mxu0 %v1943_v30 }
 0x508   : > { %4926 = vmatpush3.msra.mxu0 %v1943_v30  ;;  %v2122_v30 = vld [vmem:[#allocation2 + $0x590] sm:$0xff] }
 0x509   : > { %4927 = vmatprep.subr.mxu0 %v1942_v31 }
 0x50a   : > { %4928 = vmatpush3.msra.mxu0 %v1942_v31  ;;  %v2121_v31 = vld [vmem:[#allocation2 + $0x588] sm:$0xff] }
 0x50b   : > { %4929 = vmatprep.subr.mxu0 %v1941_v32 }
 0x50c   : > { %4930 = vmatpush3.msra.mxu0 %v1941_v32  ;;  %v2256_v32 = vld [vmem:[#allocation4 + $0x1f8] sm:$0xff] }
 0x50d   : > { %4931 = vmatprep.subr.mxu0 %v1940_v33 }
 0x50e   : > { %4932 = vmatpush3.msra.mxu0 %v1940_v33  ;;  %v2120_v33 = vld [vmem:[#allocation2 + $0x580] sm:$0xff] }
 0x50f   : > { %4933 = vmatprep.subr.mxu0 %v1939_v34 }
 0x510   : > { %4934 = vmatpush3.msra.mxu0 %v1939_v34  ;;  %v2239_v34 = vld [vmem:[#allocation4 + $0x178] sm:$0xff] }
 0x511   : > { %4935 = vmatprep.subr.mxu0 %v1938_v35 }
 0x512   : > { %4936 = vmatpush3.msra.mxu0 %v1938_v35 }
 0x513   : > { %4937 = vmatprep.subr.mxu0 %v1937_v36 }
 0x514   : > { %4938 = vmatpush3.msra.mxu0 %v1937_v36 }
 0x515   : > { %4939 = vmatprep.subr.mxu0 %v1936_v29 }
 0x516   : > { %4940 = vmatpush3.msra.mxu0 %v1936_v29  ;;  %v2410_v29 = vld [vmem:[#allocation4 + $0x210] sm:$0xff] }
 0x517   : > { %4979 = vmatprep.subr.mxu0 %v2256_v32 }
 0x5b3   : > { %v4824_v39 = vpop.f32.mrf.mxu1 }
 0x5b4   : > { %v1676_v44 = vadd.f32 %v4824_v39, %v4789_v37  ;;  %v2255_v37 = vld [vmem:[#allocation4 + $0x1f0] sm:$0xff]  ;;  %v2254_v39 = vld [vmem:[#allocation4 + $0x1e8] sm:$0xff] }
 0x5b5   : > { %v1670_v43 = vpop.f32.mrf.mxu1 }
 0x5b6   : > { %v1671_v47 = vadd.f32 %v1670_v43, %v1595_v41  ;;  %v2253_v43 = vld [vmem:[#allocation4 + $0x1e0] sm:$0xff] }
 0x5b7   : > { %v4859_v46 = vpop.f32.mrf.mxu0 }
 0x5b8   : > { %v1772_v48 = vadd.f32 %v4859_v46, %v1676_v44  ;;  %v2238_v44 = vld [vmem:[#allocation4 + $0x170] sm:$0xff]  ;;  %v2237_v46 = vld [vmem:[#allocation4 + $0x168] sm:$0xff] }
 0x5b9   : > { %v1762_v49 = vpop.f32.mrf.mxu0 }
 0x5ba   : > { %v1778_v50 = vadd.f32 %v1776_v45, %v1772_v48  ;;  %v1771_v51 = vadd.f32 %v1762_v49, %v1671_v47  ;;  %v2251_v47 = vld [vmem:[#allocation4 + $0x1d0] sm:$0xff]  ;;  %v2236_v48 = vld [vmem:[#allocation4 + $0x160] sm:$0xff]  ;;  %v2250_v49 = vld [vmem:[#allocation4 + $0x1c8] sm:$0xff] }
 0x5bc   : > { %vm1780_vm7 = vcmp.ge.f32.partialorder %v1778_v50, 0.0  ;;  %v1782_v52 = vmul.f32 0.01, %v1778_v50  ;;  %v1777_v53 = vadd.f32 %v1776_v45, %v1771_v51  ;;  %v2252_v45 = vld [vmem:[#allocation4 + $0x1d8] sm:$0xff]  ;;  %v2249_v51 = vld [vmem:[#allocation4 + $0x1c0] sm:$0xff] }
 0x5be   : > { %vm1779_vm8 = vcmp.ge.f32.partialorder %v1777_v53, 0.0  ;;  %v1781_v54 = vmul.f32 0.01, %v1777_v53  ;;  %v5809_v55 = vsel %vm1780_vm7, %v1778_v50, %v1782_v52  ;;  %v2235_v50 = vld [vmem:[#allocation4 + $0x158] sm:$0xff]  ;;  %v2234_v52 = vld [vmem:[#allocation4 + $0x150] sm:$0xff] }
 0x5bf   : > { %4860 = vmatprep.subr.mxu1 %v5809_v55 }
 0x5c0   : > { %4861 = vmatpush3.msra.mxu1 %v5809_v55  ;;  %v1783_v56 = vsel %vm1779_vm8, %v1777_v53, %v1781_v54  ;;  %v2248_v53 = vld [vmem:[#allocation4 + $0x1b8] sm:$0xff]  ;;  %v2233_v54 = vld [vmem:[#allocation4 + $0x148] sm:$0xff] }
 0x5c1   : > { %4862 = vmatprep.subr.mxu1 %v1783_v56 }
 0x5c2   : > { %4863 = vmatpush3.msra.mxu1 %v1783_v56 }
 0x5c3   : > { %4865 = vmatmul.mubr.msk.f32.vlgmr.msra.gmra.mxu1 %vm266_vm0, %v5730_v13  ;;  %4867 = vmatprep.subr.mxu1 %v5809_v55 }
 0x5c4   : > { %4868 = vmatpush3.msra.mxu1 %v5809_v55  ;;  %4871 = vmatprep.mubr.msk.f32.mxu1 %vm266_vm0, %v5733_v14 }
 0x5c5   : > { %4869 = vmatprep.subr.mxu1 %v1783_v56 }
 0x5c6   : > { %4870 = vmatpush3.msra.mxu1 %v1783_v56 }
 0x5c7   : > { %4872 = vmatmul.mubr.msk.f32.vlgmr.msra.gmra.mxu1 %vm266_vm0, %v5742_v16  ;;  %4874 = vmatprep.subr.mxu1 %v1968_v26 }
 0x5c8   : > { %4875 = vmatpush3.msra.mxu1 %v1968_v26  ;;  %4906 = vmatprep.mubr.f32.mxu1 %v1783_v56  ;;  %v2232_v56 = vld [vmem:[#allocation4 + $0x140] sm:$0xff]  ;;  %v2246_v26 = vld [vmem:[#allocation4 + $0x1a8] sm:$0xff] }
 0x5c9   : > { %4876 = vmatprep.subr.mxu1 %v1967_v57 }
 0x5ca   : > { %4877 = vmatpush3.msra.mxu1 %v1967_v57  ;;  %v2231_v57 = vld [vmem:[#allocation4 + $0x138] sm:$0xff] }
 0x5cb   : > { %4878 = vmatprep.subr.mxu1 %v1966_v58 }
 0x5cc   : > { %4879 = vmatpush3.msra.mxu1 %v1966_v58  ;;  %v2245_v58 = vld [vmem:[#allocation4 + $0x1a0] sm:$0xff] }
 0x5cd   : > { %4880 = vmatprep.subr.mxu1 %v1965_v59 }
 0x5ce   : > { %4881 = vmatpush3.msra.mxu1 %v1965_v59  ;;  %v2230_v59 = vld [vmem:[#allocation4 + $0x130] sm:$0xff] }
 0x5cf   : > { %4882 = vmatprep.subr.mxu1 %v1964_v60 }
 0x5d0   : > { %4883 = vmatpush3.msra.mxu1 %v1964_v60  ;;  %v2244_v60 = vld [vmem:[#allocation4 + $0x198] sm:$0xff] }
 0x5d1   : > { %4884 = vmatprep.subr.mxu1 %v1963_v61 }
 0x5d2   : > { %4885 = vmatpush3.msra.mxu1 %v1963_v61  ;;  %v2229_v61 = vld [vmem:[#allocation4 + $0x128] sm:$0xff] }
 0x5d3   : > { %4886 = vmatprep.subr.mxu1 %v1962_v62 }
 0x5d4   : > { %4887 = vmatpush3.msra.mxu1 %v1962_v62  ;;  %v2243_v62 = vld [vmem:[#allocation4 + $0x190] sm:$0xff] }
 0x5d5   : > { %4888 = vmatprep.subr.mxu1 %v1961_v63 }
 0x5d6   : > { %4889 = vmatpush3.msra.mxu1 %v1961_v63  ;;  %v2228_v63 = vld [vmem:[#allocation4 + $0x120] sm:$0xff] }
 0x5d7   : > { %4890 = vmatprep.subr.mxu1 %v1960_v0 }
 0x5d8   : > { %4891 = vmatpush3.msra.mxu1 %v1960_v0  ;;  %v2242_v0 = vld [vmem:[#allocation4 + $0x188] sm:$0xff] }
 0x5d9   : > { %4892 = vmatprep.subr.mxu1 %v1959_v2 }
 0x5da   : > { %4893 = vmatpush3.msra.mxu1 %v1959_v2  ;;  %v2227_v2 = vld [vmem:[#allocation4 + $0x118] sm:$0xff] }
 0x5db   : > { %4894 = vmatprep.subr.mxu1 %v1958_v3 }
 0x5dc   : > { %4895 = vmatpush3.msra.mxu1 %v1958_v3  ;;  %v2241_v3 = vld [vmem:[#allocation4 + $0x180] sm:$0xff] }
 0x5dd   : > { %4896 = vmatprep.subr.mxu1 %v1957_v4 }
 0x5de   : > { %4897 = vmatpush3.msra.mxu1 %v1957_v4  ;;  %v2226_v4 = vld [vmem:[#allocation4 + $0x110] sm:$0xff] }
 0x5df   : > { %4898 = vmatprep.subr.mxu1 %v1956_v5 }
 0x5e0   : > { %4899 = vmatpush3.msra.mxu1 %v1956_v5  ;;  %v2225_v5 = vld [vmem:[#allocation4 + $0x108] sm:$0xff] }
 0x5e1   : > { %4900 = vmatprep.subr.mxu1 %v1955_v6 }
 0x5e2   : > { %4901 = vmatpush3.msra.mxu1 %v1955_v6  ;;  %v2224_v6 = vld [vmem:[#allocation4 + $0x100] sm:$0xff] }
 0x5e3   : > { %4902 = vmatprep.subr.mxu1 %v1954_v9 }
 0x5e4   : > { %4903 = vmatpush3.msra.mxu1 %v1954_v9  ;;  %v2423_v9 = vld [vmem:[#allocation4 + $0x278] sm:$0xff] }
 0x5e5   : > { %4904 = vmatprep.subr.mxu1 %v1953_v11 }
 0x5e6   : > { %4905 = vmatpush3.msra.mxu1 %v1953_v11  ;;  %v5504_v11 = vld [vmem:[%s5715_s13] sm:$0xff] }
 0x5e7   : > { %4907 = vmatmul.mubr.f32.vlgmr.msra.gmra.mxu1 %v5809_v55  ;;  %4944 = vmatprep.subr.mxu1 %v2135_v12  ;;  %v2247_v55 = vld [vmem:[#allocation4 + $0x1b0] sm:$0xff] }
 0x5e8   : > { %4945 = vmatpush3.msra.mxu1 %v2135_v12  ;;  %v2422_v12 = vld [vmem:[#allocation4 + $0x270] sm:$0xff] }
 0x5e9   : > { %4946 = vmatprep.subr.mxu1 %v2134_v18 }
 0x5ea   : > { %4947 = vmatpush3.msra.mxu1 %v2134_v18  ;;  %v2421_v18 = vld [vmem:[#allocation4 + $0x268] sm:$0xff] }
 0x5eb   : > { %4948 = vmatprep.subr.mxu1 %v2133_v19 }
 0x5ec   : > { %4949 = vmatpush3.msra.mxu1 %v2133_v19  ;;  %v5505_v19 = vld [vmem:[%s5715_s13 + $0x8] sm:$0xff] }
 0x5ed   : > { %4950 = vmatprep.subr.mxu1 %v2132_v20 }
 0x5ee   : > { %4951 = vmatpush3.msra.mxu1 %v2132_v20  ;;  %v2420_v20 = vld [vmem:[#allocation4 + $0x260] sm:$0xff] }
 0x5ef   : > { %4952 = vmatprep.subr.mxu1 %v2131_v21 }
 0x5f0   : > { %4953 = vmatpush3.msra.mxu1 %v2131_v21  ;;  %v2419_v21 = vld [vmem:[#allocation4 + $0x258] sm:$0xff] }
 0x5f1   : > { %4954 = vmatprep.subr.mxu1 %v2130_v8 }
 0x5f2   : > { %4955 = vmatpush3.msra.mxu1 %v2130_v8  ;;  %v2418_v8 = vld [vmem:[#allocation4 + $0x250] sm:$0xff] }
 0x5f3   : > { %4956 = vmatprep.subr.mxu1 %v2129_v7 }
 0x5f4   : > { %4957 = vmatpush3.msra.mxu1 %v2129_v7  ;;  %v2417_v7 = vld [vmem:[#allocation4 + $0x248] sm:$0xff] }
 0x5f5   : > { %4958 = vmatprep.subr.mxu1 %v2128_v22 }
 0x5f6   : > { %4959 = vmatpush3.msra.mxu1 %v2128_v22  ;;  %v2416_v22 = vld [vmem:[#allocation4 + $0x240] sm:$0xff] }
 0x5f7   : > { %4960 = vmatprep.subr.mxu1 %v2127_v23 }
 0x5f8   : > { %4961 = vmatpush3.msra.mxu1 %v2127_v23  ;;  %v2415_v23 = vld [vmem:[#allocation4 + $0x238] sm:$0xff] }
 0x5f9   : > { %4962 = vmatprep.subr.mxu1 %v2126_v24 }
 0x5fa   : > { %4963 = vmatpush3.msra.mxu1 %v2126_v24  ;;  %v2414_v24 = vld [vmem:[#allocation4 + $0x230] sm:$0xff] }
 0x5fb   : > { %4964 = vmatprep.subr.mxu1 %v2125_v25 }
 0x5fc   : > { %4965 = vmatpush3.msra.mxu1 %v2125_v25  ;;  %v2413_v25 = vld [vmem:[#allocation4 + $0x228] sm:$0xff] }
 0x5fd   : > { %4966 = vmatprep.subr.mxu1 %v2124_v27 }
 0x5fe   : > { %4967 = vmatpush3.msra.mxu1 %v2124_v27  ;;  %v2412_v27 = vld [vmem:[#allocation4 + $0x220] sm:$0xff] }
 0x5ff   : > { %4968 = vmatprep.subr.mxu1 %v2123_v28 }
 0x600   : > { %4969 = vmatpush3.msra.mxu1 %v2123_v28  ;;  %v2411_v28 = vld [vmem:[#allocation4 + $0x218] sm:$0xff] }
 0x601   : > { %4970 = vmatprep.subr.mxu1 %v2122_v30 }
 0x602   : > { %4971 = vmatpush3.msra.mxu1 %v2122_v30  ;;  %v2409_v30 = vld [vmem:[#allocation4 + $0x208] sm:$0xff] }
 0x603   : > { %4972 = vmatprep.subr.mxu1 %v2121_v31 }
 0x604   : > { %4973 = vmatpush3.msra.mxu1 %v2121_v31  ;;  %v2408_v31 = vld [vmem:[#allocation4 + $0x200] sm:$0xff] }
 0x605   : > { %4974 = vmatprep.subr.mxu1 %v2120_v33 }
 0x606   : > { %4975 = vmatpush3.msra.mxu1 %v2120_v33  ;;  %v2215_v33 = vsub.s32 3, %v5705_v1 }
 0x607   : > { %5014 = vmatprep.subr.mxu1 %v2239_v34 }
 0x683   : > { %v4866_v35 = vpop.f32.mrf.mxu1 }
 0x685   : > { %v1851_v36 = vpop.f32.mrf.mxu1 }
 0x686   : > { %4941 = vmatprep.mubr.f32.mxu0 %v1851_v36 }
 0x687   : > { %v4873_v38 = vpop.f32.mrf.mxu1  ;;  %4942 = vmatmul.mubr.f32.vlgmr.msra.gmra.mxu0 %v4866_v35 }
 0x688   : > { %4980 = vmatpush3.msra.mxu0 %v2256_v32  ;;  %5011 = vmatprep.mubr.f32.mxu0 %v5776_v15 }
 0x689   : > { %4981 = vmatprep.subr.mxu0 %v2255_v37  ;;  %v1926_v41 = vpop.f32.mrf.mxu1 }
 0x68a   : > { %4982 = vmatpush3.msra.mxu0 %v2255_v37  ;;  %4976 = vmatprep.mubr.f32.mxu1 %v1926_v41 }
 0x68b   : > { %4983 = vmatprep.subr.mxu0 %v2254_v39  ;;  %4977 = vmatmul.mubr.f32.vlgmr.msra.gmra.mxu1 %v4873_v38  ;;  %v5829_v38 = vld [vmem:[#allocation6] sm:$0xff] }
 0x68c   : > { %4984 = vmatpush3.msra.mxu0 %v2254_v39  ;;  %5015 = vmatpush3.msra.mxu1 %v2239_v34  ;;  %v2216_v39 = vrot.slane %v5829_v38, %v2215_v33  ;;  %v2679_v33 = vld [vmem:[#allocation2 + $0x6a0] sm:$0xff] }
 0x68d   : > { %4985 = vmatprep.subr.mxu0 %v2253_v43  ;;  %5016 = vmatprep.subr.mxu1 %v2238_v44 }
 0x68e   : > { %4986 = vmatpush3.msra.mxu0 %v2253_v43  ;;  %5017 = vmatpush3.msra.mxu1 %v2238_v44 }
 0x68f   : > { %4987 = vmatprep.subr.mxu0 %v2252_v45  ;;  %5018 = vmatprep.subr.mxu1 %v2237_v46 }
 0x690   : > { %4988 = vmatpush3.msra.mxu0 %v2252_v45  ;;  %5019 = vmatpush3.msra.mxu1 %v2237_v46 }
 0x691   : > { %4989 = vmatprep.subr.mxu0 %v2251_v47  ;;  %5020 = vmatprep.subr.mxu1 %v2236_v48 }
 0x692   : > { %4990 = vmatpush3.msra.mxu0 %v2251_v47  ;;  %5021 = vmatpush3.msra.mxu1 %v2236_v48 }
 0x693   : > { %4991 = vmatprep.subr.mxu0 %v2250_v49  ;;  %5022 = vmatprep.subr.mxu1 %v2235_v50 }
 0x694   : > { %4992 = vmatpush3.msra.mxu0 %v2250_v49  ;;  %5023 = vmatpush3.msra.mxu1 %v2235_v50 }
 0x695   : > { %4993 = vmatprep.subr.mxu0 %v2249_v51  ;;  %5024 = vmatprep.subr.mxu1 %v2234_v52 }
 0x696   : > { %4994 = vmatpush3.msra.mxu0 %v2249_v51  ;;  %5025 = vmatpush3.msra.mxu1 %v2234_v52 }
 0x697   : > { %4995 = vmatprep.subr.mxu0 %v2248_v53  ;;  %5026 = vmatprep.subr.mxu1 %v2233_v54 }
 0x698   : > { %4996 = vmatpush3.msra.mxu0 %v2248_v53  ;;  %5027 = vmatpush3.msra.mxu1 %v2233_v54  ;;  %v2673_v53 = vld [vmem:[#allocation2 + $0x678] sm:$0xff]  ;;  %v2672_v54 = vld [vmem:[#allocation2 + $0x670] sm:$0xff] }
 0x699   : > { %4997 = vmatprep.subr.mxu0 %v2247_v55  ;;  %5028 = vmatprep.subr.mxu1 %v2232_v56 }
 0x69a   : > { %4998 = vmatpush3.msra.mxu0 %v2247_v55  ;;  %5029 = vmatpush3.msra.mxu1 %v2232_v56  ;;  %v2671_v55 = vld [vmem:[#allocation2 + $0x668] sm:$0xff]  ;;  %v2670_v56 = vld [vmem:[#allocation2 + $0x660] sm:$0xff] }
 0x69b   : > { %4999 = vmatprep.subr.mxu0 %v2246_v26  ;;  %5030 = vmatprep.subr.mxu1 %v2231_v57 }
 0x69c   : > { %5000 = vmatpush3.msra.mxu0 %v2246_v26  ;;  %5031 = vmatpush3.msra.mxu1 %v2231_v57  ;;  %v2669_v26 = vld [vmem:[#allocation2 + $0x658] sm:$0xff]  ;;  %v2666_v57 = vld [vmem:[#allocation2 + $0x640] sm:$0xff] }
 0x69d   : > { %5001 = vmatprep.subr.mxu0 %v2245_v58  ;;  %5032 = vmatprep.subr.mxu1 %v2230_v59 }
 0x69e   : > { %5002 = vmatpush3.msra.mxu0 %v2245_v58  ;;  %5033 = vmatpush3.msra.mxu1 %v2230_v59  ;;  %v2665_v58 = vld [vmem:[#allocation2 + $0x638] sm:$0xff]  ;;  %v2664_v59 = vld [vmem:[#allocation2 + $0x630] sm:$0xff] }
 0x69f   : > { %5003 = vmatprep.subr.mxu0 %v2244_v60  ;;  %5034 = vmatprep.subr.mxu1 %v2229_v61 }
 0x6a0   : > { %5004 = vmatpush3.msra.mxu0 %v2244_v60  ;;  %5035 = vmatpush3.msra.mxu1 %v2229_v61  ;;  %v2663_v60 = vld [vmem:[#allocation2 + $0x628] sm:$0xff]  ;;  %v2662_v61 = vld [vmem:[#allocation2 + $0x620] sm:$0xff] }
 0x6a1   : > { %5005 = vmatprep.subr.mxu0 %v2243_v62  ;;  %5036 = vmatprep.subr.mxu1 %v2228_v63 }
 0x6a2   : > { %5006 = vmatpush3.msra.mxu0 %v2243_v62  ;;  %5037 = vmatpush3.msra.mxu1 %v2228_v63  ;;  %v2661_v62 = vld [vmem:[#allocation2 + $0x618] sm:$0xff]  ;;  %v2660_v63 = vld [vmem:[#allocation2 + $0x610] sm:$0xff] }
 0x6a3   : > { %5007 = vmatprep.subr.mxu0 %v2242_v0  ;;  %5038 = vmatprep.subr.mxu1 %v2227_v2 }
 0x6a4   : > { %5008 = vmatpush3.msra.mxu0 %v2242_v0  ;;  %5039 = vmatpush3.msra.mxu1 %v2227_v2 }
 0x6a5   : > { %5009 = vmatprep.subr.mxu0 %v2241_v3  ;;  %5040 = vmatprep.subr.mxu1 %v2226_v4 }
 0x6a6   : > { %5010 = vmatpush3.msra.mxu0 %v2241_v3  ;;  %5041 = vmatpush3.msra.mxu1 %v2226_v4  ;;  %v2503_v3 = vsub.s32 7, %v5705_v1 }
 0x6a7   : > { %5012 = vmatmul.mubr.f32.vlgmr.msra.gmra.mxu0 %v5779_v17  ;;  %5042 = vmatprep.subr.mxu1 %v2225_v5  ;;  %v4908_v32 = vpop.f32.mrf.mxu1 }
 0x6a8   : > { %5043 = vmatpush3.msra.mxu1 %v2225_v5  ;;  %5046 = vmatprep.mubr.f32.mxu1 %v5504_v11 }
 0x6a9   : > { %5044 = vmatprep.subr.mxu1 %v2224_v6  ;;  %5049 = vmatprep.subr.mxu0 %v2423_v9  ;;  %v2035_v35 = vpop.f32.mrf.mxu1 }
 0x6aa   : > { %5045 = vmatpush3.msra.mxu1 %v2224_v6  ;;  %5050 = vmatpush3.msra.mxu0 %v2423_v9  ;;  %v2504_v9 = vrot.slane %v5829_v38, %v2503_v3  ;;  %v3109_v3 = vld [vmem:[#allocation2 + $0x7d8] sm:$0xff] }
 0x6ab   : > { %5047 = vmatmul.mubr.f32.vlgmr.msra.gmra.mxu1 %v5505_v19  ;;  %5051 = vmatprep.subr.mxu0 %v2422_v12 }
 0x6ac   : > { %5052 = vmatpush3.msra.mxu0 %v2422_v12  ;;  %5088 = vmatprep.mubr.msk.f32.mxu1 %vm266_vm0, %v5724_v10 }
 0x6ad   : > { %5053 = vmatprep.subr.mxu0 %v2421_v18 }
 0x6ae   : > { %5054 = vmatpush3.msra.mxu0 %v2421_v18 }
 0x6af   : > { %5055 = vmatprep.subr.mxu0 %v2420_v20 }
 0x6b0   : > { %5056 = vmatpush3.msra.mxu0 %v2420_v20 }
 0x6b1   : > { %5057 = vmatprep.subr.mxu0 %v2419_v21 }
 0x6b2   : > { %5058 = vmatpush3.msra.mxu0 %v2419_v21 }
 0x6b3   : > { %5059 = vmatprep.subr.mxu0 %v2418_v8 }
 0x6b4   : > { %5060 = vmatpush3.msra.mxu0 %v2418_v8 }
 0x6b5   : > { %5061 = vmatprep.subr.mxu0 %v2417_v7 }
 0x6b6   : > { %5062 = vmatpush3.msra.mxu0 %v2417_v7  ;;  %v2690_v7 = vld [vmem:[#allocation2 + $0x6f8] sm:$0xff] }
 0x6b7   : > { %5063 = vmatprep.subr.mxu0 %v2416_v22 }
 0x6b8   : > { %5064 = vmatpush3.msra.mxu0 %v2416_v22  ;;  %v2689_v22 = vld [vmem:[#allocation2 + $0x6f0] sm:$0xff] }
 0x6b9   : > { %5065 = vmatprep.subr.mxu0 %v2415_v23 }
 0x6ba   : > { %5066 = vmatpush3.msra.mxu0 %v2415_v23  ;;  %v2688_v23 = vld [vmem:[#allocation2 + $0x6e8] sm:$0xff] }
 0x6bb   : > { %5067 = vmatprep.subr.mxu0 %v2414_v24 }
 0x6bc   : > { %5068 = vmatpush3.msra.mxu0 %v2414_v24  ;;  %v2687_v24 = vld [vmem:[#allocation2 + $0x6e0] sm:$0xff] }
 0x6bd   : > { %5069 = vmatprep.subr.mxu0 %v2413_v25 }
 0x6be   : > { %5070 = vmatpush3.msra.mxu0 %v2413_v25  ;;  %v2686_v25 = vld [vmem:[#allocation2 + $0x6d8] sm:$0xff] }
 0x6bf   : > { %5071 = vmatprep.subr.mxu0 %v2412_v27 }
 0x6c0   : > { %5072 = vmatpush3.msra.mxu0 %v2412_v27  ;;  %v2685_v27 = vld [vmem:[#allocation2 + $0x6d0] sm:$0xff] }
 0x6c1   : > { %5073 = vmatprep.subr.mxu0 %v2411_v28 }
 0x6c2   : > { %5074 = vmatpush3.msra.mxu0 %v2411_v28  ;;  %v2684_v28 = vld [vmem:[#allocation2 + $0x6c8] sm:$0xff] }
 0x6c3   : > { %5075 = vmatprep.subr.mxu0 %v2410_v29 }
 0x6c4   : > { %5076 = vmatpush3.msra.mxu0 %v2410_v29  ;;  %v2683_v29 = vld [vmem:[#allocation2 + $0x6c0] sm:$0xff] }
 0x6c5   : > { %5077 = vmatprep.subr.mxu0 %v2409_v30 }
 0x6c6   : > { %5078 = vmatpush3.msra.mxu0 %v2409_v30  ;;  %v2682_v30 = vld [vmem:[#allocation2 + $0x6b8] sm:$0xff] }
 0x6c7   : > { %5079 = vmatprep.subr.mxu0 %v2408_v31 }
 0x6c8   : > { %5080 = vmatpush3.msra.mxu0 %v2408_v31  ;;  %v2681_v31 = vld [vmem:[#allocation2 + $0x6b0] sm:$0xff] }
 0x6c9   : > { %5133 = vmatprep.subr.mxu0 %v2673_v53 }
 0x747   : > { %v4943_v34 = vpop.f32.mrf.mxu0 }
 0x748   : > { %v2116_v37 = vadd.f32 %v4943_v34, %v4908_v32  ;;  %v2680_v32 = vld [vmem:[#allocation2 + $0x6a8] sm:$0xff]  ;;  %v2678_v34 = vld [vmem:[#allocation2 + $0x698] sm:$0xff] }
 0x749   : > { %v2110_v36 = vpop.f32.mrf.mxu0 }
 0x74a   : > { %v2111_v43 = vadd.f32 %v2110_v36, %v2035_v35  ;;  %v2677_v35 = vld [vmem:[#allocation2 + $0x690] sm:$0xff]  ;;  %v2676_v36 = vld [vmem:[#allocation2 + $0x688] sm:$0xff] }
 0x74b   : > { %v4978_v41 = vpop.f32.mrf.mxu1 }
 0x74c   : > { %v2212_v44 = vadd.f32 %v4978_v41, %v2116_v37  ;;  %v2675_v37 = vld [vmem:[#allocation2 + $0x680] sm:$0xff]  ;;  %v2856_v41 = vld [vmem:[#allocation2 + $0x770] sm:$0xff] }
 0x74d   : > { %v2202_v45 = vpop.f32.mrf.mxu1 }
 0x74e   : > { %v2218_v46 = vadd.f32 %v2216_v39, %v2212_v44  ;;  %v2211_v47 = vadd.f32 %v2202_v45, %v2111_v43  ;;  %v2855_v43 = vld [vmem:[#allocation2 + $0x768] sm:$0xff]  ;;  %v2854_v44 = vld [vmem:[#allocation2 + $0x760] sm:$0xff]  ;;  %v2853_v45 = vld [vmem:[#allocation2 + $0x758] sm:$0xff] }
 0x750   : > { %v2217_v48 = vadd.f32 %v2216_v39, %v2211_v47  ;;  %v2220_v49 = vmul.f32 0.1, %v2218_v46  ;;  %v2857_v39 = vld [vmem:[#allocation2 + $0x778] sm:$0xff]  ;;  %v2852_v46 = vld [vmem:[#allocation2 + $0x750] sm:$0xff]  ;;  %v2851_v47 = vld [vmem:[#allocation2 + $0x748] sm:$0xff] }
 0x752   : > { %v2219_v50 = vmul.f32 0.1, %v2217_v48  ;;  %v5836_v52 = vadd.f32 %v2220_v49, %v5785_v40  ;;  %v2667_v40 = vld [vmem:[#allocation2 + $0x648] sm:$0xff]  ;;  %v2850_v48 = vld [vmem:[#allocation2 + $0x740] sm:$0xff]  ;;  %v2849_v49 = vld [vmem:[#allocation2 + $0x738] sm:$0xff] }
 0x754   : > { %v5833_v51 = vadd.f32 %v2219_v50, %v5787_v42  ;;  %v2668_v42 = vld [vmem:[#allocation2 + $0x650] sm:$0xff] }
 0x755   : > { %v2848_v50 = vld [vmem:[#allocation2 + $0x730] sm:$0xff] }
 0x756   : > { %5081 = vmatprep.mubr.f32.mxu0 %v5833_v51 }
 0x757   : > { %5082 = vmatmul.mubr.f32.vlgmr.msra.gmra.mxu0 %v5836_v52 }
 0x758   : > { %5134 = vmatpush3.msra.mxu0 %v2673_v53  ;;  %v2847_v53 = vld [vmem:[#allocation2 + $0x728] sm:$0xff] }
 0x759   : > { %5135 = vmatprep.subr.mxu0 %v2672_v54 }
 0x75a   : > { %5136 = vmatpush3.msra.mxu0 %v2672_v54  ;;  %v2846_v54 = vld [vmem:[#allocation2 + $0x720] sm:$0xff] }
 0x75b   : > { %5137 = vmatprep.subr.mxu0 %v2671_v55 }
 0x75c   : > { %5138 = vmatpush3.msra.mxu0 %v2671_v55  ;;  %v2659_v55 = vld [vmem:[#allocation2 + $0x608] sm:$0xff] }
 0x75d   : > { %5139 = vmatprep.subr.mxu0 %v2670_v56 }
 0x75e   : > { %5140 = vmatpush3.msra.mxu0 %v2670_v56  ;;  %v2845_v56 = vld [vmem:[#allocation2 + $0x718] sm:$0xff] }
 0x75f   : > { %5141 = vmatprep.subr.mxu0 %v2669_v26 }
 0x760   : > { %5142 = vmatpush3.msra.mxu0 %v2669_v26  ;;  %v2658_v26 = vld [vmem:[#allocation2 + $0x600] sm:$0xff] }
 0x761   : > { %5143 = vmatprep.subr.mxu0 %v2668_v42 }
 0x762   : > { %5144 = vmatpush3.msra.mxu0 %v2668_v42  ;;  %v2844_v42 = vld [vmem:[#allocation2 + $0x710] sm:$0xff] }
 0x763   : > { %5145 = vmatprep.subr.mxu0 %v2667_v40 }
 0x764   : > { %5146 = vmatpush3.msra.mxu0 %v2667_v40  ;;  %v2843_v40 = vld [vmem:[#allocation2 + $0x708] sm:$0xff] }
 0x765   : > { %5147 = vmatprep.subr.mxu0 %v2666_v57 }
 0x766   : > { %5148 = vmatpush3.msra.mxu0 %v2666_v57  ;;  %v2842_v57 = vld [vmem:[#allocation2 + $0x700] sm:$0xff] }
 0x767   : > { %5149 = vmatprep.subr.mxu0 %v2665_v58  ;;  %v5013_v0 = vpop.f32.mrf.mxu0 }
 0x768   : > { %5150 = vmatpush3.msra.mxu0 %v2665_v58 }
 0x769   : > { %5151 = vmatprep.subr.mxu0 %v2664_v59  ;;  %v2323_v4 = vpop.f32.mrf.mxu0 }
 0x76a   : > { %5152 = vmatpush3.msra.mxu0 %v2664_v59 }
 0x76b   : > { %5153 = vmatprep.subr.mxu0 %v2663_v60  ;;  %v5048_v2 = vpop.f32.mrf.mxu1 }
 0x76c   : > { %5154 = vmatpush3.msra.mxu0 %v2663_v60  ;;  %v2404_v6 = vadd.f32 %v5048_v2, %v5013_v0  ;;  %v3111_v0 = vld [vmem:[#allocation2 + $0x7e8] sm:$0xff]  ;;  %v3110_v2 = vld [vmem:[#allocation2 + $0x7e0] sm:$0xff] }
 0x76d   : > { %5155 = vmatprep.subr.mxu0 %v2662_v61  ;;  %v2398_v5 = vpop.f32.mrf.mxu1 }
 0x76e   : > { %5156 = vmatpush3.msra.mxu0 %v2662_v61  ;;  %v2399_v12 = vadd.f32 %v2398_v5, %v2323_v4  ;;  %v3108_v4 = vld [vmem:[#allocation2 + $0x7d0] sm:$0xff]  ;;  %v3106_v5 = vld [vmem:[#allocation2 + $0x7c0] sm:$0xff] }
 0x76f   : > { %5157 = vmatprep.subr.mxu0 %v2661_v62 }
 0x770   : > { %5158 = vmatpush3.msra.mxu0 %v2661_v62  ;;  %v3113_v62 = vld [vmem:[#allocation2 + $0x7f8] sm:$0xff] }
 0x771   : > { %5159 = vmatprep.subr.mxu0 %v2660_v63 }
 0x772   : > { %5160 = vmatpush3.msra.mxu0 %v2660_v63  ;;  %v3112_v63 = vld [vmem:[#allocation2 + $0x7f0] sm:$0xff] }
 0x773   : > { %5161 = vmatprep.subr.mxu0 %v2659_v55 }
 0x774   : > { %5162 = vmatpush3.msra.mxu0 %v2659_v55  ;;  %v3116_v55 = vld [vmem:[#allocation2 + $0x808] sm:$0xff] }
 0x775   : > { %5163 = vmatprep.subr.mxu0 %v2658_v26 }
 0x776   : > { %5164 = vmatpush3.msra.mxu0 %v2658_v26  ;;  %v3297_v26 = vld [vmem:[#allocation2 + $0x8f8] sm:$0xff] }
 0x817   : > { %v5083_v11 = vpop.f32.mrf.mxu0 }
 0x818   : > { %v2500_v18 = vadd.f32 %v5083_v11, %v2404_v6  ;;  %v3105_v6 = vld [vmem:[#allocation2 + $0x7b8] sm:$0xff]  ;;  %v3103_v11 = vld [vmem:[#allocation2 + $0x7a8] sm:$0xff] }
 0x819   : > { %v2490_v19 = vpop.f32.mrf.mxu0 }
 0x81a   : > { %v5842_v20 = vadd.f32 %v2504_v9, %v2500_v18  ;;  %v2499_v21 = vadd.f32 %v2490_v19, %v2399_v12  ;;  %v3102_v12 = vld [vmem:[#allocation2 + $0x7a0] sm:$0xff]  ;;  %v3101_v18 = vld [vmem:[#allocation2 + $0x798] sm:$0xff]  ;;  %v3100_v19 = vld [vmem:[#allocation2 + $0x790] sm:$0xff] }
 0x81c   : > { %v5844_v8 = vadd.f32 %v2504_v9, %v2499_v21  ;;  %5084 = vmatprep.subr.mxu1 %v5842_v20  ;;  %v3104_v9 = vld [vmem:[#allocation2 + $0x7b0] sm:$0xff]  ;;  %v3099_v21 = vld [vmem:[#allocation2 + $0x788] sm:$0xff] }
 0x81d   : > { %5085 = vmatpush3.msra.mxu1 %v5842_v20 }
 0x81e   : > { %5086 = vmatprep.subr.mxu1 %v5844_v8 }
 0x81f   : > { %5087 = vmatpush3.msra.mxu1 %v5844_v8 }
 0x820   : > { %5089 = vmatmul.mubr.msk.f32.vlgmr.msra.gmra.mxu1 %vm266_vm0, %v5730_v13  ;;  %5091 = vmatprep.subr.mxu1 %v5842_v20 }
 0x821   : > { %5092 = vmatpush3.msra.mxu1 %v5842_v20  ;;  %5095 = vmatprep.mubr.msk.f32.mxu1 %vm266_vm0, %v5733_v14 }
 0x822   : > { %5093 = vmatprep.subr.mxu1 %v5844_v8 }
 0x823   : > { %5094 = vmatpush3.msra.mxu1 %v5844_v8 }
 0x824   : > { %5096 = vmatmul.mubr.msk.f32.vlgmr.msra.gmra.mxu1 %vm266_vm0, %v5742_v16  ;;  %5098 = vmatprep.subr.mxu1 %v2690_v7 }
 0x825   : > { %5099 = vmatpush3.msra.mxu1 %v2690_v7  ;;  %5130 = vmatprep.mubr.f32.mxu1 %v5844_v8 }
 0x826   : > { %5100 = vmatprep.subr.mxu1 %v2689_v22 }
 0x827   : > { %5101 = vmatpush3.msra.mxu1 %v2689_v22  ;;  %v2937_v22 = vsub.s32 4, %v5705_v1 }
 0x828   : > { %5102 = vmatprep.subr.mxu1 %v2688_v23 }
 0x829   : > { %5103 = vmatpush3.msra.mxu1 %v2688_v23 }
 0x82a   : > { %5104 = vmatprep.subr.mxu1 %v2687_v24 }
 0x82b   : > { %5105 = vmatpush3.msra.mxu1 %v2687_v24 }
 0x82c   : > { %5106 = vmatprep.subr.mxu1 %v2686_v25 }
 0x82d   : > { %5107 = vmatpush3.msra.mxu1 %v2686_v25 }
 0x82e   : > { %5108 = vmatprep.subr.mxu1 %v2685_v27 }
 0x82f   : > { %5109 = vmatpush3.msra.mxu1 %v2685_v27 }
 0x830   : > { %5110 = vmatprep.subr.mxu1 %v2684_v28 }
 0x831   : > { %5111 = vmatpush3.msra.mxu1 %v2684_v28  ;;  %v2938_v28 = vrot.slane %v5829_v38, %v2937_v22  ;;  %v3130_v38 = vld [vmem:[#allocation2 + $0x878] sm:$0xff] }
 0x832   : > { %5112 = vmatprep.subr.mxu1 %v2683_v29 }
 0x833   : > { %5113 = vmatpush3.msra.mxu1 %v2683_v29 }
 0x834   : > { %5114 = vmatprep.subr.mxu1 %v2682_v30 }
 0x835   : > { %5115 = vmatpush3.msra.mxu1 %v2682_v30 }
 0x836   : > { %5116 = vmatprep.subr.mxu1 %v2681_v31 }
 0x837   : > { %5117 = vmatpush3.msra.mxu1 %v2681_v31 }
 0x838   : > { %5118 = vmatprep.subr.mxu1 %v2680_v32 }
 0x839   : > { %5119 = vmatpush3.msra.mxu1 %v2680_v32 }
 0x83a   : > { %5120 = vmatprep.subr.mxu1 %v2679_v33 }
 0x83b   : > { %5121 = vmatpush3.msra.mxu1 %v2679_v33 }
 0x83c   : > { %5122 = vmatprep.subr.mxu1 %v2678_v34 }
 0x83d   : > { %5123 = vmatpush3.msra.mxu1 %v2678_v34 }
 0x83e   : > { %5124 = vmatprep.subr.mxu1 %v2677_v35 }
 0x83f   : > { %5125 = vmatpush3.msra.mxu1 %v2677_v35 }
 0x840   : > { %5126 = vmatprep.subr.mxu1 %v2676_v36 }
 0x841   : > { %5127 = vmatpush3.msra.mxu1 %v2676_v36 }
 0x842   : > { %5128 = vmatprep.subr.mxu1 %v2675_v37 }
 0x843   : > { %5129 = vmatpush3.msra.mxu1 %v2675_v37 }
 0x844   : > { %5131 = vmatmul.mubr.f32.vlgmr.msra.gmra.mxu1 %v5842_v20  ;;  %5168 = vmatprep.subr.mxu1 %v2857_v39 }
 0x845   : > { %5169 = vmatpush3.msra.mxu1 %v2857_v39 }
 0x846   : > { %5170 = vmatprep.subr.mxu1 %v2856_v41 }
 0x847   : > { %5171 = vmatpush3.msra.mxu1 %v2856_v41 }
 0x848   : > { %5172 = vmatprep.subr.mxu1 %v2855_v43 }
 0x849   : > { %5173 = vmatpush3.msra.mxu1 %v2855_v43  ;;  %v3129_v43 = vld [vmem:[#allocation2 + $0x870] sm:$0xff] }
 0x84a   : > { %5174 = vmatprep.subr.mxu1 %v2854_v44 }
 0x84b   : > { %5175 = vmatpush3.msra.mxu1 %v2854_v44  ;;  %v3128_v44 = vld [vmem:[#allocation2 + $0x868] sm:$0xff] }
 0x84c   : > { %5176 = vmatprep.subr.mxu1 %v2853_v45 }
 0x84d   : > { %5177 = vmatpush3.msra.mxu1 %v2853_v45  ;;  %v3126_v45 = vld [vmem:[#allocation2 + $0x858] sm:$0xff] }
 0x84e   : > { %5178 = vmatprep.subr.mxu1 %v2852_v46 }
 0x84f   : > { %5179 = vmatpush3.msra.mxu1 %v2852_v46  ;;  %v3124_v46 = vld [vmem:[#allocation2 + $0x848] sm:$0xff] }
 0x850   : > { %5180 = vmatprep.subr.mxu1 %v2851_v47 }
 0x851   : > { %5181 = vmatpush3.msra.mxu1 %v2851_v47  ;;  %v3123_v47 = vld [vmem:[#allocation2 + $0x840] sm:$0xff] }
 0x852   : > { %5182 = vmatprep.subr.mxu1 %v2850_v48 }
 0x853   : > { %5183 = vmatpush3.msra.mxu1 %v2850_v48  ;;  %v3121_v48 = vld [vmem:[#allocation2 + $0x830] sm:$0xff] }
 0x854   : > { %5184 = vmatprep.subr.mxu1 %v2849_v49 }
 0x855   : > { %5185 = vmatpush3.msra.mxu1 %v2849_v49  ;;  %v3120_v49 = vld [vmem:[#allocation2 + $0x828] sm:$0xff] }
 0x856   : > { %5186 = vmatprep.subr.mxu1 %v2848_v50 }
 0x857   : > { %5187 = vmatpush3.msra.mxu1 %v2848_v50  ;;  %v3119_v50 = vld [vmem:[#allocation2 + $0x820] sm:$0xff] }
 0x858   : > { %5188 = vmatprep.subr.mxu1 %v2847_v53 }
 0x859   : > { %5189 = vmatpush3.msra.mxu1 %v2847_v53  ;;  %v3118_v53 = vld [vmem:[#allocation2 + $0x818] sm:$0xff] }
 0x85a   : > { %5190 = vmatprep.subr.mxu1 %v2846_v54 }
 0x85b   : > { %5191 = vmatpush3.msra.mxu1 %v2846_v54  ;;  %v3117_v54 = vld [vmem:[#allocation2 + $0x810] sm:$0xff] }
 0x85c   : > { %5192 = vmatprep.subr.mxu1 %v2845_v56 }
 0x85d   : > { %5193 = vmatpush3.msra.mxu1 %v2845_v56  ;;  %v3115_v56 = vld [vmem:[#allocation2 + $0x800] sm:$0xff] }
 0x85e   : > { %5194 = vmatprep.subr.mxu1 %v2844_v42 }
 0x85f   : > { %5195 = vmatpush3.msra.mxu1 %v2844_v42  ;;  %v3296_v42 = vld [vmem:[#allocation2 + $0x8f0] sm:$0xff] }
 0x860   : > { %5196 = vmatprep.subr.mxu1 %v2843_v40 }
 0x861   : > { %5197 = vmatpush3.msra.mxu1 %v2843_v40  ;;  %v3295_v40 = vld [vmem:[#allocation2 + $0x8e8] sm:$0xff] }
 0x862   : > { %5198 = vmatprep.subr.mxu1 %v2842_v57 }
 0x863   : > { %5199 = vmatpush3.msra.mxu1 %v2842_v57  ;;  %v3294_v57 = vld [vmem:[#allocation2 + $0x8e0] sm:$0xff] }
 0x864   : > { %5252 = vmatprep.subr.mxu1 %v3113_v62 }
 0x8e0   : > { %v5090_v58 = vpop.f32.mrf.mxu1 }
 0x8e2   : > { %v2573_v59 = vpop.f32.mrf.mxu1 }
 0x8e3   : > { %5165 = vmatprep.mubr.f32.mxu0 %v2573_v59  ;;  %v3292_v59 = vld [vmem:[#allocation2 + $0x8d0] sm:$0xff] }
 0x8e4   : > { %v5097_v60 = vpop.f32.mrf.mxu1  ;;  %5166 = vmatmul.mubr.f32.vlgmr.msra.gmra.mxu0 %v5090_v58  ;;  %v3293_v58 = vld [vmem:[#allocation2 + $0x8d8] sm:$0xff] }
 0x8e5   : > { %5207 = vmatprep.mubr.msk.f32.mxu0 %vm266_vm0, %v5724_v10  ;;  %v3107_v10 = vld [vmem:[#allocation2 + $0x7c8] sm:$0xff] }
 0x8e6   : > { %v2648_v61 = vpop.f32.mrf.mxu1 }
 0x8e7   : > { %5200 = vmatprep.mubr.f32.mxu1 %v2648_v61  ;;  %v3290_v61 = vld [vmem:[#allocation2 + $0x8c0] sm:$0xff] }
 0x8e8   : > { %5201 = vmatmul.mubr.f32.vlgmr.msra.gmra.mxu1 %v5097_v60  ;;  %v3291_v60 = vld [vmem:[#allocation2 + $0x8c8] sm:$0xff] }
 0x8e9   : > { %5253 = vmatpush3.msra.mxu1 %v3113_v62  ;;  %v3289_v62 = vld [vmem:[#allocation2 + $0x8b8] sm:$0xff] }
 0x8ea   : > { %5254 = vmatprep.subr.mxu1 %v3112_v63 }
 0x8eb   : > { %5255 = vmatpush3.msra.mxu1 %v3112_v63  ;;  %v3288_v63 = vld [vmem:[#allocation2 + $0x8b0] sm:$0xff] }
 0x8ec   : > { %5256 = vmatprep.subr.mxu1 %v3111_v0 }
 0x8ed   : > { %5257 = vmatpush3.msra.mxu1 %v3111_v0  ;;  %v3287_v0 = vld [vmem:[#allocation2 + $0x8a8] sm:$0xff] }
 0x8ee   : > { %5258 = vmatprep.subr.mxu1 %v3110_v2 }
 0x8ef   : > { %5259 = vmatpush3.msra.mxu1 %v3110_v2  ;;  %v3286_v2 = vld [vmem:[#allocation2 + $0x8a0] sm:$0xff] }
 0x8f0   : > { %5260 = vmatprep.subr.mxu1 %v3109_v3 }
 0x8f1   : > { %5261 = vmatpush3.msra.mxu1 %v3109_v3  ;;  %v3285_v3 = vld [vmem:[#allocation2 + $0x898] sm:$0xff] }
 0x8f2   : > { %5262 = vmatprep.subr.mxu1 %v3108_v4 }
 0x8f3   : > { %5263 = vmatpush3.msra.mxu1 %v3108_v4  ;;  %v3098_v4 = vld [vmem:[#allocation2 + $0x780] sm:$0xff] }
 0x8f4   : > { %5264 = vmatprep.subr.mxu1 %v3107_v10 }
 0x8f5   : > { %5265 = vmatpush3.msra.mxu1 %v3107_v10  ;;  %v3284_v10 = vld [vmem:[#allocation2 + $0x890] sm:$0xff] }
 0x8f6   : > { %5266 = vmatprep.subr.mxu1 %v3106_v5 }
 0x8f7   : > { %5267 = vmatpush3.msra.mxu1 %v3106_v5  ;;  %v3283_v5 = vld [vmem:[#allocation2 + $0x888] sm:$0xff] }
 0x8f8   : > { %5268 = vmatprep.subr.mxu1 %v3105_v6 }
 0x8f9   : > { %5269 = vmatpush3.msra.mxu1 %v3105_v6  ;;  %v3418_v6 = vld [vmem:[#allocation4 + $0x378] sm:$0xff] }
 0x8fa   : > { %5270 = vmatprep.subr.mxu1 %v3104_v9 }
 0x8fb   : > { %5271 = vmatpush3.msra.mxu1 %v3104_v9  ;;  %v3282_v9 = vld [vmem:[#allocation2 + $0x880] sm:$0xff] }
 0x8fc   : > { %5272 = vmatprep.subr.mxu1 %v3103_v11 }
 0x8fd   : > { %5273 = vmatpush3.msra.mxu1 %v3103_v11  ;;  %v3401_v11 = vld [vmem:[#allocation4 + $0x2f8] sm:$0xff] }
 0x8fe   : > { %5274 = vmatprep.subr.mxu1 %v3102_v12 }
 0x8ff   : > { %5275 = vmatpush3.msra.mxu1 %v3102_v12 }
 0x900   : > { %5276 = vmatprep.subr.mxu1 %v3101_v18 }
 0x901   : > { %5277 = vmatpush3.msra.mxu1 %v3101_v18 }
 0x902   : > { %5278 = vmatprep.subr.mxu1 %v3100_v19 }
 0x903   : > { %5279 = vmatpush3.msra.mxu1 %v3100_v19  ;;  %v3417_v19 = vld [vmem:[#allocation4 + $0x370] sm:$0xff] }
 0x904   : > { %5280 = vmatprep.subr.mxu1 %v3099_v21  ;;  %v5132_v7 = vpop.f32.mrf.mxu1 }
 0x905   : > { %5281 = vmatpush3.msra.mxu1 %v3099_v21 }
 0x906   : > { %v2757_v24 = vpop.f32.mrf.mxu1  ;;  %5282 = vmatprep.subr.mxu1 %v3098_v4 }
 0x907   : > { %5283 = vmatpush3.msra.mxu1 %v3098_v4  ;;  %v3575_v4 = vld [vmem:[#allocation4 + $0x3a8] sm:$0xff] }
 0x908   : > { %5322 = vmatprep.subr.mxu1 %v3418_v6 }
 0x9a4   : > { %v5167_v23 = vpop.f32.mrf.mxu0 }
 0x9a5   : > { %v2838_v27 = vadd.f32 %v5167_v23, %v5132_v7  ;;  %v3416_v7 = vld [vmem:[#allocation4 + $0x368] sm:$0xff]  ;;  %v3415_v23 = vld [vmem:[#allocation4 + $0x360] sm:$0xff] }
 0x9a6   : > { %v2832_v25 = vpop.f32.mrf.mxu0 }
 0x9a7   : > { %v2833_v30 = vadd.f32 %v2832_v25, %v2757_v24  ;;  %v3400_v24 = vld [vmem:[#allocation4 + $0x2f0] sm:$0xff]  ;;  %v3414_v25 = vld [vmem:[#allocation4 + $0x358] sm:$0xff] }
 0x9a8   : > { %v5202_v29 = vpop.f32.mrf.mxu1 }
 0x9a9   : > { %v2934_v31 = vadd.f32 %v5202_v29, %v2838_v27  ;;  %v3399_v27 = vld [vmem:[#allocation4 + $0x2e8] sm:$0xff]  ;;  %v3398_v29 = vld [vmem:[#allocation4 + $0x2e0] sm:$0xff] }
 0x9aa   : > { %v2924_v32 = vpop.f32.mrf.mxu1 }
 0x9ab   : > { %v2940_v33 = vadd.f32 %v2938_v28, %v2934_v31  ;;  %v2933_v34 = vadd.f32 %v2924_v32, %v2833_v30  ;;  %v3397_v30 = vld [vmem:[#allocation4 + $0x2d8] sm:$0xff]  ;;  %v3411_v31 = vld [vmem:[#allocation4 + $0x340] sm:$0xff]  ;;  %v3396_v32 = vld [vmem:[#allocation4 + $0x2d0] sm:$0xff] }
 0x9ad   : > { %vm2942_vm9 = vcmp.ge.f32.partialorder %v2940_v33, 0.0  ;;  %v2944_v35 = vmul.f32 0.01, %v2940_v33  ;;  %v2939_v36 = vadd.f32 %v2938_v28, %v2933_v34  ;;  %v3413_v28 = vld [vmem:[#allocation4 + $0x350] sm:$0xff]  ;;  %v3395_v34 = vld [vmem:[#allocation4 + $0x2c8] sm:$0xff] }
 0x9af   : > { %vm2941_vm10 = vcmp.ge.f32.partialorder %v2939_v36, 0.0  ;;  %v2943_v37 = vmul.f32 0.01, %v2939_v36  ;;  %v5866_v39 = vsel %vm2942_vm9, %v2940_v33, %v2944_v35  ;;  %v3410_v33 = vld [vmem:[#allocation4 + $0x338] sm:$0xff]  ;;  %v3409_v35 = vld [vmem:[#allocation4 + $0x330] sm:$0xff] }
 0x9b0   : > { %5203 = vmatprep.subr.mxu0 %v5866_v39 }
 0x9b1   : > { %5204 = vmatpush3.msra.mxu0 %v5866_v39  ;;  %v2945_v41 = vsel %vm2941_vm10, %v2939_v36, %v2943_v37  ;;  %v3394_v36 = vld [vmem:[#allocation4 + $0x2c0] sm:$0xff]  ;;  %v3408_v37 = vld [vmem:[#allocation4 + $0x328] sm:$0xff] }
 0x9b2   : > { %5205 = vmatprep.subr.mxu0 %v2945_v41 }
 0x9b3   : > { %5206 = vmatpush3.msra.mxu0 %v2945_v41 }
 0x9b4   : > { %5208 = vmatmul.mubr.msk.f32.vlgmr.msra.gmra.mxu0 %vm266_vm0, %v5730_v13  ;;  %5210 = vmatprep.subr.mxu0 %v5866_v39  ;;  %v3127_v13 = vld [vmem:[#allocation2 + $0x860] sm:$0xff] }
 0x9b5   : > { %5211 = vmatpush3.msra.mxu0 %v5866_v39  ;;  %5214 = vmatprep.mubr.msk.f32.mxu0 %vm266_vm0, %v5733_v14  ;;  %v3125_v14 = vld [vmem:[#allocation2 + $0x850] sm:$0xff] }
 0x9b6   : > { %5212 = vmatprep.subr.mxu0 %v2945_v41 }
 0x9b7   : > { %5213 = vmatpush3.msra.mxu0 %v2945_v41 }
 0x9b8   : > { %5215 = vmatmul.mubr.msk.f32.vlgmr.msra.gmra.mxu0 %vm266_vm0, %v5742_v16  ;;  %5217 = vmatprep.subr.mxu0 %v3130_v38  ;;  %v3122_v16 = vld [vmem:[#allocation2 + $0x838] sm:$0xff] }
 0x9b9   : > { %5218 = vmatpush3.msra.mxu0 %v3130_v38  ;;  %5249 = vmatprep.mubr.f32.mxu0 %v2945_v41  ;;  %v3407_v41 = vld [vmem:[#allocation4 + $0x320] sm:$0xff]  ;;  %v3392_v38 = vld [vmem:[#allocation4 + $0x2b0] sm:$0xff] }
 0x9ba   : > { %5219 = vmatprep.subr.mxu0 %v3129_v43 }
 0x9bb   : > { %5220 = vmatpush3.msra.mxu0 %v3129_v43  ;;  %v3406_v43 = vld [vmem:[#allocation4 + $0x318] sm:$0xff] }
 0x9bc   : > { %5221 = vmatprep.subr.mxu0 %v3128_v44 }
 0x9bd   : > { %5222 = vmatpush3.msra.mxu0 %v3128_v44  ;;  %v3391_v44 = vld [vmem:[#allocation4 + $0x2a8] sm:$0xff] }
 0x9be   : > { %5223 = vmatprep.subr.mxu0 %v3127_v13 }
 0x9bf   : > { %5224 = vmatpush3.msra.mxu0 %v3127_v13  ;;  %v3405_v13 = vld [vmem:[#allocation4 + $0x310] sm:$0xff] }
 0x9c0   : > { %5225 = vmatprep.subr.mxu0 %v3126_v45 }
 0x9c1   : > { %5226 = vmatpush3.msra.mxu0 %v3126_v45  ;;  %v3390_v45 = vld [vmem:[#allocation4 + $0x2a0] sm:$0xff] }
 0x9c2   : > { %5227 = vmatprep.subr.mxu0 %v3125_v14 }
 0x9c3   : > { %5228 = vmatpush3.msra.mxu0 %v3125_v14  ;;  %v3404_v14 = vld [vmem:[#allocation4 + $0x308] sm:$0xff] }
 0x9c4   : > { %5229 = vmatprep.subr.mxu0 %v3124_v46 }
 0x9c5   : > { %5230 = vmatpush3.msra.mxu0 %v3124_v46  ;;  %v3389_v46 = vld [vmem:[#allocation4 + $0x298] sm:$0xff] }
 0x9c6   : > { %5231 = vmatprep.subr.mxu0 %v3123_v47 }
 0x9c7   : > { %5232 = vmatpush3.msra.mxu0 %v3123_v47  ;;  %v3403_v47 = vld [vmem:[#allocation4 + $0x300] sm:$0xff] }
 0x9c8   : > { %5233 = vmatprep.subr.mxu0 %v3122_v16 }
 0x9c9   : > { %5234 = vmatpush3.msra.mxu0 %v3122_v16  ;;  %v3388_v16 = vld [vmem:[#allocation4 + $0x290] sm:$0xff] }
 0x9ca   : > { %5235 = vmatprep.subr.mxu0 %v3121_v48 }
 0x9cb   : > { %5236 = vmatpush3.msra.mxu0 %v3121_v48  ;;  %v3387_v48 = vld [vmem:[#allocation4 + $0x288] sm:$0xff] }
 0x9cc   : > { %5237 = vmatprep.subr.mxu0 %v3120_v49 }
 0x9cd   : > { %5238 = vmatpush3.msra.mxu0 %v3120_v49  ;;  %v3585_v49 = vld [vmem:[#allocation4 + $0x3f8] sm:$0xff] }
 0x9ce   : > { %5239 = vmatprep.subr.mxu0 %v3119_v50 }
 0x9cf   : > { %5240 = vmatpush3.msra.mxu0 %v3119_v50  ;;  %v3386_v50 = vld [vmem:[#allocation4 + $0x280] sm:$0xff] }
 0x9d0   : > { %5241 = vmatprep.subr.mxu0 %v3118_v53 }
 0x9d1   : > { %5242 = vmatpush3.msra.mxu0 %v3118_v53  ;;  %v3584_v53 = vld [vmem:[#allocation4 + $0x3f0] sm:$0xff] }
 0x9d2   : > { %5243 = vmatprep.subr.mxu0 %v3117_v54 }
 0x9d3   : > { %5244 = vmatpush3.msra.mxu0 %v3117_v54  ;;  %v3583_v54 = vld [vmem:[#allocation4 + $0x3e8] sm:$0xff] }
 0x9d4   : > { %5245 = vmatprep.subr.mxu0 %v3116_v55 }
 0x9d5   : > { %5246 = vmatpush3.msra.mxu0 %v3116_v55  ;;  %v3679_v55 = vld [vmem:[#allocation4 + $0x478] sm:$0xff] }
 0x9d6   : > { %5247 = vmatprep.subr.mxu0 %v3115_v56 }
 0x9d7   : > { %5248 = vmatpush3.msra.mxu0 %v3115_v56  ;;  %v5507_v56 = vld [vmem:[%s5715_s13] sm:$0xff] }
 0x9d8   : > { %5250 = vmatmul.mubr.f32.vlgmr.msra.gmra.mxu0 %v5866_v39  ;;  %5287 = vmatprep.subr.mxu0 %v3297_v26  ;;  %v3393_v39 = vld [vmem:[#allocation4 + $0x2b8] sm:$0xff] }
 0x9d9   : > { %5288 = vmatpush3.msra.mxu0 %v3297_v26  ;;  %v5508_v26 = vld [vmem:[%s5715_s13 + $0x8] sm:$0xff] }
 0x9da   : > { %5289 = vmatprep.subr.mxu0 %v3296_v42 }
 0x9db   : > { %5290 = vmatpush3.msra.mxu0 %v3296_v42  ;;  %v3678_v42 = vld [vmem:[#allocation4 + $0x470] sm:$0xff] }
 0x9dc   : > { %5291 = vmatprep.subr.mxu0 %v3295_v40 }
 0x9dd   : > { %5292 = vmatpush3.msra.mxu0 %v3295_v40  ;;  %v3581_v40 = vld [vmem:[#allocation4 + $0x3d8] sm:$0xff] }
 0x9de   : > { %5293 = vmatprep.subr.mxu0 %v3294_v57 }
 0x9df   : > { %5294 = vmatpush3.msra.mxu0 %v3294_v57  ;;  %v3677_v57 = vld [vmem:[#allocation4 + $0x468] sm:$0xff] }
 0x9e0   : > { %5295 = vmatprep.subr.mxu0 %v3293_v58 }
 0x9e1   : > { %5296 = vmatpush3.msra.mxu0 %v3293_v58  ;;  %v3676_v58 = vld [vmem:[#allocation4 + $0x460] sm:$0xff] }
 0x9e2   : > { %5297 = vmatprep.subr.mxu0 %v3292_v59 }
 0x9e3   : > { %5298 = vmatpush3.msra.mxu0 %v3292_v59  ;;  %v3579_v59 = vld [vmem:[#allocation4 + $0x3c8] sm:$0xff] }
 0x9e4   : > { %5299 = vmatprep.subr.mxu0 %v3291_v60 }
 0x9e5   : > { %5300 = vmatpush3.msra.mxu0 %v3291_v60  ;;  %v3675_v60 = vld [vmem:[#allocation4 + $0x458] sm:$0xff] }
 0x9e6   : > { %5301 = vmatprep.subr.mxu0 %v3290_v61 }
 0x9e7   : > { %5302 = vmatpush3.msra.mxu0 %v3290_v61  ;;  %v3578_v61 = vld [vmem:[#allocation4 + $0x3c0] sm:$0xff] }
 0x9e8   : > { %5303 = vmatprep.subr.mxu0 %v3289_v62 }
 0x9e9   : > { %5304 = vmatpush3.msra.mxu0 %v3289_v62  ;;  %v3674_v62 = vld [vmem:[#allocation4 + $0x450] sm:$0xff] }
 0x9ea   : > { %5305 = vmatprep.subr.mxu0 %v3288_v63 }
 0x9eb   : > { %5306 = vmatpush3.msra.mxu0 %v3288_v63  ;;  %v3577_v63 = vld [vmem:[#allocation4 + $0x3b8] sm:$0xff] }
 0x9ec   : > { %5307 = vmatprep.subr.mxu0 %v3287_v0 }
 0x9ed   : > { %5308 = vmatpush3.msra.mxu0 %v3287_v0  ;;  %v3673_v0 = vld [vmem:[#allocation4 + $0x448] sm:$0xff] }
 0x9ee   : > { %5309 = vmatprep.subr.mxu0 %v3286_v2 }
 0x9ef   : > { %5310 = vmatpush3.msra.mxu0 %v3286_v2  ;;  %v3576_v2 = vld [vmem:[#allocation4 + $0x3b0] sm:$0xff] }
 0x9f0   : > { %5311 = vmatprep.subr.mxu0 %v3285_v3 }
 0x9f1   : > { %5312 = vmatpush3.msra.mxu0 %v3285_v3  ;;  %v3672_v3 = vld [vmem:[#allocation4 + $0x440] sm:$0xff] }
 0x9f2   : > { %5313 = vmatprep.subr.mxu0 %v3284_v10 }
 0x9f3   : > { %5314 = vmatpush3.msra.mxu0 %v3284_v10  ;;  %v3574_v10 = vld [vmem:[#allocation4 + $0x3a0] sm:$0xff] }
 0x9f4   : > { %5315 = vmatprep.subr.mxu0 %v3283_v5 }
 0x9f5   : > { %5316 = vmatpush3.msra.mxu0 %v3283_v5  ;;  %v3573_v5 = vld [vmem:[#allocation4 + $0x398] sm:$0xff] }
 0x9f6   : > { %5317 = vmatprep.subr.mxu0 %v3282_v9 }
 0x9f7   : > { %5318 = vmatpush3.msra.mxu0 %v3282_v9  ;;  %v3571_v9 = vld [vmem:[#allocation4 + $0x388] sm:$0xff] }
 0x9f8   : > { %5357 = vmatprep.subr.mxu0 %v3401_v11 }
 0xa74   : > { %v5209_v12 = vpop.f32.mrf.mxu0 }
 0xa76   : > { %v3013_v18 = vpop.f32.mrf.mxu0 }
 0xa77   : > { %5284 = vmatprep.mubr.f32.mxu1 %v3013_v18  ;;  %v3670_v18 = vld [vmem:[#allocation4 + $0x430] sm:$0xff] }
 0xa78   : > { %v5216_v21 = vpop.f32.mrf.mxu0  ;;  %5285 = vmatmul.mubr.f32.vlgmr.msra.gmra.mxu1 %v5209_v12  ;;  %v3671_v12 = vld [vmem:[#allocation4 + $0x438] sm:$0xff] }
 0xa79   : > { %5323 = vmatpush3.msra.mxu1 %v3418_v6  ;;  %5354 = vmatprep.mubr.f32.mxu1 %v5776_v15  ;;  %v3412_v15 = vld [vmem:[#allocation4 + $0x348] sm:$0xff]  ;;  %v3572_v6 = vld [vmem:[#allocation4 + $0x390] sm:$0xff] }
 0xa7a   : > { %5324 = vmatprep.subr.mxu1 %v3417_v19  ;;  %v3088_v22 = vpop.f32.mrf.mxu0 }
 0xa7b   : > { %5325 = vmatpush3.msra.mxu1 %v3417_v19  ;;  %5319 = vmatprep.mubr.f32.mxu0 %v3088_v22  ;;  %v3669_v19 = vld [vmem:[#allocation4 + $0x428] sm:$0xff]  ;;  %v3666_v22 = vld [vmem:[#allocation4 + $0x410] sm:$0xff] }
 0xa7c   : > { %5326 = vmatprep.subr.mxu1 %v3416_v7  ;;  %5320 = vmatmul.mubr.f32.vlgmr.msra.gmra.mxu0 %v5216_v21  ;;  %v3668_v21 = vld [vmem:[#allocation4 + $0x420] sm:$0xff] }
 0xa7d   : > { %5327 = vmatpush3.msra.mxu1 %v3416_v7  ;;  %5358 = vmatpush3.msra.mxu0 %v3401_v11  ;;  %v3570_v11 = vld [vmem:[#allocation4 + $0x380] sm:$0xff]  ;;  %v3667_v7 = vld [vmem:[#allocation4 + $0x418] sm:$0xff] }
 0xa7e   : > { %5328 = vmatprep.subr.mxu1 %v3415_v23  ;;  %5359 = vmatprep.subr.mxu0 %v3400_v24 }
 0xa7f   : > { %5329 = vmatpush3.msra.mxu1 %v3415_v23  ;;  %5360 = vmatpush3.msra.mxu0 %v3400_v24  ;;  %v3665_v23 = vld [vmem:[#allocation4 + $0x408] sm:$0xff]  ;;  %v3664_v24 = vld [vmem:[#allocation4 + $0x400] sm:$0xff] }
 0xa80   : > { %5330 = vmatprep.subr.mxu1 %v3414_v25  ;;  %5361 = vmatprep.subr.mxu0 %v3399_v27 }
 0xa81   : > { %5331 = vmatpush3.msra.mxu1 %v3414_v25  ;;  %5362 = vmatpush3.msra.mxu0 %v3399_v27  ;;  %v3377_v25 = vsub.s32 5, %v5705_v1 }
 0xa82   : > { %5332 = vmatprep.subr.mxu1 %v3413_v28  ;;  %5363 = vmatprep.subr.mxu0 %v3398_v29 }
 0xa83   : > { %5333 = vmatpush3.msra.mxu1 %v3413_v28  ;;  %5364 = vmatpush3.msra.mxu0 %v3398_v29 }
 0xa84   : > { %5334 = vmatprep.subr.mxu1 %v3412_v15  ;;  %5365 = vmatprep.subr.mxu0 %v3397_v30 }
 0xa85   : > { %5335 = vmatpush3.msra.mxu1 %v3412_v15  ;;  %5366 = vmatpush3.msra.mxu0 %v3397_v30  ;;  %v5509_v30 = vld [vmem:[#allocation6] sm:$0xff] }
 0xa86   : > { %5336 = vmatprep.subr.mxu1 %v3411_v31  ;;  %5367 = vmatprep.subr.mxu0 %v3396_v32 }
 0xa87   : > { %5337 = vmatpush3.msra.mxu1 %v3411_v31  ;;  %5368 = vmatpush3.msra.mxu0 %v3396_v32  ;;  %v3378_v31 = vrot.slane %v5509_v30, %v3377_v25 }
 0xa88   : > { %5338 = vmatprep.subr.mxu1 %v3410_v33  ;;  %5369 = vmatprep.subr.mxu0 %v3395_v34 }
 0xa89   : > { %5339 = vmatpush3.msra.mxu1 %v3410_v33  ;;  %5370 = vmatpush3.msra.mxu0 %v3395_v34 }
 0xa8a   : > { %5340 = vmatprep.subr.mxu1 %v3409_v35  ;;  %5371 = vmatprep.subr.mxu0 %v3394_v36 }
 0xa8b   : > { %5341 = vmatpush3.msra.mxu1 %v3409_v35  ;;  %5372 = vmatpush3.msra.mxu0 %v3394_v36 }
 0xa8c   : > { %5342 = vmatprep.subr.mxu1 %v3408_v37  ;;  %5373 = vmatprep.subr.mxu0 %v3393_v39 }
 0xa8d   : > { %5343 = vmatpush3.msra.mxu1 %v3408_v37  ;;  %5374 = vmatpush3.msra.mxu0 %v3393_v39 }
 0xa8e   : > { %5344 = vmatprep.subr.mxu1 %v3407_v41  ;;  %5375 = vmatprep.subr.mxu0 %v3392_v38 }
 0xa8f   : > { %5345 = vmatpush3.msra.mxu1 %v3407_v41  ;;  %5376 = vmatpush3.msra.mxu0 %v3392_v38 }
 0xa90   : > { %5346 = vmatprep.subr.mxu1 %v3406_v43  ;;  %5377 = vmatprep.subr.mxu0 %v3391_v44 }
 0xa91   : > { %5347 = vmatpush3.msra.mxu1 %v3406_v43  ;;  %5378 = vmatpush3.msra.mxu0 %v3391_v44 }
 0xa92   : > { %5348 = vmatprep.subr.mxu1 %v3405_v13  ;;  %5379 = vmatprep.subr.mxu0 %v3390_v45 }
 0xa93   : > { %5349 = vmatpush3.msra.mxu1 %v3405_v13  ;;  %5380 = vmatpush3.msra.mxu0 %v3390_v45 }
 0xa94   : > { %5350 = vmatprep.subr.mxu1 %v3404_v14  ;;  %5381 = vmatprep.subr.mxu0 %v3389_v46 }
 0xa95   : > { %5351 = vmatpush3.msra.mxu1 %v3404_v14  ;;  %5382 = vmatpush3.msra.mxu0 %v3389_v46 }
 0xa96   : > { %5352 = vmatprep.subr.mxu1 %v3403_v47  ;;  %5383 = vmatprep.subr.mxu0 %v3388_v16 }
 0xa97   : > { %5353 = vmatpush3.msra.mxu1 %v3403_v47  ;;  %5384 = vmatpush3.msra.mxu0 %v3388_v16 }
 0xa98   : > { %5355 = vmatmul.mubr.f32.vlgmr.msra.gmra.mxu1 %v5779_v17  ;;  %5385 = vmatprep.subr.mxu0 %v3387_v48  ;;  %v3582_v17 = vld [vmem:[#allocation4 + $0x3e0] sm:$0xff] }
 0xa99   : > { %5392 = vmatprep.subr.mxu1 %v3585_v49  ;;  %5386 = vmatpush3.msra.mxu0 %v3387_v48 }
 0xa9a   : > { %5393 = vmatpush3.msra.mxu1 %v3585_v49  ;;  %5424 = vmatprep.mubr.f32.mxu1 %v5833_v51  ;;  %v3580_v51 = vld [vmem:[#allocation4 + $0x3d0] sm:$0xff] }
 0xa9b   : > { %5387 = vmatprep.subr.mxu0 %v3386_v50  ;;  %5394 = vmatprep.subr.mxu1 %v3584_v53 }
 0xa9c   : > { %5388 = vmatpush3.msra.mxu0 %v3386_v50  ;;  %5389 = vmatprep.mubr.f32.mxu0 %v5507_v56  ;;  %v3894_v50 = vld [vmem:[#allocation6 + $0x8] ss:$0 sm:$0xff] }
 0xa9d   : > { %5395 = vmatpush3.msra.mxu1 %v3584_v53  ;;  %5390 = vmatmul.mubr.f32.vlgmr.msra.gmra.mxu0 %v5508_v26 }
 0xa9e   : > { %5396 = vmatprep.subr.mxu1 %v3583_v54  ;;  %5427 = vmatprep.subr.mxu0 %v3679_v55 }
 0xa9f   : > { %5397 = vmatpush3.msra.mxu1 %v3583_v54  ;;  %5428 = vmatpush3.msra.mxu0 %v3679_v55 }
 0xaa0   : > { %5398 = vmatprep.subr.mxu1 %v3582_v17  ;;  %5429 = vmatprep.subr.mxu0 %v3678_v42 }
 0xaa1   : > { %5399 = vmatpush3.msra.mxu1 %v3582_v17  ;;  %5430 = vmatpush3.msra.mxu0 %v3678_v42 }
 0xaa2   : > { %5400 = vmatprep.subr.mxu1 %v3581_v40  ;;  %5431 = vmatprep.subr.mxu0 %v3677_v57 }
 0xaa3   : > { %5401 = vmatpush3.msra.mxu1 %v3581_v40  ;;  %5432 = vmatpush3.msra.mxu0 %v3677_v57 }
 0xaa4   : > { %5402 = vmatprep.subr.mxu1 %v3580_v51  ;;  %5433 = vmatprep.subr.mxu0 %v3676_v58 }
 0xaa5   : > { %5403 = vmatpush3.msra.mxu1 %v3580_v51  ;;  %5434 = vmatpush3.msra.mxu0 %v3676_v58 }
 0xaa6   : > { %5404 = vmatprep.subr.mxu1 %v3579_v59  ;;  %5435 = vmatprep.subr.mxu0 %v3675_v60 }
 0xaa7   : > { %5405 = vmatpush3.msra.mxu1 %v3579_v59  ;;  %5436 = vmatpush3.msra.mxu0 %v3675_v60 }
 0xaa8   : > { %5406 = vmatprep.subr.mxu1 %v3578_v61  ;;  %5437 = vmatprep.subr.mxu0 %v3674_v62 }
 0xaa9   : > { %5407 = vmatpush3.msra.mxu1 %v3578_v61  ;;  %5438 = vmatpush3.msra.mxu0 %v3674_v62 }
 0xaaa   : > { %5408 = vmatprep.subr.mxu1 %v3577_v63  ;;  %5439 = vmatprep.subr.mxu0 %v3673_v0 }
 0xaab   : > { %5409 = vmatpush3.msra.mxu1 %v3577_v63  ;;  %5440 = vmatpush3.msra.mxu0 %v3673_v0 }
 0xaac   : > { %5410 = vmatprep.subr.mxu1 %v3576_v2  ;;  %5441 = vmatprep.subr.mxu0 %v3672_v3 }
 0xaad   : > { %5411 = vmatpush3.msra.mxu1 %v3576_v2  ;;  %5442 = vmatpush3.msra.mxu0 %v3672_v3 }
 0xaae   : > { %5412 = vmatprep.subr.mxu1 %v3575_v4  ;;  %5443 = vmatprep.subr.mxu0 %v3671_v12 }
 0xaaf   : > { %5413 = vmatpush3.msra.mxu1 %v3575_v4  ;;  %5444 = vmatpush3.msra.mxu0 %v3671_v12 }
 0xab0   : > { %5414 = vmatprep.subr.mxu1 %v3574_v10  ;;  %5445 = vmatprep.subr.mxu0 %v3670_v18 }
 0xab1   : > { %5415 = vmatpush3.msra.mxu1 %v3574_v10  ;;  %5446 = vmatpush3.msra.mxu0 %v3670_v18 }
 0xab2   : > { %5416 = vmatprep.subr.mxu1 %v3573_v5  ;;  %5447 = vmatprep.subr.mxu0 %v3669_v19 }
 0xab3   : > { %5417 = vmatpush3.msra.mxu1 %v3573_v5  ;;  %5448 = vmatpush3.msra.mxu0 %v3669_v19 }
 0xab4   : > { %5418 = vmatprep.subr.mxu1 %v3572_v6  ;;  %5449 = vmatprep.subr.mxu0 %v3668_v21 }
 0xab5   : > { %5419 = vmatpush3.msra.mxu1 %v3572_v6  ;;  %5450 = vmatpush3.msra.mxu0 %v3668_v21 }
 0xab6   : > { %5420 = vmatprep.subr.mxu1 %v3571_v9  ;;  %5451 = vmatprep.subr.mxu0 %v3667_v7 }
 0xab7   : > { %5421 = vmatpush3.msra.mxu1 %v3571_v9  ;;  %5452 = vmatpush3.msra.mxu0 %v3667_v7 }
 0xab8   : > { %5422 = vmatprep.subr.mxu1 %v3570_v11  ;;  %5453 = vmatprep.subr.mxu0 %v3666_v22 }
 0xab9   : > { %5423 = vmatpush3.msra.mxu1 %v3570_v11  ;;  %5454 = vmatpush3.msra.mxu0 %v3666_v22 }
 0xaba   : > { %5425 = vmatmul.mubr.f32.vlgmr.msra.gmra.mxu1 %v5836_v52  ;;  %5455 = vmatprep.subr.mxu0 %v3665_v23  ;;  %v5251_v52 = vpop.f32.mrf.mxu0 }
 0xabb   : > { %5456 = vmatpush3.msra.mxu0 %v3665_v23 }
 0xabc   : > { %5457 = vmatprep.subr.mxu0 %v3664_v24  ;;  %v3197_v28 = vpop.f32.mrf.mxu0 }
 0xabd   : > { %5458 = vmatpush3.msra.mxu0 %v3664_v24 }
 0xb38   : > { %v5286_v27 = vpop.f32.mrf.mxu1 }
 0xb39   : > { %v3278_v15 = vadd.f32 %v5286_v27, %v5251_v52 }
 0xb3a   : > { %v3272_v29 = vpop.f32.mrf.mxu1 }
 0xb3b   : > { %v3273_v33 = vadd.f32 %v3272_v29, %v3197_v28 }
 0xb3c   : > { %v5321_v32 = vpop.f32.mrf.mxu0 }
 0xb3d   : > { %v3374_v34 = vadd.f32 %v5321_v32, %v3278_v15 }
 0xb3e   : > { %v3364_v35 = vpop.f32.mrf.mxu0 }
 0xb3f   : > { %v3380_v36 = vadd.f32 %v3378_v31, %v3374_v34  ;;  %v3373_v37 = vadd.f32 %v3364_v35, %v3273_v33 }
 0xb41   : > { %v3379_v39 = vadd.f32 %v3378_v31, %v3373_v37  ;;  %v3382_v41 = vmul.f32 0.1, %v3380_v36 }
 0xb43   : > { %v3381_v38 = vmul.f32 0.1, %v3379_v39  ;;  %v3384_v44 = vadd.f32 %v3382_v41, %v5842_v20 }
 0xb45   : > { %v3383_v43 = vadd.f32 %v3381_v38, %v5844_v8 }
 0xb47   : > { %5459 = vmatprep.mubr.f32.mxu0 %v3383_v43 }
 0xb48   : > { %5460 = vmatmul.mubr.f32.vlgmr.msra.gmra.mxu0 %v3384_v44 }
 0xb58   : > { %v5356_v1 = vpop.f32.mrf.mxu1 }
 0xb5a   : > { %v3485_v13 = vpop.f32.mrf.mxu1 }
 0xb5d   : > { %v5391_v45 = vpop.f32.mrf.mxu0 }
 0xb5e   : > { %v3566_v47 = vadd.f32 %v5391_v45, %v5356_v1 }
 0xb5f   : > { %v3560_v46 = vpop.f32.mrf.mxu0 }
 0xb60   : > { %v3561_v48 = vadd.f32 %v3560_v46, %v3485_v13 }
 0xb7a   : > { %v5426_v14 = vpop.f32.mrf.mxu1 }
 0xb7b   : > { %v3662_v49 = vadd.f32 %v5426_v14, %v3566_v47 }
 0xb7c   : > { %v3652_v16 = vpop.f32.mrf.mxu1 }
 0xb7d   : > { %v3661_v54 = vadd.f32 %v3652_v16, %v3561_v48 }
 0xc08   : > { %v5461_v53 = vpop.f32.mrf.mxu0 }
 0xc09   : > { %v3756_v55 = vadd.f32 %v5461_v53, %v3662_v49 }
 0xc0a   : > { %v3746_v20 = vpop.f32.mrf.mxu0 }
 0xc0b   : > { %v3762_v8 = vadd.f32 %v3894_v50, %v3756_v55  ;;  %v3755_v56 = vadd.f32 %v3746_v20, %v3661_v54 }
 0xc0d   : > { %3764 = vst [vmem:[%s241_s18 + $0x8] sm:$0xff] %v3762_v8  ;;  %v3761_v26 = vadd.f32 %v3894_v50, %v3755_v56 }
 0xc0f   : > { %3763 = vst [vmem:[%s241_s18] sm:$0xff] %v3761_v26 }
 0xc10 PF: > { %s16_s15 = sadd.s32 1, %s5602_s15  }
 0xc11   : > { %p13_p2 = scmp.ge.s32.totalorder %s16_s15, 4  }
 0xc13   :  { %15 = sbr.rel (!%p13_p2) target bundleno = 2 (0x2), region = 104 }
 0xc18   :  { %3786 = vsyncpa [#allocation3], 1 }
 0xc19   :  { %3788 = vsyncpa [#allocation3 + $0x1], 1 }
 0xc1a   :  { %3789 = vsyncpa [#allocation5], 1 }

</bundles_post_ra>
